<compile_context>
chip_gen: v7x
topology: tpu7x:2x2x1
jax: 0.10.0
libtpu: 0.0.40
codegen_flags: <defaults>
</compile_context>

<pallas_src>
import functools

import jax
import jax.numpy as jnp
from jax import lax
from jax.experimental import pallas as pl
from jax.experimental.pallas import tpu as pltpu

# ----------------------- small CLIP config (synthetic) -----------------------
D = 32          # hidden size
HEADS = 2
DH = D // HEADS
LAYERS = 2
MLP = 64        # intermediate size
PROJ = 16       # projection_dim (shared by visual / text projection)
IMG = 16        # image height = width
PATCH = 8
C_IN = 3
NPATCH = (IMG // PATCH) ** 2       # 4
VSEQ = NPATCH + 1                  # 5  (CLS + patches)
VOCAB = 64
TSEQ = 8
EPS = 1e-5


# ------------------------------ in-kernel helpers ------------------------------


def _ln(x, g, b):
    """LayerNorm over the last axis. x: (M, N) f32; g, b: (1, N) f32."""
    mu = jnp.mean(x, axis=-1, keepdims=True)
    xc = x - mu
    var = jnp.mean(xc * xc, axis=-1, keepdims=True)
    return xc * lax.rsqrt(var + EPS) * g + b


def _mm(a_f32, w_bf16):
    """bf16 MXU matmul with f32 accumulation."""
    return jnp.dot(a_f32.astype(jnp.bfloat16), w_bf16,
                   preferred_element_type=jnp.float32)


def _layer_body(x, wqkv, bqkv, wo, fc1_w, fc1_b, fc2_w, vec, *, heads, head_dim, causal):
    """One pre-LN CLIP encoder layer on the whole batch.

    x: (Bg, S, D) f32.  Weights bf16; biases/LN params f32.
    vec rows: [ln1_g, ln1_b, ln2_g, ln2_b, o_proj_bias, fc2_bias], each (D,).
    """
    Bg, S, Dm = x.shape
    ln1_g, ln1_b = vec[0:1], vec[1:2]
    ln2_g, ln2_b = vec[2:3], vec[3:4]
    bo, fc2_b = vec[4:5], vec[5:6]

    # ---- LN1 + fused QKV projection on (B*S, D) ----
    x2 = x.reshape(Bg * S, Dm)
    h = _ln(x2, ln1_g, ln1_b)
    qkv = (_mm(h, wqkv) + bqkv).reshape(Bg, S, 3 * Dm)        # (Bg, S, 3D) f32

    scale = float(head_dim) ** -0.5
    if causal:
        row = lax.broadcasted_iota(jnp.int32, (S, S), 0)
        col = lax.broadcasted_iota(jnp.int32, (S, S), 1)
        # mask add + softmax stay f32 (only matmul operands are bf16)
        mask_bias = jnp.where(col <= row, 0.0, -1e9).astype(jnp.float32)[None]

    # ---- per-head attention, o-proj accumulated per head (no scratch round trip) ----
    acc = None
    for hh in range(heads):
        c0 = hh * head_dim
        q = qkv[:, :, c0:c0 + head_dim].astype(jnp.bfloat16)
        k = qkv[:, :, Dm + c0:Dm + c0 + head_dim].astype(jnp.bfloat16)
        v = qkv[:, :, 2 * Dm + c0:2 * Dm + c0 + head_dim].astype(jnp.bfloat16)
        s = jnp.einsum("bqd,bkd->bqk", q, k,
                       preferred_element_type=jnp.float32) * scale        # (Bg, S, S) f32
        if causal:
            s = s + mask_bias
        m = jnp.max(s, axis=-1, keepdims=True)
        p = jnp.exp(s - m)
        p = p * pl.reciprocal(jnp.sum(p, axis=-1, keepdims=True), approx=True)
        o_h = jnp.einsum("bqk,bkd->bqd", p.astype(jnp.bfloat16), v,
                         preferred_element_type=jnp.float32)               # (Bg, S, DH)
        part = jnp.dot(o_h.reshape(Bg * S, head_dim).astype(jnp.bfloat16),
                       wo[c0:c0 + head_dim, :],
                       preferred_element_type=jnp.float32)                 # (Bg*S, D)
        acc = part if acc is None else acc + part

    # ---- residual + LN2 + fused MLP (fc1 -> quick_gelu -> fc2) + residual ----
    x2 = x2 + acc + bo
    h2 = _ln(x2, ln2_g, ln2_b)
    f = _mm(h2, fc1_w) + fc1_b
    f = f * jax.nn.sigmoid(1.702 * f)            # quick_gelu (HF CLIP hidden_act)
    f = _mm(f, fc2_w) + fc2_b
    return (x2 + f).reshape(Bg, S, Dm)


# ------------------------------- stack kernels -------------------------------


def _text_stack_kernel(x_ref, wqkv_ref, wo_ref, fc1_w_ref, fc2_w_ref,
                       bqkv_ref, fc1_b_ref, vec_ref, o_ref, *, heads, head_dim):
    l = pl.program_id(1)

    @pl.when(l == 0)
    def _():
        o_ref[...] = x_ref[...]          # seed the resident activation carry

    o_ref[...] = _layer_body(o_ref[...], wqkv_ref[0], bqkv_ref[0], wo_ref[0],
                             fc1_w_ref[0], fc1_b_ref[0], fc2_w_ref[0], vec_ref[0],
                             heads=heads, head_dim=head_dim, causal=True)


def _vision_stack_kernel(patches_ref, patch_w_ref, vfront_ref,
                         wqkv_ref, wo_ref, fc1_w_ref, fc2_w_ref,
                         bqkv_ref, fc1_b_ref, vec_ref, o_ref, *, heads, head_dim):
    l = pl.program_id(1)

    @pl.when(l == 0)
    def _():
        # Fused vision front end: patch-embed matmul + CLS/pos add + pre-LN.
        Bg, S, Dm = o_ref.shape
        npatch = S - 1
        pe = _mm(patches_ref[...], patch_w_ref[...]).reshape(Bg, npatch, Dm)
        # vfront rows: [class_emb + pos[0], pos[1:], pre_ln_g, pre_ln_b]
        o_ref[:, 0:1, :] = jnp.broadcast_to(vfront_ref[0:1][None], (Bg, 1, Dm))
        o_ref[:, 1:S, :] = pe + vfront_ref[1:S][None]
        pre_g = vfront_ref[S:S + 1]
        pre_b = vfront_ref[S + 1:S + 2]
        emb = o_ref[...]
        o_ref[...] = _ln(emb.reshape(Bg * S, Dm), pre_g, pre_b).reshape(Bg, S, Dm)

    o_ref[...] = _layer_body(o_ref[...], wqkv_ref[0], bqkv_ref[0], wo_ref[0],
                             fc1_w_ref[0], fc1_b_ref[0], fc2_w_ref[0], vec_ref[0],
                             heads=heads, head_dim=head_dim, causal=False)


def _layer_weight_specs():
    """BlockSpecs for the layer-stacked weights (layer axis = grid axis 1)."""
    def wspec(*shape):
        return pl.BlockSpec((1,) + shape, lambda g, l: (l,) + (0,) * len(shape))
    return [
        wspec(D, 3 * D),     # wqkv  (bf16)
        wspec(D, D),         # wo    (bf16)
        wspec(D, MLP),       # fc1_w (bf16)
        wspec(MLP, D),       # fc2_w (bf16)
        wspec(1, 3 * D),     # bqkv
        wspec(1, MLP),       # fc1_b
        wspec(6, D),         # packed [ln1_g, ln1_b, ln2_g, ln2_b, bo, fc2_b]
    ]


def pallas_text_stack(x, sp, *, batch_groups=1):
    """All text encoder layers in one pallas_call. x: (B, S, D) f32."""
    B, S, Dm = x.shape
    L = sp["wqkv"].shape[0]
    Bg = B // batch_groups
    kernel = functools.partial(_text_stack_kernel, heads=HEADS, head_dim=DH)
    return pl.pallas_call(
        kernel,
        out_shape=jax.ShapeDtypeStruct((B, S, Dm), jnp.float32),
        grid=(batch_groups, L),
        in_specs=[pl.BlockSpec((Bg, S, Dm), lambda g, l: (g, 0, 0))]
                 + _layer_weight_specs(),
        out_specs=pl.BlockSpec((Bg, S, Dm), lambda g, l: (g, 0, 0)),
        compiler_params=pltpu.CompilerParams(
            dimension_semantics=("parallel", "arbitrary")),
    )(x, sp["wqkv"], sp["wo"], sp["fc1_w"], sp["fc2_w"],
      sp["bqkv"], sp["fc1_b"], sp["vec"])


def pallas_vision_stack(patches, patch_w, vfront, sp, *, batch, batch_groups=1):
    """Patch embed + pre-LN + all vision encoder layers in one pallas_call.

    patches: (B*NPATCH, C*P*P) f32.  batch_groups must divide B (set 2 on v7x at scale).
    """
    cpp = patches.shape[1]
    L = sp["wqkv"].shape[0]
    Bg = batch // batch_groups
    kernel = functools.partial(_vision_stack_kernel, heads=HEADS, head_dim=DH)
    return pl.pallas_call(
        kernel,
        out_shape=jax.ShapeDtypeStruct((batch, VSEQ, D), jnp.float32),
        grid=(batch_groups, L),
        in_specs=[
            pl.BlockSpec((Bg * NPATCH, cpp), lambda g, l: (g, 0)),
            pl.BlockSpec((cpp, D), lambda g, l: (0, 0)),
            pl.BlockSpec((VSEQ + 2, D), lambda g, l: (0, 0)),
        ] + _layer_weight_specs(),
        out_specs=pl.BlockSpec((Bg, VSEQ, D), lambda g, l: (g, 0, 0)),
        compiler_params=pltpu.CompilerParams(
            dimension_semantics=("parallel", "arbitrary")),
    )(patches, patch_w, vfront, sp["wqkv"], sp["wo"], sp["fc1_w"], sp["fc2_w"],
      sp["bqkv"], sp["fc1_b"], sp["vec"])


# -------------------------------- fused tail kernel --------------------------------


def _tail_kernel(vpool_ref, v_ln_ref, v_proj_ref, tpool_ref, t_ln_ref, t_proj_ref,
                 scale_ref, o_ref, *, want_logits):
    """post-LN + projection for both towers + L2 normalize (+ contrastive logits)."""
    img = _mm(_ln(vpool_ref[...], v_ln_ref[0:1], v_ln_ref[1:2]), v_proj_ref[...])
    txt = _mm(_ln(tpool_ref[...], t_ln_ref[0:1], t_ln_ref[1:2]), t_proj_ref[...])
    # matches torch `z / z.norm(p=2, dim=-1, keepdim=True)` (no eps, like the reference)
    img_n = img * lax.rsqrt(jnp.sum(img * img, axis=-1, keepdims=True))
    txt_n = txt * lax.rsqrt(jnp.sum(txt * txt, axis=-1, keepdims=True))
    if want_logits:
        scale = jnp.exp(scale_ref[0, 0])                        # scalar from SMEM
        # logits_per_text = txt_n @ img_n.T (transposed contraction, lane-dense output)
        o_ref[...] = lax.dot_general(txt_n, img_n, (((1,), (1,)), ((), ())),
                                     preferred_element_type=jnp.float32) * scale
    else:
        o_ref[0] = img_n
        o_ref[1] = txt_n


def pallas_clip_tail(v_pooled, t_pooled, vp, tp, logit_scale, *, want_logits):
    B = v_pooled.shape[0]
    vm = pl.BlockSpec(memory_space=pltpu.MemorySpace.VMEM)
    sm = pl.BlockSpec(memory_space=pltpu.MemorySpace.SMEM)
    out_shape = (jax.ShapeDtypeStruct((B, B), jnp.float32) if want_logits
                 else jax.ShapeDtypeStruct((2, B, PROJ), jnp.float32))
    return pl.pallas_call(
        functools.partial(_tail_kernel, want_logits=want_logits),
        out_shape=out_shape,
        in_specs=[vm, vm, vm, vm, vm, vm, sm],
        out_specs=vm,
    )(v_pooled, vp["post_ln"], vp["proj_w"], t_pooled, tp["final_ln"], tp["proj_w"],
      logit_scale)


# ------------------------------ model (JAX glue) ------------------------------


def vision_forward(pixel_values, vp):
    """CLIPVisionTransformer pooled output. pixel_values: (B, C, H, W) NCHW."""
    B, C, H, W = pixel_values.shape
    gh, gw = H // PATCH, W // PATCH
    # conv(kernel=stride=PATCH, no bias) == flatten patches and matmul (done in-kernel)
    patches = pixel_values.reshape(B, C, gh, PATCH, gw, PATCH)
    patches = patches.transpose(0, 2, 4, 1, 3, 5).reshape(B * gh * gw, C * PATCH * PATCH)
    # Pack [class_emb + pos[0], pos[1:], pre_ln_g, pre_ln_b] into one small buffer.
    cls_row = (vp["class_emb"] + vp["pos_emb"][0])[None]
    vfront = jnp.concatenate([cls_row, vp["pos_emb"][1:], vp["pre_ln"]], axis=0)
    x = pallas_vision_stack(patches, vp["patch_w"], vfront, vp["stack"], batch=B)
    return x[:, 0, :]                                                      # CLS token


def text_forward(input_ids, tp):
    """CLIPTextTransformer pooled output. input_ids: (B, S) int32."""
    B, S = input_ids.shape
    x = tp["tok_emb"][input_ids] + tp["pos_emb"][:S][None]                 # (B, S, D)
    # TODO(synk): HF also folds the padding attention_mask into the scores; we assume all-ones.
    x = pallas_text_stack(x, tp["stack"])
    # LN is per-token, so pooling the EOS row first and LN-ing it in the tail kernel is
    # equivalent to HF's LN(full sequence) then pooling.
    eos_idx = jnp.argmax(input_ids, axis=-1)     # TODO(synk): legacy argmax EOS pooling
    return x[jnp.arange(B), eos_idx]                                       # (B, D)


def clip_forward(pixel_values, input_ids, params, output_embed=False):
    v_pooled = vision_forward(pixel_values, params["vision"])   # CustomVisualCLIP (num_classes=0)
    t_pooled = text_forward(input_ids, params["text"])          # CustomTextualCLIP (num_classes=0)
    if output_embed:
        return pallas_clip_tail(v_pooled, t_pooled, params["vision"], params["text"],
                                params["logit_scale"], want_logits=False)   # (2, B, PROJ)
    logits_per_text = pallas_clip_tail(v_pooled, t_pooled, params["vision"], params["text"],
                                       params["logit_scale"], want_logits=True)
    # stack([logits_per_image, logits_per_text]) — transpose done in cheap JAX glue.
    return jnp.stack([logits_per_text.T, logits_per_text], axis=0)          # (2, B, B)


# ------------------------------ parameter init ------------------------------


def init_params(key):
    keys = iter(jax.random.split(key, 32))
    bf16 = jnp.bfloat16

    def nrm(shape, scale=0.02, dtype=jnp.float32):
        return (scale * jax.random.normal(next(keys), shape, jnp.float32)).astype(dtype)

    def ln_pack():  # rows [gamma, beta]
        return jnp.concatenate([jnp.ones((1, D), jnp.float32),
                                jnp.zeros((1, D), jnp.float32)], axis=0)

    def stack_params():
        # packed rows: [ln1_g, ln1_b, ln2_g, ln2_b, o_proj_bias, fc2_bias]
        vec = jnp.zeros((LAYERS, 6, D), jnp.float32)
        vec = vec.at[:, 0, :].set(1.0).at[:, 2, :].set(1.0)
        return dict(
            wqkv=nrm((LAYERS, D, 3 * D), dtype=bf16),            # wq | wk | wv fused
            wo=nrm((LAYERS, D, D), dtype=bf16),
            fc1_w=nrm((LAYERS, D, MLP), dtype=bf16),
            fc2_w=nrm((LAYERS, MLP, D), dtype=bf16),
            bqkv=jnp.zeros((LAYERS, 1, 3 * D), jnp.float32),
            fc1_b=jnp.zeros((LAYERS, 1, MLP), jnp.float32),
            vec=vec,
        )

    vision = dict(
        patch_w=nrm((C_IN * PATCH * PATCH, D), dtype=bf16),
        class_emb=nrm((D,)),
        pos_emb=nrm((VSEQ, D)),
        pre_ln=ln_pack(),
        stack=stack_params(),
        post_ln=ln_pack(),
        proj_w=nrm((D, PROJ), dtype=bf16),
    )
    text = dict(
        tok_emb=nrm((VOCAB, D)),
        pos_emb=nrm((TSEQ, D)),
        stack=stack_params(),
        final_ln=ln_pack(),
        proj_w=nrm((D, PROJ), dtype=bf16),
    )
    # TODO(synk): the unused nn.Linear(proj_dim, 0) classifiers are dead code on this path; omitted.
    return dict(vision=vision, text=text,
                logit_scale=jnp.full((1, 1), 2.6592, jnp.float32))


# ------------------------------------ main ------------------------------------

if __name__ == "__main__":
    key = jax.random.PRNGKey(0)
    kp, kpix, kids = jax.random.split(key, 3)

    params = init_params(kp)
    pixel_values = jax.random.normal(kpix, (2, C_IN, IMG, IMG), jnp.float32)   # NCHW
    input_ids = jax.random.randint(kids, (2, TSEQ), 0, VOCAB, jnp.int32)

    clip_fwd = jax.jit(clip_forward, static_argnames=("output_embed",))

    out = jax.block_until_ready(
        clip_fwd(pixel_values, input_ids, params, output_embed=False))
    assert out.shape == (2, 2, 2) and out.dtype == jnp.float32

    embeds = jax.block_until_ready(
        clip_fwd(pixel_values, input_ids, params, output_embed=True))
    assert embeds.shape == (2, 2, PROJ)

    print("KERNEL_OK")
</pallas_src>

<mosaic_0001>
module attributes {stable_mosaic.version = 11 : i64} {
  func.func @_vision_stack_kernel(%arg0: i32, %arg1: i32, %arg2: memref<8x192xf32, #tpu.memory_space<vmem>>, %arg3: memref<192x32xbf16, #tpu.memory_space<vmem>>, %arg4: memref<7x32xf32, #tpu.memory_space<vmem>>, %arg5: memref<1x32x96xbf16, #tpu.memory_space<vmem>>, %arg6: memref<1x32x32xbf16, #tpu.memory_space<vmem>>, %arg7: memref<1x32x64xbf16, #tpu.memory_space<vmem>>, %arg8: memref<1x64x32xbf16, #tpu.memory_space<vmem>>, %arg9: memref<1x1x96xf32, #tpu.memory_space<vmem>>, %arg10: memref<1x1x64xf32, #tpu.memory_space<vmem>>, %arg11: memref<1x6x32xf32, #tpu.memory_space<vmem>>, %arg12: memref<2x5x32xf32, #tpu.memory_space<vmem>>) attributes {dimension_semantics = [#tpu.dimension_semantics<parallel>, #tpu.dimension_semantics<arbitrary>], iteration_bounds = array<i64: 1, 2>, scalar_prefetch = 0 : i64, scratch_operands = 0 : i64, tpu.core_type = #tpu.core_type<tc>, window_params = [{transform_indices = @transform_0, window_bounds = array<i64: 8, 192>}, {pipeline_mode = #tpu.pipeline_mode<synchronous>, transform_indices = @transform_1, window_bounds = array<i64: 192, 32>}, {pipeline_mode = #tpu.pipeline_mode<synchronous>, transform_indices = @transform_2, window_bounds = array<i64: 7, 32>}, {transform_indices = @transform_3, window_bounds = array<i64: 1, 32, 96>}, {transform_indices = @transform_4, window_bounds = array<i64: 1, 32, 32>}, {transform_indices = @transform_5, window_bounds = array<i64: 1, 32, 64>}, {transform_indices = @transform_6, window_bounds = array<i64: 1, 64, 32>}, {transform_indices = @transform_7, window_bounds = array<i64: 1, 1, 96>}, {transform_indices = @transform_8, window_bounds = array<i64: 1, 1, 64>}, {transform_indices = @transform_9, window_bounds = array<i64: 1, 6, 32>}, {transform_indices = @transform_10, window_bounds = array<i64: 2, 5, 32>}]} {
    %c0_i32 = arith.constant 0 : i32
    %0 = arith.cmpi eq, %arg1, %c0_i32 : i32
    %1 = arith.extui %0 : i1 to i32
    %c0_i32_0 = arith.constant 0 : i32
    %2 = arith.cmpi ne, %1, %c0_i32_0 : i32
    scf.if %2 {
      %c0_53 = arith.constant 0 : index
      %c0_54 = arith.constant 0 : index
      %143 = vector.load %arg2[%c0_53, %c0_54] : memref<8x192xf32, #tpu.memory_space<vmem>>, vector<8x192xf32>
      %c0_55 = arith.constant 0 : index
      %c0_56 = arith.constant 0 : index
      %144 = vector.load %arg3[%c0_55, %c0_56] : memref<192x32xbf16, #tpu.memory_space<vmem>>, vector<192x32xbf16>
      %145 = arith.truncf %143 : vector<8x192xf32> to vector<8x192xbf16>
      %cst_57 = arith.constant dense<0.000000e+00> : vector<8x32xf32>
      %146 = tpu.matmul %145, %144, %cst_57 {dimension_numbers = #tpu.dot_dimension_numbers<[1], [0], [0], [1], [0, 0, 1, 1], [], []>} : vector<8x192xbf16>, vector<192x32xbf16>, vector<8x32xf32> -> vector<8x32xf32>
      %147 = vector.shape_cast %146 : vector<8x32xf32> to vector<2x4x32xf32>
      %c0_58 = arith.constant 0 : index
      %c0_59 = arith.constant 0 : index
      %148 = vector.load %arg4[%c0_58, %c0_59] : memref<7x32xf32, #tpu.memory_space<vmem>>, vector<1x32xf32>
      %149 = vector.shape_cast %148 : vector<1x32xf32> to vector<1x1x32xf32>
      %150 = vector.shape_cast %149 : vector<1x1x32xf32> to vector<1x1x32xf32>
      %151 = vector.broadcast %150 : vector<1x1x32xf32> to vector<2x1x32xf32>
      %c0_60 = arith.constant 0 : index
      %c0_61 = arith.constant 0 : index
      %c0_62 = arith.constant 0 : index
      %152 = vector.load %arg12[%c0_60, %c0_61, %c0_62] : memref<2x5x32xf32, #tpu.memory_space<vmem>>, vector<2x1x32xf32>
      tpu.vector_store %arg12[%c0_60, %c0_61, %c0_62], %151 {strides = array<i32>} : memref<2x5x32xf32, #tpu.memory_space<vmem>>, vector<2x1x32xf32>,
      %c1 = arith.constant 1 : index
      %c0_63 = arith.constant 0 : index
      %153 = vector.load %arg4[%c1, %c0_63] : memref<7x32xf32, #tpu.memory_space<vmem>>, vector<4x32xf32>
      %154 = vector.shape_cast %153 : vector<4x32xf32> to vector<1x4x32xf32>
      %155 = vector.broadcast %154 : vector<1x4x32xf32> to vector<2x4x32xf32>
      %156 = arith.addf %147, %155 : vector<2x4x32xf32>
      %c0_64 = arith.constant 0 : index
      %c1_65 = arith.constant 1 : index
      %c0_66 = arith.constant 0 : index
      %157 = vector.load %arg12[%c0_64, %c1_65, %c0_66] : memref<2x5x32xf32, #tpu.memory_space<vmem>>, vector<2x4x32xf32>
      tpu.vector_store %arg12[%c0_64, %c1_65, %c0_66], %156 {strides = array<i32>} : memref<2x5x32xf32, #tpu.memory_space<vmem>>, vector<2x4x32xf32>,
      %c5 = arith.constant 5 : index
      %c0_67 = arith.constant 0 : index
      %158 = vector.load %arg4[%c5, %c0_67] : memref<7x32xf32, #tpu.memory_space<vmem>>, vector<1x32xf32>
      %c6 = arith.constant 6 : index
      %c0_68 = arith.constant 0 : index
      %159 = vector.load %arg4[%c6, %c0_68] : memref<7x32xf32, #tpu.memory_space<vmem>>, vector<1x32xf32>
      %c0_69 = arith.constant 0 : index
      %c0_70 = arith.constant 0 : index
      %c0_71 = arith.constant 0 : index
      %160 = vector.load %arg12[%c0_69, %c0_70, %c0_71] : memref<2x5x32xf32, #tpu.memory_space<vmem>>, vector<2x5x32xf32>
      %161 = vector.shape_cast %160 : vector<2x5x32xf32> to vector<10x32xf32>
      %cst_72 = arith.constant dense<0.000000e+00> : vector<10xf32>
      %162 = vector.multi_reduction <add>, %161, %cst_72 [1] : vector<10x32xf32> to vector<10xf32>
      %163 = vector.shape_cast %162 : vector<10xf32> to vector<10x1xf32>
      %cst_73 = arith.constant 3.200000e+01 : f32
      %164 = vector.broadcast %cst_73 : f32 to vector<10x1xf32>
      %165 = arith.divf %163, %164 : vector<10x1xf32>
      %166 = vector.broadcast %165 : vector<10x1xf32> to vector<10x32xf32>
      %167 = arith.subf %161, %166 : vector<10x32xf32>
      %168 = arith.mulf %167, %167 : vector<10x32xf32>
      %cst_74 = arith.constant dense<0.000000e+00> : vector<10xf32>
      %169 = vector.multi_reduction <add>, %168, %cst_74 [1] : vector<10x32xf32> to vector<10xf32>
      %170 = vector.shape_cast %169 : vector<10xf32> to vector<10x1xf32>
      %cst_75 = arith.constant 3.200000e+01 : f32
      %171 = vector.broadcast %cst_75 : f32 to vector<10x1xf32>
      %172 = arith.divf %170, %171 : vector<10x1xf32>
      %cst_76 = arith.constant 9.99999974E-6 : f32
      %173 = vector.broadcast %cst_76 : f32 to vector<10x1xf32>
      %174 = arith.addf %172, %173 : vector<10x1xf32>
      %175 = math.rsqrt %174 : vector<10x1xf32>
      %176 = vector.broadcast %175 : vector<10x1xf32> to vector<10x32xf32>
      %177 = arith.mulf %167, %176 : vector<10x32xf32>
      %178 = vector.broadcast %158 : vector<1x32xf32> to vector<10x32xf32>
      %179 = arith.mulf %177, %178 : vector<10x32xf32>
      %180 = vector.broadcast %159 : vector<1x32xf32> to vector<10x32xf32>
      %181 = arith.addf %179, %180 : vector<10x32xf32>
      %182 = vector.shape_cast %181 : vector<10x32xf32> to vector<2x5x32xf32>
      %c0_77 = arith.constant 0 : index
      %c0_78 = arith.constant 0 : index
      %c0_79 = arith.constant 0 : index
      %183 = vector.load %arg12[%c0_77, %c0_78, %c0_79] : memref<2x5x32xf32, #tpu.memory_space<vmem>>, vector<2x5x32xf32>
      tpu.vector_store %arg12[%c0_77, %c0_78, %c0_79], %182 {strides = array<i32>} : memref<2x5x32xf32, #tpu.memory_space<vmem>>, vector<2x5x32xf32>,
    } else {
    }
    %c0 = arith.constant 0 : index
    %c0_1 = arith.constant 0 : index
    %c0_2 = arith.constant 0 : index
    %3 = vector.load %arg12[%c0, %c0_1, %c0_2] : memref<2x5x32xf32, #tpu.memory_space<vmem>>, vector<2x5x32xf32>
    %c0_3 = arith.constant 0 : index
    %c0_4 = arith.constant 0 : index
    %c0_5 = arith.constant 0 : index
    %4 = vector.load %arg5[%c0_3, %c0_4, %c0_5] : memref<1x32x96xbf16, #tpu.memory_space<vmem>>, vector<1x32x96xbf16>
    %5 = vector.shape_cast %4 : vector<1x32x96xbf16> to vector<32x96xbf16>
    %c0_6 = arith.constant 0 : index
    %c0_7 = arith.constant 0 : index
    %c0_8 = arith.constant 0 : index
    %6 = vector.load %arg9[%c0_6, %c0_7, %c0_8] : memref<1x1x96xf32, #tpu.memory_space<vmem>>, vector<1x1x96xf32>
    %7 = vector.shape_cast %6 : vector<1x1x96xf32> to vector<1x96xf32>
    %c0_9 = arith.constant 0 : index
    %c0_10 = arith.constant 0 : index
    %c0_11 = arith.constant 0 : index
    %8 = vector.load %arg6[%c0_9, %c0_10, %c0_11] : memref<1x32x32xbf16, #tpu.memory_space<vmem>>, vector<1x32x32xbf16>
    %9 = vector.shape_cast %8 : vector<1x32x32xbf16> to vector<32x32xbf16>
    %c0_12 = arith.constant 0 : index
    %c0_13 = arith.constant 0 : index
    %c0_14 = arith.constant 0 : index
    %10 = vector.load %arg7[%c0_12, %c0_13, %c0_14] : memref<1x32x64xbf16, #tpu.memory_space<vmem>>, vector<1x32x64xbf16>
    %11 = vector.shape_cast %10 : vector<1x32x64xbf16> to vector<32x64xbf16>
    %c0_15 = arith.constant 0 : index
    %c0_16 = arith.constant 0 : index
    %c0_17 = arith.constant 0 : index
    %12 = vector.load %arg10[%c0_15, %c0_16, %c0_17] : memref<1x1x64xf32, #tpu.memory_space<vmem>>, vector<1x1x64xf32>
    %13 = vector.shape_cast %12 : vector<1x1x64xf32> to vector<1x64xf32>
    %c0_18 = arith.constant 0 : index
    %c0_19 = arith.constant 0 : index
    %c0_20 = arith.constant 0 : index
    %14 = vector.load %arg8[%c0_18, %c0_19, %c0_20] : memref<1x64x32xbf16, #tpu.memory_space<vmem>>, vector<1x64x32xbf16>
    %15 = vector.shape_cast %14 : vector<1x64x32xbf16> to vector<64x32xbf16>
    %c0_21 = arith.constant 0 : index
    %c0_22 = arith.constant 0 : index
    %c0_23 = arith.constant 0 : index
    %16 = vector.load %arg11[%c0_21, %c0_22, %c0_23] : memref<1x6x32xf32, #tpu.memory_space<vmem>>, vector<1x6x32xf32>
    %17 = vector.shape_cast %16 : vector<1x6x32xf32> to vector<6x32xf32>
    %18 = vector.extract_strided_slice %17 {offsets = [0, 0], sizes = [1, 32], strides = [1, 1]} : vector<6x32xf32> to vector<1x32xf32>
    %19 = vector.extract_strided_slice %17 {offsets = [1, 0], sizes = [1, 32], strides = [1, 1]} : vector<6x32xf32> to vector<1x32xf32>
    %20 = vector.extract_strided_slice %17 {offsets = [2, 0], sizes = [1, 32], strides = [1, 1]} : vector<6x32xf32> to vector<1x32xf32>
    %21 = vector.extract_strided_slice %17 {offsets = [3, 0], sizes = [1, 32], strides = [1, 1]} : vector<6x32xf32> to vector<1x32xf32>
    %22 = vector.extract_strided_slice %17 {offsets = [4, 0], sizes = [1, 32], strides = [1, 1]} : vector<6x32xf32> to vector<1x32xf32>
    %23 = vector.extract_strided_slice %17 {offsets = [5, 0], sizes = [1, 32], strides = [1, 1]} : vector<6x32xf32> to vector<1x32xf32>
    %24 = vector.shape_cast %3 : vector<2x5x32xf32> to vector<10x32xf32>
    %cst = arith.constant dense<0.000000e+00> : vector<10xf32>
    %25 = vector.multi_reduction <add>, %24, %cst [1] : vector<10x32xf32> to vector<10xf32>
    %26 = vector.shape_cast %25 : vector<10xf32> to vector<10x1xf32>
    %cst_24 = arith.constant 3.200000e+01 : f32
    %27 = vector.broadcast %cst_24 : f32 to vector<10x1xf32>
    %28 = arith.divf %26, %27 : vector<10x1xf32>
    %29 = vector.broadcast %28 : vector<10x1xf32> to vector<10x32xf32>
    %30 = arith.subf %24, %29 : vector<10x32xf32>
    %31 = arith.mulf %30, %30 : vector<10x32xf32>
    %cst_25 = arith.constant dense<0.000000e+00> : vector<10xf32>
    %32 = vector.multi_reduction <add>, %31, %cst_25 [1] : vector<10x32xf32> to vector<10xf32>
    %33 = vector.shape_cast %32 : vector<10xf32> to vector<10x1xf32>
    %cst_26 = arith.constant 3.200000e+01 : f32
    %34 = vector.broadcast %cst_26 : f32 to vector<10x1xf32>
    %35 = arith.divf %33, %34 : vector<10x1xf32>
    %cst_27 = arith.constant 9.99999974E-6 : f32
    %36 = vector.broadcast %cst_27 : f32 to vector<10x1xf32>
    %37 = arith.addf %35, %36 : vector<10x1xf32>
    %38 = math.rsqrt %37 : vector<10x1xf32>
    %39 = vector.broadcast %38 : vector<10x1xf32> to vector<10x32xf32>
    %40 = arith.mulf %30, %39 : vector<10x32xf32>
    %41 = vector.broadcast %18 : vector<1x32xf32> to vector<10x32xf32>
    %42 = arith.mulf %40, %41 : vector<10x32xf32>
    %43 = vector.broadcast %19 : vector<1x32xf32> to vector<10x32xf32>
    %44 = arith.addf %42, %43 : vector<10x32xf32>
    %45 = arith.truncf %44 : vector<10x32xf32> to vector<10x32xbf16>
    %cst_28 = arith.constant dense<0.000000e+00> : vector<10x96xf32>
    %46 = tpu.matmul %45, %5, %cst_28 {dimension_numbers = #tpu.dot_dimension_numbers<[1], [0], [0], [1], [0, 0, 1, 1], [], []>} : vector<10x32xbf16>, vector<32x96xbf16>, vector<10x96xf32> -> vector<10x96xf32>
    %47 = vector.broadcast %7 : vector<1x96xf32> to vector<10x96xf32>
    %48 = arith.addf %46, %47 : vector<10x96xf32>
    %49 = vector.shape_cast %48 : vector<10x96xf32> to vector<2x5x96xf32>
    %50 = vector.extract_strided_slice %49 {offsets = [0, 0, 0], sizes = [2, 5, 16], strides = [1, 1, 1]} : vector<2x5x96xf32> to vector<2x5x16xf32>
    %51 = arith.truncf %50 : vector<2x5x16xf32> to vector<2x5x16xbf16>
    %52 = vector.extract_strided_slice %49 {offsets = [0, 0, 32], sizes = [2, 5, 16], strides = [1, 1, 1]} : vector<2x5x96xf32> to vector<2x5x16xf32>
    %53 = arith.truncf %52 : vector<2x5x16xf32> to vector<2x5x16xbf16>
    %54 = vector.extract_strided_slice %49 {offsets = [0, 0, 64], sizes = [2, 5, 16], strides = [1, 1, 1]} : vector<2x5x96xf32> to vector<2x5x16xf32>
    %55 = arith.truncf %54 : vector<2x5x16xf32> to vector<2x5x16xbf16>
    "tpu.trace_start"() <{level = 10 : i32, message = "bqd,bkd->bqk"}> : () -> ()
    %cst_29 = arith.constant dense<0.000000e+00> : vector<2x5x5xf32>
    %56 = tpu.matmul %51, %53, %cst_29 {dimension_numbers = #tpu.dot_dimension_numbers<[2], [2], [1], [1], [0, 0, 0, 1, 1, 1], [0], [0]>} : vector<2x5x16xbf16>, vector<2x5x16xbf16>, vector<2x5x5xf32> -> vector<2x5x5xf32>
    "tpu.trace_stop"() : () -> ()
    %cst_30 = arith.constant 2.500000e-01 : f32
    %57 = vector.broadcast %cst_30 : f32 to vector<2x5x5xf32>
    %58 = arith.mulf %56, %57 : vector<2x5x5xf32>
    %cst_31 = arith.constant dense<0xFF800000> : vector<2x5xf32>
    %59 = vector.multi_reduction <maximumf>, %58, %cst_31 [2] : vector<2x5x5xf32> to vector<2x5xf32>
    %60 = vector.shape_cast %59 : vector<2x5xf32> to vector<2x5x1xf32>
    %61 = vector.broadcast %60 : vector<2x5x1xf32> to vector<2x5x5xf32>
    %62 = arith.subf %58, %61 : vector<2x5x5xf32>
    %63 = math.exp %62 : vector<2x5x5xf32>
    %cst_32 = arith.constant dense<0.000000e+00> : vector<2x5xf32>
    %64 = vector.multi_reduction <add>, %63, %cst_32 [2] : vector<2x5x5xf32> to vector<2x5xf32>
    %65 = vector.shape_cast %64 : vector<2x5xf32> to vector<2x5x1xf32>
    %66 = tpu.reciprocal %65 {approx = true} : vector<2x5x1xf32> -> vector<2x5x1xf32>
    %67 = vector.broadcast %66 : vector<2x5x1xf32> to vector<2x5x5xf32>
    %68 = arith.mulf %63, %67 : vector<2x5x5xf32>
    %69 = arith.truncf %68 : vector<2x5x5xf32> to vector<2x5x5xbf16>
    "tpu.trace_start"() <{level = 10 : i32, message = "bqk,bkd->bqd"}> : () -> ()
    %cst_33 = arith.constant dense<0.000000e+00> : vector<2x5x16xf32>
    %70 = tpu.matmul %69, %55, %cst_33 {dimension_numbers = #tpu.dot_dimension_numbers<[2], [1], [1], [2], [0, 0, 0, 1, 1, 2], [0], [0]>} : vector<2x5x5xbf16>, vector<2x5x16xbf16>, vector<2x5x16xf32> -> vector<2x5x16xf32>
    "tpu.trace_stop"() : () -> ()
    %71 = vector.shape_cast %70 : vector<2x5x16xf32> to vector<10x16xf32>
    %72 = arith.truncf %71 : vector<10x16xf32> to vector<10x16xbf16>
    %73 = vector.extract_strided_slice %9 {offsets = [0, 0], sizes = [16, 32], strides = [1, 1]} : vector<32x32xbf16> to vector<16x32xbf16>
    %cst_34 = arith.constant dense<0.000000e+00> : vector<10x32xf32>
    %74 = tpu.matmul %72, %73, %cst_34 {dimension_numbers = #tpu.dot_dimension_numbers<[1], [0], [0], [1], [0, 0, 1, 1], [], []>} : vector<10x16xbf16>, vector<16x32xbf16>, vector<10x32xf32> -> vector<10x32xf32>
    %75 = vector.extract_strided_slice %49 {offsets = [0, 0, 16], sizes = [2, 5, 16], strides = [1, 1, 1]} : vector<2x5x96xf32> to vector<2x5x16xf32>
    %76 = arith.truncf %75 : vector<2x5x16xf32> to vector<2x5x16xbf16>
    %77 = vector.extract_strided_slice %49 {offsets = [0, 0, 48], sizes = [2, 5, 16], strides = [1, 1, 1]} : vector<2x5x96xf32> to vector<2x5x16xf32>
    %78 = arith.truncf %77 : vector<2x5x16xf32> to vector<2x5x16xbf16>
    %79 = vector.extract_strided_slice %49 {offsets = [0, 0, 80], sizes = [2, 5, 16], strides = [1, 1, 1]} : vector<2x5x96xf32> to vector<2x5x16xf32>
    %80 = arith.truncf %79 : vector<2x5x16xf32> to vector<2x5x16xbf16>
    "tpu.trace_start"() <{level = 10 : i32, message = "bqd,bkd->bqk"}> : () -> ()
    %cst_35 = arith.constant dense<0.000000e+00> : vector<2x5x5xf32>
    %81 = tpu.matmul %76, %78, %cst_35 {dimension_numbers = #tpu.dot_dimension_numbers<[2], [2], [1], [1], [0, 0, 0, 1, 1, 1], [0], [0]>} : vector<2x5x16xbf16>, vector<2x5x16xbf16>, vector<2x5x5xf32> -> vector<2x5x5xf32>
    "tpu.trace_stop"() : () -> ()
    %cst_36 = arith.constant 2.500000e-01 : f32
    %82 = vector.broadcast %cst_36 : f32 to vector<2x5x5xf32>
    %83 = arith.mulf %81, %82 : vector<2x5x5xf32>
    %cst_37 = arith.constant dense<0xFF800000> : vector<2x5xf32>
    %84 = vector.multi_reduction <maximumf>, %83, %cst_37 [2] : vector<2x5x5xf32> to vector<2x5xf32>
    %85 = vector.shape_cast %84 : vector<2x5xf32> to vector<2x5x1xf32>
    %86 = vector.broadcast %85 : vector<2x5x1xf32> to vector<2x5x5xf32>
    %87 = arith.subf %83, %86 : vector<2x5x5xf32>
    %88 = math.exp %87 : vector<2x5x5xf32>
    %cst_38 = arith.constant dense<0.000000e+00> : vector<2x5xf32>
    %89 = vector.multi_reduction <add>, %88, %cst_38 [2] : vector<2x5x5xf32> to vector<2x5xf32>
    %90 = vector.shape_cast %89 : vector<2x5xf32> to vector<2x5x1xf32>
    %91 = tpu.reciprocal %90 {approx = true} : vector<2x5x1xf32> -> vector<2x5x1xf32>
    %92 = vector.broadcast %91 : vector<2x5x1xf32> to vector<2x5x5xf32>
    %93 = arith.mulf %88, %92 : vector<2x5x5xf32>
    %94 = arith.truncf %93 : vector<2x5x5xf32> to vector<2x5x5xbf16>
    "tpu.trace_start"() <{level = 10 : i32, message = "bqk,bkd->bqd"}> : () -> ()
    %cst_39 = arith.constant dense<0.000000e+00> : vector<2x5x16xf32>
    %95 = tpu.matmul %94, %80, %cst_39 {dimension_numbers = #tpu.dot_dimension_numbers<[2], [1], [1], [2], [0, 0, 0, 1, 1, 2], [0], [0]>} : vector<2x5x5xbf16>, vector<2x5x16xbf16>, vector<2x5x16xf32> -> vector<2x5x16xf32>
    "tpu.trace_stop"() : () -> ()
    %96 = vector.shape_cast %95 : vector<2x5x16xf32> to vector<10x16xf32>
    %97 = arith.truncf %96 : vector<10x16xf32> to vector<10x16xbf16>
    %98 = vector.extract_strided_slice %9 {offsets = [16, 0], sizes = [16, 32], strides = [1, 1]} : vector<32x32xbf16> to vector<16x32xbf16>
    %cst_40 = arith.constant dense<0.000000e+00> : vector<10x32xf32>
    %99 = tpu.matmul %97, %98, %cst_40 {dimension_numbers = #tpu.dot_dimension_numbers<[1], [0], [0], [1], [0, 0, 1, 1], [], []>} : vector<10x16xbf16>, vector<16x32xbf16>, vector<10x32xf32> -> vector<10x32xf32>
    %100 = arith.addf %74, %99 : vector<10x32xf32>
    %101 = arith.addf %24, %100 : vector<10x32xf32>
    %102 = vector.broadcast %22 : vector<1x32xf32> to vector<10x32xf32>
    %103 = arith.addf %101, %102 : vector<10x32xf32>
    %cst_41 = arith.constant dense<0.000000e+00> : vector<10xf32>
    %104 = vector.multi_reduction <add>, %103, %cst_41 [1] : vector<10x32xf32> to vector<10xf32>
    %105 = vector.shape_cast %104 : vector<10xf32> to vector<10x1xf32>
    %cst_42 = arith.constant 3.200000e+01 : f32
    %106 = vector.broadcast %cst_42 : f32 to vector<10x1xf32>
    %107 = arith.divf %105, %106 : vector<10x1xf32>
    %108 = vector.broadcast %107 : vector<10x1xf32> to vector<10x32xf32>
    %109 = arith.subf %103, %108 : vector<10x32xf32>
    %110 = arith.mulf %109, %109 : vector<10x32xf32>
    %cst_43 = arith.constant dense<0.000000e+00> : vector<10xf32>
    %111 = vector.multi_reduction <add>, %110, %cst_43 [1] : vector<10x32xf32> to vector<10xf32>
    %112 = vector.shape_cast %111 : vector<10xf32> to vector<10x1xf32>
    %cst_44 = arith.constant 3.200000e+01 : f32
    %113 = vector.broadcast %cst_44 : f32 to vector<10x1xf32>
    %114 = arith.divf %112, %113 : vector<10x1xf32>
    %cst_45 = arith.constant 9.99999974E-6 : f32
    %115 = vector.broadcast %cst_45 : f32 to vector<10x1xf32>
    %116 = arith.addf %114, %115 : vector<10x1xf32>
    %117 = math.rsqrt %116 : vector<10x1xf32>
    %118 = vector.broadcast %117 : vector<10x1xf32> to vector<10x32xf32>
    %119 = arith.mulf %109, %118 : vector<10x32xf32>
    %120 = vector.broadcast %20 : vector<1x32xf32> to vector<10x32xf32>
    %121 = arith.mulf %119, %120 : vector<10x32xf32>
    %122 = vector.broadcast %21 : vector<1x32xf32> to vector<10x32xf32>
    %123 = arith.addf %121, %122 : vector<10x32xf32>
    %124 = arith.truncf %123 : vector<10x32xf32> to vector<10x32xbf16>
    %cst_46 = arith.constant dense<0.000000e+00> : vector<10x64xf32>
    %125 = tpu.matmul %124, %11, %cst_46 {dimension_numbers = #tpu.dot_dimension_numbers<[1], [0], [0], [1], [0, 0, 1, 1], [], []>} : vector<10x32xbf16>, vector<32x64xbf16>, vector<10x64xf32> -> vector<10x64xf32>
    %126 = vector.broadcast %13 : vector<1x64xf32> to vector<10x64xf32>
    %127 = arith.addf %125, %126 : vector<10x64xf32>
    %cst_47 = arith.constant 1.702000e+00 : f32
    %128 = vector.broadcast %cst_47 : f32 to vector<10x64xf32>
    %129 = arith.mulf %128, %127 : vector<10x64xf32>
    %130 = arith.negf %129 : vector<10x64xf32>
    %131 = math.exp %130 : vector<10x64xf32>
    %cst_48 = arith.constant 1.000000e+00 : f32
    %132 = vector.broadcast %cst_48 : f32 to vector<10x64xf32>
    %133 = arith.addf %132, %131 : vector<10x64xf32>
    %134 = arith.divf %132, %133 : vector<10x64xf32>
    %135 = arith.mulf %127, %134 : vector<10x64xf32>
    %136 = arith.truncf %135 : vector<10x64xf32> to vector<10x64xbf16>
    %cst_49 = arith.constant dense<0.000000e+00> : vector<10x32xf32>
    %137 = tpu.matmul %136, %15, %cst_49 {dimension_numbers = #tpu.dot_dimension_numbers<[1], [0], [0], [1], [0, 0, 1, 1], [], []>} : vector<10x64xbf16>, vector<64x32xbf16>, vector<10x32xf32> -> vector<10x32xf32>
    %138 = vector.broadcast %23 : vector<1x32xf32> to vector<10x32xf32>
    %139 = arith.addf %137, %138 : vector<10x32xf32>
    %140 = arith.addf %103, %139 : vector<10x32xf32>
    %141 = vector.shape_cast %140 : vector<10x32xf32> to vector<2x5x32xf32>
    %c0_50 = arith.constant 0 : index
    %c0_51 = arith.constant 0 : index
    %c0_52 = arith.constant 0 : index
    %142 = vector.load %arg12[%c0_50, %c0_51, %c0_52] : memref<2x5x32xf32, #tpu.memory_space<vmem>>, vector<2x5x32xf32>
    tpu.vector_store %arg12[%c0_50, %c0_51, %c0_52], %141 {strides = array<i32>} : memref<2x5x32xf32, #tpu.memory_space<vmem>>, vector<2x5x32xf32>,
    return
  }
  func.func @transform_0(%arg0: i32, %arg1: i32) -> (i32, i32) {
    %c0_i32 = arith.constant 0 : i32
    %c0_i32_0 = arith.constant 0 : i32
    return %arg0, %c0_i32 : i32, i32
  }
  func.func @transform_1(%arg0: i32, %arg1: i32) -> (i32, i32) {
    %c0_i32 = arith.constant 0 : i32
    %c0_i32_0 = arith.constant 0 : i32
    %c0_i32_1 = arith.constant 0 : i32
    return %c0_i32, %c0_i32_0 : i32, i32
  }
  func.func @transform_2(%arg0: i32, %arg1: i32) -> (i32, i32) {
    %c0_i32 = arith.constant 0 : i32
    %c0_i32_0 = arith.constant 0 : i32
    %c0_i32_1 = arith.constant 0 : i32
    return %c0_i32, %c0_i32_0 : i32, i32
  }
  func.func @transform_3(%arg0: i32, %arg1: i32) -> (i32, i32, i32) {
    %c0_i32 = arith.constant 0 : i32
    %c0_i32_0 = arith.constant 0 : i32
    %c0_i32_1 = arith.constant 0 : i32
    return %arg1, %c0_i32, %c0_i32_0 : i32, i32, i32
  }
  func.func @transform_4(%arg0: i32, %arg1: i32) -> (i32, i32, i32) {
    %c0_i32 = arith.constant 0 : i32
    %c0_i32_0 = arith.constant 0 : i32
    %c0_i32_1 = arith.constant 0 : i32
    return %arg1, %c0_i32, %c0_i32_0 : i32, i32, i32
  }
  func.func @transform_5(%arg0: i32, %arg1: i32) -> (i32, i32, i32) {
    %c0_i32 = arith.constant 0 : i32
    %c0_i32_0 = arith.constant 0 : i32
    %c0_i32_1 = arith.constant 0 : i32
    return %arg1, %c0_i32, %c0_i32_0 : i32, i32, i32
  }
  func.func @transform_6(%arg0: i32, %arg1: i32) -> (i32, i32, i32) {
    %c0_i32 = arith.constant 0 : i32
    %c0_i32_0 = arith.constant 0 : i32
    %c0_i32_1 = arith.constant 0 : i32
    return %arg1, %c0_i32, %c0_i32_0 : i32, i32, i32
  }
  func.func @transform_7(%arg0: i32, %arg1: i32) -> (i32, i32, i32) {
    %c0_i32 = arith.constant 0 : i32
    %c0_i32_0 = arith.constant 0 : i32
    %c0_i32_1 = arith.constant 0 : i32
    return %arg1, %c0_i32, %c0_i32_0 : i32, i32, i32
  }
  func.func @transform_8(%arg0: i32, %arg1: i32) -> (i32, i32, i32) {
    %c0_i32 = arith.constant 0 : i32
    %c0_i32_0 = arith.constant 0 : i32
    %c0_i32_1 = arith.constant 0 : i32
    return %arg1, %c0_i32, %c0_i32_0 : i32, i32, i32
  }
  func.func @transform_9(%arg0: i32, %arg1: i32) -> (i32, i32, i32) {
    %c0_i32 = arith.constant 0 : i32
    %c0_i32_0 = arith.constant 0 : i32
    %c0_i32_1 = arith.constant 0 : i32
    return %arg1, %c0_i32, %c0_i32_0 : i32, i32, i32
  }
  func.func @transform_10(%arg0: i32, %arg1: i32) -> (i32, i32, i32) {
    %c0_i32 = arith.constant 0 : i32
    %c0_i32_0 = arith.constant 0 : i32
    %c0_i32_1 = arith.constant 0 : i32
    return %arg0, %c0_i32, %c0_i32_0 : i32, i32, i32
  }
}

module attributes {stable_mosaic.version = 11 : i64} {
  func.func @_text_stack_kernel(%arg0: i32, %arg1: i32, %arg2: memref<2x8x32xf32, #tpu.memory_space<vmem>>, %arg3: memref<1x32x96xbf16, #tpu.memory_space<vmem>>, %arg4: memref<1x32x32xbf16, #tpu.memory_space<vmem>>, %arg5: memref<1x32x64xbf16, #tpu.memory_space<vmem>>, %arg6: memref<1x64x32xbf16, #tpu.memory_space<vmem>>, %arg7: memref<1x1x96xf32, #tpu.memory_space<vmem>>, %arg8: memref<1x1x64xf32, #tpu.memory_space<vmem>>, %arg9: memref<1x6x32xf32, #tpu.memory_space<vmem>>, %arg10: memref<2x8x32xf32, #tpu.memory_space<vmem>>) attributes {dimension_semantics = [#tpu.dimension_semantics<parallel>, #tpu.dimension_semantics<arbitrary>], iteration_bounds = array<i64: 1, 2>, scalar_prefetch = 0 : i64, scratch_operands = 0 : i64, tpu.core_type = #tpu.core_type<tc>, window_params = [{transform_indices = @transform_0, window_bounds = array<i64: 2, 8, 32>}, {transform_indices = @transform_1, window_bounds = array<i64: 1, 32, 96>}, {transform_indices = @transform_2, window_bounds = array<i64: 1, 32, 32>}, {transform_indices = @transform_3, window_bounds = array<i64: 1, 32, 64>}, {transform_indices = @transform_4, window_bounds = array<i64: 1, 64, 32>}, {transform_indices = @transform_5, window_bounds = array<i64: 1, 1, 96>}, {transform_indices = @transform_6, window_bounds = array<i64: 1, 1, 64>}, {transform_indices = @transform_7, window_bounds = array<i64: 1, 6, 32>}, {transform_indices = @transform_8, window_bounds = array<i64: 2, 8, 32>}]} {
    %c0_i32 = arith.constant 0 : i32
    %0 = arith.cmpi eq, %arg1, %c0_i32 : i32
    %1 = arith.extui %0 : i1 to i32
    %c0_i32_0 = arith.constant 0 : i32
    %2 = arith.cmpi ne, %1, %c0_i32_0 : i32
    scf.if %2 {
      %c0_55 = arith.constant 0 : index
      %c0_56 = arith.constant 0 : index
      %c0_57 = arith.constant 0 : index
      %154 = vector.load %arg2[%c0_55, %c0_56, %c0_57] : memref<2x8x32xf32, #tpu.memory_space<vmem>>, vector<2x8x32xf32>
      %c0_58 = arith.constant 0 : index
      %c0_59 = arith.constant 0 : index
      %c0_60 = arith.constant 0 : index
      %155 = vector.load %arg10[%c0_58, %c0_59, %c0_60] : memref<2x8x32xf32, #tpu.memory_space<vmem>>, vector<2x8x32xf32>
      tpu.vector_store %arg10[%c0_58, %c0_59, %c0_60], %154 {strides = array<i32>} : memref<2x8x32xf32, #tpu.memory_space<vmem>>, vector<2x8x32xf32>,
    } else {
    }
    %c0 = arith.constant 0 : index
    %c0_1 = arith.constant 0 : index
    %c0_2 = arith.constant 0 : index
    %3 = vector.load %arg10[%c0, %c0_1, %c0_2] : memref<2x8x32xf32, #tpu.memory_space<vmem>>, vector<2x8x32xf32>
    %c0_3 = arith.constant 0 : index
    %c0_4 = arith.constant 0 : index
    %c0_5 = arith.constant 0 : index
    %4 = vector.load %arg3[%c0_3, %c0_4, %c0_5] : memref<1x32x96xbf16, #tpu.memory_space<vmem>>, vector<1x32x96xbf16>
    %5 = vector.shape_cast %4 : vector<1x32x96xbf16> to vector<32x96xbf16>
    %c0_6 = arith.constant 0 : index
    %c0_7 = arith.constant 0 : index
    %c0_8 = arith.constant 0 : index
    %6 = vector.load %arg7[%c0_6, %c0_7, %c0_8] : memref<1x1x96xf32, #tpu.memory_space<vmem>>, vector<1x1x96xf32>
    %7 = vector.shape_cast %6 : vector<1x1x96xf32> to vector<1x96xf32>
    %c0_9 = arith.constant 0 : index
    %c0_10 = arith.constant 0 : index
    %c0_11 = arith.constant 0 : index
    %8 = vector.load %arg4[%c0_9, %c0_10, %c0_11] : memref<1x32x32xbf16, #tpu.memory_space<vmem>>, vector<1x32x32xbf16>
    %9 = vector.shape_cast %8 : vector<1x32x32xbf16> to vector<32x32xbf16>
    %c0_12 = arith.constant 0 : index
    %c0_13 = arith.constant 0 : index
    %c0_14 = arith.constant 0 : index
    %10 = vector.load %arg5[%c0_12, %c0_13, %c0_14] : memref<1x32x64xbf16, #tpu.memory_space<vmem>>, vector<1x32x64xbf16>
    %11 = vector.shape_cast %10 : vector<1x32x64xbf16> to vector<32x64xbf16>
    %c0_15 = arith.constant 0 : index
    %c0_16 = arith.constant 0 : index
    %c0_17 = arith.constant 0 : index
    %12 = vector.load %arg8[%c0_15, %c0_16, %c0_17] : memref<1x1x64xf32, #tpu.memory_space<vmem>>, vector<1x1x64xf32>
    %13 = vector.shape_cast %12 : vector<1x1x64xf32> to vector<1x64xf32>
    %c0_18 = arith.constant 0 : index
    %c0_19 = arith.constant 0 : index
    %c0_20 = arith.constant 0 : index
    %14 = vector.load %arg6[%c0_18, %c0_19, %c0_20] : memref<1x64x32xbf16, #tpu.memory_space<vmem>>, vector<1x64x32xbf16>
    %15 = vector.shape_cast %14 : vector<1x64x32xbf16> to vector<64x32xbf16>
    %c0_21 = arith.constant 0 : index
    %c0_22 = arith.constant 0 : index
    %c0_23 = arith.constant 0 : index
    %16 = vector.load %arg9[%c0_21, %c0_22, %c0_23] : memref<1x6x32xf32, #tpu.memory_space<vmem>>, vector<1x6x32xf32>
    %17 = vector.shape_cast %16 : vector<1x6x32xf32> to vector<6x32xf32>
    %18 = vector.extract_strided_slice %17 {offsets = [0, 0], sizes = [1, 32], strides = [1, 1]} : vector<6x32xf32> to vector<1x32xf32>
    %19 = vector.extract_strided_slice %17 {offsets = [1, 0], sizes = [1, 32], strides = [1, 1]} : vector<6x32xf32> to vector<1x32xf32>
    %20 = vector.extract_strided_slice %17 {offsets = [2, 0], sizes = [1, 32], strides = [1, 1]} : vector<6x32xf32> to vector<1x32xf32>
    %21 = vector.extract_strided_slice %17 {offsets = [3, 0], sizes = [1, 32], strides = [1, 1]} : vector<6x32xf32> to vector<1x32xf32>
    %22 = vector.extract_strided_slice %17 {offsets = [4, 0], sizes = [1, 32], strides = [1, 1]} : vector<6x32xf32> to vector<1x32xf32>
    %23 = vector.extract_strided_slice %17 {offsets = [5, 0], sizes = [1, 32], strides = [1, 1]} : vector<6x32xf32> to vector<1x32xf32>
    %24 = vector.shape_cast %3 : vector<2x8x32xf32> to vector<16x32xf32>
    %cst = arith.constant dense<0.000000e+00> : vector<16xf32>
    %25 = vector.multi_reduction <add>, %24, %cst [1] : vector<16x32xf32> to vector<16xf32>
    %26 = vector.shape_cast %25 : vector<16xf32> to vector<16x1xf32>
    %cst_24 = arith.constant 3.200000e+01 : f32
    %27 = vector.broadcast %cst_24 : f32 to vector<16x1xf32>
    %28 = arith.divf %26, %27 : vector<16x1xf32>
    %29 = vector.broadcast %28 : vector<16x1xf32> to vector<16x32xf32>
    %30 = arith.subf %24, %29 : vector<16x32xf32>
    %31 = arith.mulf %30, %30 : vector<16x32xf32>
    %cst_25 = arith.constant dense<0.000000e+00> : vector<16xf32>
    %32 = vector.multi_reduction <add>, %31, %cst_25 [1] : vector<16x32xf32> to vector<16xf32>
    %33 = vector.shape_cast %32 : vector<16xf32> to vector<16x1xf32>
    %cst_26 = arith.constant 3.200000e+01 : f32
    %34 = vector.broadcast %cst_26 : f32 to vector<16x1xf32>
    %35 = arith.divf %33, %34 : vector<16x1xf32>
    %cst_27 = arith.constant 9.99999974E-6 : f32
    %36 = vector.broadcast %cst_27 : f32 to vector<16x1xf32>
    %37 = arith.addf %35, %36 : vector<16x1xf32>
    %38 = math.rsqrt %37 : vector<16x1xf32>
    %39 = vector.broadcast %38 : vector<16x1xf32> to vector<16x32xf32>
    %40 = arith.mulf %30, %39 : vector<16x32xf32>
    %41 = vector.broadcast %18 : vector<1x32xf32> to vector<16x32xf32>
    %42 = arith.mulf %40, %41 : vector<16x32xf32>
    %43 = vector.broadcast %19 : vector<1x32xf32> to vector<16x32xf32>
    %44 = arith.addf %42, %43 : vector<16x32xf32>
    %45 = arith.truncf %44 : vector<16x32xf32> to vector<16x32xbf16>
    %cst_28 = arith.constant dense<0.000000e+00> : vector<16x96xf32>
    %46 = tpu.matmul %45, %5, %cst_28 {dimension_numbers = #tpu.dot_dimension_numbers<[1], [0], [0], [1], [0, 0, 1, 1], [], []>} : vector<16x32xbf16>, vector<32x96xbf16>, vector<16x96xf32> -> vector<16x96xf32>
    %47 = vector.broadcast %7 : vector<1x96xf32> to vector<16x96xf32>
    %48 = arith.addf %46, %47 : vector<16x96xf32>
    %49 = vector.shape_cast %48 : vector<16x96xf32> to vector<2x8x96xf32>
    %50 = tpu.iota {dimensions = array<i32: 0>} : vector<8x8xi32>
    %51 = tpu.iota {dimensions = array<i32: 1>} : vector<8x8xi32>
    %52 = arith.cmpi sle, %51, %50 : vector<8x8xi32>
    %cst_29 = arith.constant 0.000000e+00 : f32
    %cst_30 = arith.constant -1.000000e+09 : f32
    %53 = vector.broadcast %cst_29 : f32 to vector<8x8xf32>
    %54 = vector.broadcast %cst_30 : f32 to vector<8x8xf32>
    %55 = arith.select %52, %53, %54 : vector<8x8xi1>, vector<8x8xf32>
    %56 = vector.shape_cast %55 : vector<8x8xf32> to vector<1x8x8xf32>
    %57 = vector.extract_strided_slice %49 {offsets = [0, 0, 0], sizes = [2, 8, 16], strides = [1, 1, 1]} : vector<2x8x96xf32> to vector<2x8x16xf32>
    %58 = arith.truncf %57 : vector<2x8x16xf32> to vector<2x8x16xbf16>
    %59 = vector.extract_strided_slice %49 {offsets = [0, 0, 32], sizes = [2, 8, 16], strides = [1, 1, 1]} : vector<2x8x96xf32> to vector<2x8x16xf32>
    %60 = arith.truncf %59 : vector<2x8x16xf32> to vector<2x8x16xbf16>
    %61 = vector.extract_strided_slice %49 {offsets = [0, 0, 64], sizes = [2, 8, 16], strides = [1, 1, 1]} : vector<2x8x96xf32> to vector<2x8x16xf32>
    %62 = arith.truncf %61 : vector<2x8x16xf32> to vector<2x8x16xbf16>
    "tpu.trace_start"() <{level = 10 : i32, message = "bqd,bkd->bqk"}> : () -> ()
    %cst_31 = arith.constant dense<0.000000e+00> : vector<2x8x8xf32>
    %63 = tpu.matmul %58, %60, %cst_31 {dimension_numbers = #tpu.dot_dimension_numbers<[2], [2], [1], [1], [0, 0, 0, 1, 1, 1], [0], [0]>} : vector<2x8x16xbf16>, vector<2x8x16xbf16>, vector<2x8x8xf32> -> vector<2x8x8xf32>
    "tpu.trace_stop"() : () -> ()
    %cst_32 = arith.constant 2.500000e-01 : f32
    %64 = vector.broadcast %cst_32 : f32 to vector<2x8x8xf32>
    %65 = arith.mulf %63, %64 : vector<2x8x8xf32>
    %66 = vector.broadcast %56 : vector<1x8x8xf32> to vector<2x8x8xf32>
    %67 = arith.addf %65, %66 : vector<2x8x8xf32>
    %cst_33 = arith.constant dense<0xFF800000> : vector<2x8xf32>
    %68 = vector.multi_reduction <maximumf>, %67, %cst_33 [2] : vector<2x8x8xf32> to vector<2x8xf32>
    %69 = vector.shape_cast %68 : vector<2x8xf32> to vector<2x8x1xf32>
    %70 = vector.broadcast %69 : vector<2x8x1xf32> to vector<2x8x8xf32>
    %71 = arith.subf %67, %70 : vector<2x8x8xf32>
    %72 = math.exp %71 : vector<2x8x8xf32>
    %cst_34 = arith.constant dense<0.000000e+00> : vector<2x8xf32>
    %73 = vector.multi_reduction <add>, %72, %cst_34 [2] : vector<2x8x8xf32> to vector<2x8xf32>
    %74 = vector.shape_cast %73 : vector<2x8xf32> to vector<2x8x1xf32>
    %75 = tpu.reciprocal %74 {approx = true} : vector<2x8x1xf32> -> vector<2x8x1xf32>
    %76 = vector.broadcast %75 : vector<2x8x1xf32> to vector<2x8x8xf32>
    %77 = arith.mulf %72, %76 : vector<2x8x8xf32>
    %78 = arith.truncf %77 : vector<2x8x8xf32> to vector<2x8x8xbf16>
    "tpu.trace_start"() <{level = 10 : i32, message = "bqk,bkd->bqd"}> : () -> ()
    %cst_35 = arith.constant dense<0.000000e+00> : vector<2x8x16xf32>
    %79 = tpu.matmul %78, %62, %cst_35 {dimension_numbers = #tpu.dot_dimension_numbers<[2], [1], [1], [2], [0, 0, 0, 1, 1, 2], [0], [0]>} : vector<2x8x8xbf16>, vector<2x8x16xbf16>, vector<2x8x16xf32> -> vector<2x8x16xf32>
    "tpu.trace_stop"() : () -> ()
    %80 = vector.shape_cast %79 : vector<2x8x16xf32> to vector<16x16xf32>
    %81 = arith.truncf %80 : vector<16x16xf32> to vector<16x16xbf16>
    %82 = vector.extract_strided_slice %9 {offsets = [0, 0], sizes = [16, 32], strides = [1, 1]} : vector<32x32xbf16> to vector<16x32xbf16>
    %cst_36 = arith.constant dense<0.000000e+00> : vector<16x32xf32>
    %83 = tpu.matmul %81, %82, %cst_36 {dimension_numbers = #tpu.dot_dimension_numbers<[1], [0], [0], [1], [0, 0, 1, 1], [], []>} : vector<16x16xbf16>, vector<16x32xbf16>, vector<16x32xf32> -> vector<16x32xf32>
    %84 = vector.extract_strided_slice %49 {offsets = [0, 0, 16], sizes = [2, 8, 16], strides = [1, 1, 1]} : vector<2x8x96xf32> to vector<2x8x16xf32>
    %85 = arith.truncf %84 : vector<2x8x16xf32> to vector<2x8x16xbf16>
    %86 = vector.extract_strided_slice %49 {offsets = [0, 0, 48], sizes = [2, 8, 16], strides = [1, 1, 1]} : vector<2x8x96xf32> to vector<2x8x16xf32>
    %87 = arith.truncf %86 : vector<2x8x16xf32> to vector<2x8x16xbf16>
    %88 = vector.extract_strided_slice %49 {offsets = [0, 0, 80], sizes = [2, 8, 16], strides = [1, 1, 1]} : vector<2x8x96xf32> to vector<2x8x16xf32>
    %89 = arith.truncf %88 : vector<2x8x16xf32> to vector<2x8x16xbf16>
    "tpu.trace_start"() <{level = 10 : i32, message = "bqd,bkd->bqk"}> : () -> ()
    %cst_37 = arith.constant dense<0.000000e+00> : vector<2x8x8xf32>
    %90 = tpu.matmul %85, %87, %cst_37 {dimension_numbers = #tpu.dot_dimension_numbers<[2], [2], [1], [1], [0, 0, 0, 1, 1, 1], [0], [0]>} : vector<2x8x16xbf16>, vector<2x8x16xbf16>, vector<2x8x8xf32> -> vector<2x8x8xf32>
    "tpu.trace_stop"() : () -> ()
    %cst_38 = arith.constant 2.500000e-01 : f32
    %91 = vector.broadcast %cst_38 : f32 to vector<2x8x8xf32>
    %92 = arith.mulf %90, %91 : vector<2x8x8xf32>
    %93 = vector.broadcast %56 : vector<1x8x8xf32> to vector<2x8x8xf32>
    %94 = arith.addf %92, %93 : vector<2x8x8xf32>
    %cst_39 = arith.constant dense<0xFF800000> : vector<2x8xf32>
    %95 = vector.multi_reduction <maximumf>, %94, %cst_39 [2] : vector<2x8x8xf32> to vector<2x8xf32>
    %96 = vector.shape_cast %95 : vector<2x8xf32> to vector<2x8x1xf32>
    %97 = vector.broadcast %96 : vector<2x8x1xf32> to vector<2x8x8xf32>
    %98 = arith.subf %94, %97 : vector<2x8x8xf32>
    %99 = math.exp %98 : vector<2x8x8xf32>
    %cst_40 = arith.constant dense<0.000000e+00> : vector<2x8xf32>
    %100 = vector.multi_reduction <add>, %99, %cst_40 [2] : vector<2x8x8xf32> to vector<2x8xf32>
    %101 = vector.shape_cast %100 : vector<2x8xf32> to vector<2x8x1xf32>
    %102 = tpu.reciprocal %101 {approx = true} : vector<2x8x1xf32> -> vector<2x8x1xf32>
    %103 = vector.broadcast %102 : vector<2x8x1xf32> to vector<2x8x8xf32>
    %104 = arith.mulf %99, %103 : vector<2x8x8xf32>
    %105 = arith.truncf %104 : vector<2x8x8xf32> to vector<2x8x8xbf16>
    "tpu.trace_start"() <{level = 10 : i32, message = "bqk,bkd->bqd"}> : () -> ()
    %cst_41 = arith.constant dense<0.000000e+00> : vector<2x8x16xf32>
    %106 = tpu.matmul %105, %89, %cst_41 {dimension_numbers = #tpu.dot_dimension_numbers<[2], [1], [1], [2], [0, 0, 0, 1, 1, 2], [0], [0]>} : vector<2x8x8xbf16>, vector<2x8x16xbf16>, vector<2x8x16xf32> -> vector<2x8x16xf32>
    "tpu.trace_stop"() : () -> ()
    %107 = vector.shape_cast %106 : vector<2x8x16xf32> to vector<16x16xf32>
    %108 = arith.truncf %107 : vector<16x16xf32> to vector<16x16xbf16>
    %109 = vector.extract_strided_slice %9 {offsets = [16, 0], sizes = [16, 32], strides = [1, 1]} : vector<32x32xbf16> to vector<16x32xbf16>
    %cst_42 = arith.constant dense<0.000000e+00> : vector<16x32xf32>
    %110 = tpu.matmul %108, %109, %cst_42 {dimension_numbers = #tpu.dot_dimension_numbers<[1], [0], [0], [1], [0, 0, 1, 1], [], []>} : vector<16x16xbf16>, vector<16x32xbf16>, vector<16x32xf32> -> vector<16x32xf32>
    %111 = arith.addf %83, %110 : vector<16x32xf32>
    %112 = arith.addf %24, %111 : vector<16x32xf32>
    %113 = vector.broadcast %22 : vector<1x32xf32> to vector<16x32xf32>
    %114 = arith.addf %112, %113 : vector<16x32xf32>
    %cst_43 = arith.constant dense<0.000000e+00> : vector<16xf32>
    %115 = vector.multi_reduction <add>, %114, %cst_43 [1] : vector<16x32xf32> to vector<16xf32>
    %116 = vector.shape_cast %115 : vector<16xf32> to vector<16x1xf32>
    %cst_44 = arith.constant 3.200000e+01 : f32
    %117 = vector.broadcast %cst_44 : f32 to vector<16x1xf32>
    %118 = arith.divf %116, %117 : vector<16x1xf32>
    %119 = vector.broadcast %118 : vector<16x1xf32> to vector<16x32xf32>
    %120 = arith.subf %114, %119 : vector<16x32xf32>
    %121 = arith.mulf %120, %120 : vector<16x32xf32>
    %cst_45 = arith.constant dense<0.000000e+00> : vector<16xf32>
    %122 = vector.multi_reduction <add>, %121, %cst_45 [1] : vector<16x32xf32> to vector<16xf32>
    %123 = vector.shape_cast %122 : vector<16xf32> to vector<16x1xf32>
    %cst_46 = arith.constant 3.200000e+01 : f32
    %124 = vector.broadcast %cst_46 : f32 to vector<16x1xf32>
    %125 = arith.divf %123, %124 : vector<16x1xf32>
    %cst_47 = arith.constant 9.99999974E-6 : f32
    %126 = vector.broadcast %cst_47 : f32 to vector<16x1xf32>
    %127 = arith.addf %125, %126 : vector<16x1xf32>
    %128 = math.rsqrt %127 : vector<16x1xf32>
    %129 = vector.broadcast %128 : vector<16x1xf32> to vector<16x32xf32>
    %130 = arith.mulf %120, %129 : vector<16x32xf32>
    %131 = vector.broadcast %20 : vector<1x32xf32> to vector<16x32xf32>
    %132 = arith.mulf %130, %131 : vector<16x32xf32>
    %133 = vector.broadcast %21 : vector<1x32xf32> to vector<16x32xf32>
    %134 = arith.addf %132, %133 : vector<16x32xf32>
    %135 = arith.truncf %134 : vector<16x32xf32> to vector<16x32xbf16>
    %cst_48 = arith.constant dense<0.000000e+00> : vector<16x64xf32>
    %136 = tpu.matmul %135, %11, %cst_48 {dimension_numbers = #tpu.dot_dimension_numbers<[1], [0], [0], [1], [0, 0, 1, 1], [], []>} : vector<16x32xbf16>, vector<32x64xbf16>, vector<16x64xf32> -> vector<16x64xf32>
    %137 = vector.broadcast %13 : vector<1x64xf32> to vector<16x64xf32>
    %138 = arith.addf %136, %137 : vector<16x64xf32>
    %cst_49 = arith.constant 1.702000e+00 : f32
    %139 = vector.broadcast %cst_49 : f32 to vector<16x64xf32>
    %140 = arith.mulf %139, %138 : vector<16x64xf32>
    %141 = arith.negf %140 : vector<16x64xf32>
    %142 = math.exp %141 : vector<16x64xf32>
    %cst_50 = arith.constant 1.000000e+00 : f32
    %143 = vector.broadcast %cst_50 : f32 to vector<16x64xf32>
    %144 = arith.addf %143, %142 : vector<16x64xf32>
    %145 = arith.divf %143, %144 : vector<16x64xf32>
    %146 = arith.mulf %138, %145 : vector<16x64xf32>
    %147 = arith.truncf %146 : vector<16x64xf32> to vector<16x64xbf16>
    %cst_51 = arith.constant dense<0.000000e+00> : vector<16x32xf32>
    %148 = tpu.matmul %147, %15, %cst_51 {dimension_numbers = #tpu.dot_dimension_numbers<[1], [0], [0], [1], [0, 0, 1, 1], [], []>} : vector<16x64xbf16>, vector<64x32xbf16>, vector<16x32xf32> -> vector<16x32xf32>
    %149 = vector.broadcast %23 : vector<1x32xf32> to vector<16x32xf32>
    %150 = arith.addf %148, %149 : vector<16x32xf32>
    %151 = arith.addf %114, %150 : vector<16x32xf32>
    %152 = vector.shape_cast %151 : vector<16x32xf32> to vector<2x8x32xf32>
    %c0_52 = arith.constant 0 : index
    %c0_53 = arith.constant 0 : index
    %c0_54 = arith.constant 0 : index
    %153 = vector.load %arg10[%c0_52, %c0_53, %c0_54] : memref<2x8x32xf32, #tpu.memory_space<vmem>>, vector<2x8x32xf32>
    tpu.vector_store %arg10[%c0_52, %c0_53, %c0_54], %152 {strides = array<i32>} : memref<2x8x32xf32, #tpu.memory_space<vmem>>, vector<2x8x32xf32>,
    return
  }
  func.func @transform_0(%arg0: i32, %arg1: i32) -> (i32, i32, i32) {
    %c0_i32 = arith.constant 0 : i32
    %c0_i32_0 = arith.constant 0 : i32
    %c0_i32_1 = arith.constant 0 : i32
    return %arg0, %c0_i32, %c0_i32_0 : i32, i32, i32
  }
  func.func @transform_1(%arg0: i32, %arg1: i32) -> (i32, i32, i32) {
    %c0_i32 = arith.constant 0 : i32
    %c0_i32_0 = arith.constant 0 : i32
    %c0_i32_1 = arith.constant 0 : i32
    return %arg1, %c0_i32, %c0_i32_0 : i32, i32, i32
  }
  func.func @transform_2(%arg0: i32, %arg1: i32) -> (i32, i32, i32) {
    %c0_i32 = arith.constant 0 : i32
    %c0_i32_0 = arith.constant 0 : i32
    %c0_i32_1 = arith.constant 0 : i32
    return %arg1, %c0_i32, %c0_i32_0 : i32, i32, i32
  }
  func.func @transform_3(%arg0: i32, %arg1: i32) -> (i32, i32, i32) {
    %c0_i32 = arith.constant 0 : i32
    %c0_i32_0 = arith.constant 0 : i32
    %c0_i32_1 = arith.constant 0 : i32
    return %arg1, %c0_i32, %c0_i32_0 : i32, i32, i32
  }
  func.func @transform_4(%arg0: i32, %arg1: i32) -> (i32, i32, i32) {
    %c0_i32 = arith.constant 0 : i32
    %c0_i32_0 = arith.constant 0 : i32
    %c0_i32_1 = arith.constant 0 : i32
    return %arg1, %c0_i32, %c0_i32_0 : i32, i32, i32
  }
  func.func @transform_5(%arg0: i32, %arg1: i32) -> (i32, i32, i32) {
    %c0_i32 = arith.constant 0 : i32
    %c0_i32_0 = arith.constant 0 : i32
    %c0_i32_1 = arith.constant 0 : i32
    return %arg1, %c0_i32, %c0_i32_0 : i32, i32, i32
  }
  func.func @transform_6(%arg0: i32, %arg1: i32) -> (i32, i32, i32) {
    %c0_i32 = arith.constant 0 : i32
    %c0_i32_0 = arith.constant 0 : i32
    %c0_i32_1 = arith.constant 0 : i32
    return %arg1, %c0_i32, %c0_i32_0 : i32, i32, i32
  }
  func.func @transform_7(%arg0: i32, %arg1: i32) -> (i32, i32, i32) {
    %c0_i32 = arith.constant 0 : i32
    %c0_i32_0 = arith.constant 0 : i32
    %c0_i32_1 = arith.constant 0 : i32
    return %arg1, %c0_i32, %c0_i32_0 : i32, i32, i32
  }
  func.func @transform_8(%arg0: i32, %arg1: i32) -> (i32, i32, i32) {
    %c0_i32 = arith.constant 0 : i32
    %c0_i32_0 = arith.constant 0 : i32
    %c0_i32_1 = arith.constant 0 : i32
    return %arg0, %c0_i32, %c0_i32_0 : i32, i32, i32
  }
}

module attributes {stable_mosaic.version = 11 : i64} {
  func.func @_tail_kernel(%arg0: memref<2x32xf32, #tpu.memory_space<vmem>>, %arg1: memref<2x32xf32, #tpu.memory_space<vmem>>, %arg2: memref<32x16xbf16, #tpu.memory_space<vmem>>, %arg3: memref<2x32xf32, #tpu.memory_space<vmem>>, %arg4: memref<2x32xf32, #tpu.memory_space<vmem>>, %arg5: memref<32x16xbf16, #tpu.memory_space<vmem>>, %arg6: memref<1x1xf32, #tpu.memory_space<smem>>, %arg7: memref<2x2xf32, #tpu.memory_space<vmem>>) attributes {dimension_semantics = [], scalar_prefetch = 0 : i64, scratch_operands = 0 : i64, tpu.core_type = #tpu.core_type<tc>} {
    %c0 = arith.constant 0 : index
    %c0_0 = arith.constant 0 : index
    %0 = vector.load %arg0[%c0, %c0_0] : memref<2x32xf32, #tpu.memory_space<vmem>>, vector<2x32xf32>
    %c0_1 = arith.constant 0 : index
    %c0_2 = arith.constant 0 : index
    %1 = vector.load %arg1[%c0_1, %c0_2] : memref<2x32xf32, #tpu.memory_space<vmem>>, vector<1x32xf32>
    %c1 = arith.constant 1 : index
    %c0_3 = arith.constant 0 : index
    %2 = vector.load %arg1[%c1, %c0_3] : memref<2x32xf32, #tpu.memory_space<vmem>>, vector<1x32xf32>
    %cst = arith.constant dense<0.000000e+00> : vector<2xf32>
    %3 = vector.multi_reduction <add>, %0, %cst [1] : vector<2x32xf32> to vector<2xf32>
    %4 = vector.shape_cast %3 : vector<2xf32> to vector<2x1xf32>
    %cst_4 = arith.constant 3.200000e+01 : f32
    %5 = vector.broadcast %cst_4 : f32 to vector<2x1xf32>
    %6 = arith.divf %4, %5 : vector<2x1xf32>
    %7 = vector.broadcast %6 : vector<2x1xf32> to vector<2x32xf32>
    %8 = arith.subf %0, %7 : vector<2x32xf32>
    %9 = arith.mulf %8, %8 : vector<2x32xf32>
    %cst_5 = arith.constant dense<0.000000e+00> : vector<2xf32>
    %10 = vector.multi_reduction <add>, %9, %cst_5 [1] : vector<2x32xf32> to vector<2xf32>
    %11 = vector.shape_cast %10 : vector<2xf32> to vector<2x1xf32>
    %cst_6 = arith.constant 3.200000e+01 : f32
    %12 = vector.broadcast %cst_6 : f32 to vector<2x1xf32>
    %13 = arith.divf %11, %12 : vector<2x1xf32>
    %cst_7 = arith.constant 9.99999974E-6 : f32
    %14 = vector.broadcast %cst_7 : f32 to vector<2x1xf32>
    %15 = arith.addf %13, %14 : vector<2x1xf32>
    %16 = math.rsqrt %15 : vector<2x1xf32>
    %17 = vector.broadcast %16 : vector<2x1xf32> to vector<2x32xf32>
    %18 = arith.mulf %8, %17 : vector<2x32xf32>
    %19 = vector.broadcast %1 : vector<1x32xf32> to vector<2x32xf32>
    %20 = arith.mulf %18, %19 : vector<2x32xf32>
    %21 = vector.broadcast %2 : vector<1x32xf32> to vector<2x32xf32>
    %22 = arith.addf %20, %21 : vector<2x32xf32>
    %c0_8 = arith.constant 0 : index
    %c0_9 = arith.constant 0 : index
    %23 = vector.load %arg2[%c0_8, %c0_9] : memref<32x16xbf16, #tpu.memory_space<vmem>>, vector<32x16xbf16>
    %24 = arith.truncf %22 : vector<2x32xf32> to vector<2x32xbf16>
    %cst_10 = arith.constant dense<0.000000e+00> : vector<2x16xf32>
    %25 = tpu.matmul %24, %23, %cst_10 {dimension_numbers = #tpu.dot_dimension_numbers<[1], [0], [0], [1], [0, 0, 1, 1], [], []>} : vector<2x32xbf16>, vector<32x16xbf16>, vector<2x16xf32> -> vector<2x16xf32>
    %c0_11 = arith.constant 0 : index
    %c0_12 = arith.constant 0 : index
    %26 = vector.load %arg3[%c0_11, %c0_12] : memref<2x32xf32, #tpu.memory_space<vmem>>, vector<2x32xf32>
    %c0_13 = arith.constant 0 : index
    %c0_14 = arith.constant 0 : index
    %27 = vector.load %arg4[%c0_13, %c0_14] : memref<2x32xf32, #tpu.memory_space<vmem>>, vector<1x32xf32>
    %c1_15 = arith.constant 1 : index
    %c0_16 = arith.constant 0 : index
    %28 = vector.load %arg4[%c1_15, %c0_16] : memref<2x32xf32, #tpu.memory_space<vmem>>, vector<1x32xf32>
    %cst_17 = arith.constant dense<0.000000e+00> : vector<2xf32>
    %29 = vector.multi_reduction <add>, %26, %cst_17 [1] : vector<2x32xf32> to vector<2xf32>
    %30 = vector.shape_cast %29 : vector<2xf32> to vector<2x1xf32>
    %cst_18 = arith.constant 3.200000e+01 : f32
    %31 = vector.broadcast %cst_18 : f32 to vector<2x1xf32>
    %32 = arith.divf %30, %31 : vector<2x1xf32>
    %33 = vector.broadcast %32 : vector<2x1xf32> to vector<2x32xf32>
    %34 = arith.subf %26, %33 : vector<2x32xf32>
    %35 = arith.mulf %34, %34 : vector<2x32xf32>
    %cst_19 = arith.constant dense<0.000000e+00> : vector<2xf32>
    %36 = vector.multi_reduction <add>, %35, %cst_19 [1] : vector<2x32xf32> to vector<2xf32>
    %37 = vector.shape_cast %36 : vector<2xf32> to vector<2x1xf32>
    %cst_20 = arith.constant 3.200000e+01 : f32
    %38 = vector.broadcast %cst_20 : f32 to vector<2x1xf32>
    %39 = arith.divf %37, %38 : vector<2x1xf32>
    %cst_21 = arith.constant 9.99999974E-6 : f32
    %40 = vector.broadcast %cst_21 : f32 to vector<2x1xf32>
    %41 = arith.addf %39, %40 : vector<2x1xf32>
    %42 = math.rsqrt %41 : vector<2x1xf32>
    %43 = vector.broadcast %42 : vector<2x1xf32> to vector<2x32xf32>
    %44 = arith.mulf %34, %43 : vector<2x32xf32>
    %45 = vector.broadcast %27 : vector<1x32xf32> to vector<2x32xf32>
    %46 = arith.mulf %44, %45 : vector<2x32xf32>
    %47 = vector.broadcast %28 : vector<1x32xf32> to vector<2x32xf32>
    %48 = arith.addf %46, %47 : vector<2x32xf32>
    %c0_22 = arith.constant 0 : index
    %c0_23 = arith.constant 0 : index
    %49 = vector.load %arg5[%c0_22, %c0_23] : memref<32x16xbf16, #tpu.memory_space<vmem>>, vector<32x16xbf16>
    %50 = arith.truncf %48 : vector<2x32xf32> to vector<2x32xbf16>
    %cst_24 = arith.constant dense<0.000000e+00> : vector<2x16xf32>
    %51 = tpu.matmul %50, %49, %cst_24 {dimension_numbers = #tpu.dot_dimension_numbers<[1], [0], [0], [1], [0, 0, 1, 1], [], []>} : vector<2x32xbf16>, vector<32x16xbf16>, vector<2x16xf32> -> vector<2x16xf32>
    %52 = arith.mulf %25, %25 : vector<2x16xf32>
    %cst_25 = arith.constant dense<0.000000e+00> : vector<2xf32>
    %53 = vector.multi_reduction <add>, %52, %cst_25 [1] : vector<2x16xf32> to vector<2xf32>
    %54 = vector.shape_cast %53 : vector<2xf32> to vector<2x1xf32>
    %55 = math.rsqrt %54 : vector<2x1xf32>
    %56 = vector.broadcast %55 : vector<2x1xf32> to vector<2x16xf32>
    %57 = arith.mulf %25, %56 : vector<2x16xf32>
    %58 = arith.mulf %51, %51 : vector<2x16xf32>
    %cst_26 = arith.constant dense<0.000000e+00> : vector<2xf32>
    %59 = vector.multi_reduction <add>, %58, %cst_26 [1] : vector<2x16xf32> to vector<2xf32>
    %60 = vector.shape_cast %59 : vector<2xf32> to vector<2x1xf32>
    %61 = math.rsqrt %60 : vector<2x1xf32>
    %62 = vector.broadcast %61 : vector<2x1xf32> to vector<2x16xf32>
    %63 = arith.mulf %51, %62 : vector<2x16xf32>
    %c0_27 = arith.constant 0 : index
    %c0_28 = arith.constant 0 : index
    %64 = memref.load %arg6[%c0_27, %c0_28] : memref<1x1xf32, #tpu.memory_space<smem>>
    %65 = math.exp %64 : f32
    %cst_29 = arith.constant dense<0.000000e+00> : vector<2x2xf32>
    %66 = tpu.matmul %63, %57, %cst_29 {dimension_numbers = #tpu.dot_dimension_numbers<[1], [1], [0], [0], [0, 0, 1, 0], [], []>} : vector<2x16xf32>, vector<2x16xf32>, vector<2x2xf32> -> vector<2x2xf32>
    %67 = vector.broadcast %65 : f32 to vector<2x2xf32>
    %68 = arith.mulf %66, %67 : vector<2x2xf32>
    %c0_30 = arith.constant 0 : index
    %c0_31 = arith.constant 0 : index
    %69 = vector.load %arg7[%c0_30, %c0_31] : memref<2x2xf32, #tpu.memory_space<vmem>>, vector<2x2xf32>
    tpu.vector_store %arg7[%c0_30, %c0_31], %68 {strides = array<i32>} : memref<2x2xf32, #tpu.memory_space<vmem>>, vector<2x2xf32>,
    return
  }
}

</mosaic_0001>

<bundles_post_ra>
// kernel: clip_forward.5
= control target key start
LH: loop header
LB: loop body
LE: loop exit
PB: predicated region body
PF: predicated region fallthrough
CT: control target
= control target key end

     0   :  { %vm31_vm0 = vcmask 254976   ;;  %v365_v14 = vmov 0.0   ;;  %vm366_vm1 = vmmov 0   ;;  %vm73_vm2 = vcmask 261120   ;;  %s450_s0 = inlined_call_operand.vmem [shape: f32[2,32], index: 0, kind: input, shape index: {}]   ;;  %s451_s3 = inlined_call_operand.vmem [shape: f32[2,32], index: 3, kind: input, shape index: {}]   ;;  %s452_s2 = inlined_call_operand.vmem [shape: bf16[32,16], index: 2, kind: input, shape index: {}]   ;;  %s453_s5 = inlined_call_operand.vmem [shape: bf16[32,16], index: 5, kind: input, shape index: {}]   ;;  %s454_s1 = inlined_call_operand.vmem [shape: f32[2,32], index: 1, kind: input, shape index: {}]   ;;  %s455_s4 = inlined_call_operand.vmem [shape: f32[2,32], index: 4, kind: input, shape index: {}]   ;;  %s456_s6 = inlined_call_operand.<no memory space> [shape: f32[1,1], index: 6, kind: input, shape index: {}]   ;;  %s457_s7 = inlined_call_operand.vmem [shape: f32[2,2], index: 7, kind: output, shape index: {}]  }
   0x1   :  { %v28_v0 = vld [vmem:[%s450_s0] sm:$0x3]  ;;  %326 = vmatprep.subr.bf16.mxu0 %v365_v14  ;;  %334 = vmatprep.subr.bf16.mxu1 %v365_v14  ;;  %v352_v16 = vld [vmem:[%s452_s2 + $0x8] sm:$0xff]   ;;  %vm204_vm3 = vcmask 123904   ;;  %v217_v51 = vstv %s456_s6  ;;  %vm221_vm4 = vcmask 130048   ;;  %vm300_vm5 = vcmask 9216  }
   0x2   :  { %v117_v1 = vld [vmem:[%s451_s3] sm:$0x3]  ;;  %v32_v2 = vsel %vm31_vm0, %v28_v0, 0.0  ;;  %330 = vmatprep.mubr.msk.bf16.mxu0 %vm366_vm1, %v365_v14  ;;  %338 = vmatprep.mubr.msk.bf16.mxu1 %vm366_vm1, %v365_v14  ;;  %v354_v18 = vld [vmem:[%s453_s5 + $0x8] sm:$0xff]   ;;  %v218_v52 = vmul.f32 1.442695, %v217_v51 }
   0x3   :  { %33 = vadd.xlane.f32.xlu0 %v32_v2  ;;  %v120_v3 = vsel %vm31_vm0, %v117_v1, 0.0  ;;  %v351_v15 = vld [vmem:[%s452_s2] sm:$0xff]  }
   0x4   :  { %327 = vmatpush3.bf16.msra.mxu0 %v351_v15  ;;  %v353_v17 = vld [vmem:[%s453_s5] sm:$0xff]  }
   0x5   :  { %328 = vmatprep.subr.bf16.mxu0 %v365_v14  ;;  %335 = vmatpush3.bf16.msra.mxu1 %v353_v17  ;;  %v306_v26 = vld [vmem:[%s454_s1] ss:$0 sm:$0xff]  ;;  %v307_v28 = vld [vmem:[%s454_s1 + $0x1] ss:$0 sm:$0xff] }
   0x6   :  { %336 = vmatprep.subr.bf16.mxu1 %v365_v14  ;;  %v311_v31 = vld [vmem:[%s455_s4] ss:$0 sm:$0xff]  ;;  %v312_v34 = vld [vmem:[%s455_s4 + $0x1] ss:$0 sm:$0xff] }
   0x7   :  { %121 = vadd.xlane.f32.xlu0 %v120_v3 }
   0x8   :  { %329 = vmatpush3.bf16.msra.mxu0 %v352_v16 }
   0x9   :  { %342 = vmatprep.subr.mxu0 %v365_v14  ;;  %337 = vmatpush3.bf16.msra.mxu1 %v354_v18 }
  0x90   :  { %v34_v4 = vpop.xlane.xlu0 %33 }
  0x91   :  { %v36_v5 = vmul.f32 0.03125, %v34_v4 }
  0x93   :  { %v37_v6 = vsub.f32 %v28_v0, %v36_v5 }
  0x94   :  { %v122_v7 = vpop.xlane.xlu0 %121 }
  0x95   :  { %v123_v8 = vmul.f32 0.03125, %v122_v7  ;;  %v38_v9 = vmul.f32 %v37_v6, %v37_v6 }
  0x97   :  { %v124_v10 = vsub.f32 %v117_v1, %v123_v8  ;;  %v39_v11 = vsel %vm31_vm0, %v38_v9, 0.0 }
  0x98   :  { %40 = vadd.xlane.f32.xlu1 %v39_v11 }
  0x99   :  { %v125_v12 = vmul.f32 %v124_v10, %v124_v10 }
  0x9b   :  { %v126_v13 = vsel %vm31_vm0, %v125_v12, 0.0 }
  0x9c   :  { %127 = vadd.xlane.f32.xlu1 %v126_v13 }
 0x125   :  { %v41_v19 = vpop.xlane.xlu1 %40 }
 0x126   :  { %v42_v20 = vmul.f32 0.03125, %v41_v19 }
 0x128   :  { %v43_v21 = vadd.f32 1e-05, %v42_v20 }
 0x129   :  { %v128_v22 = vpop.xlane.xlu1 %127 }
 0x12a   :  { %355 = vrsqrt.f32 %v43_v21  ;;  %v129_v23 = vmul.f32 0.03125, %v128_v22 }
 0x12c   :  { %v130_v24 = vadd.f32 1e-05, %v129_v23 }
 0x12e   :  { %357 = vrsqrt.f32 %v130_v24 }
 0x12f   :  { %359 = vpow2.f32 %v218_v52 }
 0x134   :  { %v356_v25 = vpop.eup %355 }
 0x135   :  { %v45_v27 = vmul.f32 %v356_v25, %v37_v6 }
 0x137   :  { %v50_v29 = vmul.f32 %v306_v26, %v45_v27 }
 0x138   :  { %v358_v30 = vpop.eup %357 }
 0x139   :  { %v55_v32 = vadd.f32 %v307_v28, %v50_v29  ;;  %v132_v33 = vmul.f32 %v358_v30, %v124_v10  ;;  %v360_v53 = vpop.eup %359 }
 0x13a   :  { %347 = vpush %v360_v53 }
 0x13b   :  { %v60_v35 = vpack.c.bf16 %v55_v32, %v55_v32  ;;  %v137_v36 = vmul.f32 %v311_v31, %v132_v33 }
 0x13d   :  { %331 = vmatmul.mubr.msk.bf16.vlgmr.msra.gmra.mrb[0].mxu0 %vm73_vm2, %v60_v35  ;;  %v142_v37 = vadd.f32 %v312_v34, %v137_v36 }
 0x13e   :  { %344 = vmatprep.mubr.msk.f32.mxu0 %vm366_vm1, %v365_v14 }
 0x13f   :  { %v147_v38 = vpack.c.bf16 %v142_v37, %v142_v37 }
 0x141   :  { %339 = vmatmul.mubr.msk.bf16.vlgmr.msra.gmra.mrb[0].mxu1 %vm73_vm2, %v147_v38 }
 0x16b   :  { %s348_s17 = spop %347 }
 0x16c   :  { %v298_v60 = vstv %s348_s17 }
 0x210   :  { %v111_v39 = vpop.f32.mrb[0].mxu0 }
 0x211   :  { %v203_v40 = vmul.f32 %v111_v39, %v111_v39  ;;  %v332_v41 = vpop.f32.mrb[1].mxu0 }
 0x212   :  { %v114_v42 = vpop.f32.mrb[2].mxu0 }
 0x213   :  { %v333_v43 = vpop.f32.mrb[3].mxu0  ;;  %v205_v44 = vsel %vm204_vm3, %v203_v40, 0.0 }
 0x214   :  { %206 = vadd.xlane.f32.xlu0 %v205_v44  ;;  %v197_v45 = vpop.f32.mrb[0].mxu1 }
 0x215   :  { %v210_v46 = vmul.f32 %v197_v45, %v197_v45  ;;  %v340_v47 = vpop.f32.mrb[1].mxu1 }
 0x216   :  { %v200_v48 = vpop.f32.mrb[2].mxu1 }
 0x217   :  { %v341_v49 = vpop.f32.mrb[3].mxu1  ;;  %v211_v50 = vsel %vm204_vm3, %v210_v46, 0.0 }
 0x218   :  { %212 = vadd.xlane.f32.xlu1 %v211_v50 }
 0x2a1   :  { %v207_v54 = vpop.xlane.xlu0 %206 }
 0x2a2   :  { %361 = vrsqrt.f32 %v207_v54 }
 0x2a5   :  { %v213_v55 = vpop.xlane.xlu1 %212 }
 0x2a6   :  { %363 = vrsqrt.f32 %v213_v55 }
 0x2ac   :  { %v362_v56 = vpop.eup %361 }
 0x2ad   :  { %v209_v57 = vmul.f32 %v362_v56, %v111_v39 }
 0x2af   :  { %343 = vmatpush3.xpose.msk.msra.mxu0 %vm221_vm4, %v209_v57 }
 0x2b0   :  { %v364_v58 = vpop.eup %363 }
 0x2b1   :  { %v215_v59 = vmul.f32 %v364_v58, %v197_v45 }
 0x2b3   :  { %345 = vmatmul.mubr.msk.f32.vlgmr.msra.gmra.mrb[4].mxu0 %vm221_vm4, %v215_v59 }
 0x386   :  { %v294_v61 = vpop.f32.mrb[4].mxu0 }
 0x387   :  { %v299_v62 = vmul.f32 %v298_v60, %v294_v61  ;;  %v346_v63 = vpop.f32.mrb[5].mxu0 }
 0x389   :  { %301 = vst.msk [vmem:[%s457_s7] sm:$0x3] %vm300_vm5, %v299_v62 }

// kernel: clip_forward.4
= control target key start
LH: loop header
LB: loop body
LE: loop exit
PB: predicated region body
PF: predicated region fallthrough
CT: control target
= control target key end

     0   :  { %s1809_s27 = smov 0   ;;  %s1811_s28 = smov 0   ;;  %s2069_s0 = inlined_call_operand.vmem [shape: f32[2,8,32], index: 0, kind: input, shape index: {}]   ;;  %s2070_s1 = inlined_call_operand.vmem [shape: bf16[2,32,96], index: 1, kind: input, shape index: {}]   ;;  %s2071_s2 = inlined_call_operand.vmem [shape: bf16[2,32,32], index: 2, kind: input, shape index: {}]   ;;  %s2072_s3 = inlined_call_operand.vmem [shape: bf16[2,32,64], index: 3, kind: input, shape index: {}]   ;;  %s2073_s4 = inlined_call_operand.vmem [shape: bf16[2,64,32], index: 4, kind: input, shape index: {}]   ;;  %s2074_s5 = inlined_call_operand.vmem [shape: f32[2,1,96], index: 5, kind: input, shape index: {}]   ;;  %s2075_s6 = inlined_call_operand.vmem [shape: f32[2,1,64], index: 6, kind: input, shape index: {}]   ;;  %s2076_s7 = inlined_call_operand.vmem [shape: f32[2,6,32], index: 7, kind: input, shape index: {}]   ;;  %s2077_s8 = inlined_call_operand.vmem [shape: f32[2,8,32], index: 8, kind: output, shape index: {}]  }
   0x1   :  { %2078 = sst [smem:[#allocation2_spill]] %s2070_s1  ;;  %s1813_s29 = smov 0  }
   0x2   :  { %2079 = sst [smem:[#allocation3_spill]] %s2071_s2 }
   0x3 LB: > { %s27_s30 = sadd.s32 1, %s1750_s28  ;;  %p1493_p0 = scmp.ge.s32.totalorder %s1754_s29, 1  ;;  %s1754_s29 = sphi %s1813_s29, %s18_s29   ;;  %s1750_s28 = sphi %s1811_s28, %s2083_s28   ;;  %s1746_s27 = sphi %s1809_s27, %s2082_s27  }
   0x4   : > { %p28_p1 = scmp.ge.s32.totalorder %s27_s30, 2  ;;  %p340_p2 = scmp.lt.s32.totalorder %s1754_s29, 3 }
   0x6   : > { %s2085_s30 = smov (%p28_p1, %s27_s30), 0  ;;  %p341_p3 = pnand %p1493_p0, %p340_p2 }
   0x7   : > { %p410_p4 = scmp.lt.s32.totalorder (!%p341_p3), %s1746_s27, 1  ;;  %s2080_s1 = sld [smem:[#allocation2_spill]] (!%p341_p3) }
   0x8   : > { %344 = sbr.rel (%p341_p3) target bundleno = 2975 (0xb9f), region = 52  ;;  %s2081_s2 = sld [smem:[#allocation3_spill]] (!%p341_p3) }
   0x9   : > { %p1503_p5 = scmp.ne.s32.totalorder (!%p341_p3), %s1746_s27, 0 }
   0xf   : > { %s1827_s9 = scalar_select %p410_p4, %s1746_s27, 1 }
  0x10   : > { %450 = sbr.rel (%p1503_p5) target bundleno = 23 (0x17), region = 56  ;;  %v451_v0 = vld [vmem:[%s2069_s0] sm:$0xff] (!%p1503_p5)  ;;  %vm453_vm0 = vcmask (!%p1503_p5), 261120   ;;  %v452_v1 = vld [vmem:[%s2069_s0 + $0x8] sm:$0xff] (!%p1503_p5) }
  0x11   : > { %s1535_s10 = sshll.u32 %s1827_s9, 4  ;;  %s1538_s11 = sshll.u32 %s1827_s9, 5  ;;  %454 = vst.msk [vmem:[%s2077_s8] sm:$0xff] (!%p1503_p5), %vm453_vm0, %v451_v0  ;;  %455 = vst.msk [vmem:[%s2077_s8 + $0x8] sm:$0xff] (!%p1503_p5), %vm453_vm0, %v452_v1 }
  0x12   : > { %s1834_s14 = scalar_lea.vmem %s2080_s1, %s1535_s10  ;;  %s1839_s17 = scalar_lea.vmem %s2081_s2, %s1535_s10 }
  0x13   : > { %s1844_s20 = scalar_lea.vmem %s2072_s3, %s1535_s10  ;;  %s1849_s23 = scalar_lea.vmem %s2073_s4, %s1538_s11 }
  0x14   : > { %s432_s26 = scalar_lea.vmem %s2074_s5, %s1827_s9  ;;  %s435_s15 = scalar_lea.vmem %s2075_s6, %s1827_s9 }
  0x15   : > { %s1502_s16 = sshll.u32 %s1827_s9, 3 }
  0x16   : > { %s1863_s18 = scalar_lea.vmem %s2076_s7, %s1502_s16 }
  0x17 PF: > { %vm481_vm1 = vcmask 261120   ;;  %v1690_v16 = vld [vmem:[%s1834_s14] sm:$0xff]   ;;  %v1756_v17 = vmov 0.0   ;;  %v1691_v18 = vld [vmem:[%s1834_s14 + $0x8] sm:$0xff]   ;;  %vm1757_vm2 = vmmov 0   ;;  %v509_v23 = vlaneseq  ;;  %s1761_s10 = smov 80  }
  0x18   : > { %v1880_v2 = vld [vmem:[%s2077_s8] sm:$0xff]  ;;  %v1885_v3 = vld [vmem:[%s2077_s8 + $0x8] sm:$0xff]  ;;  %1570 = vmatprep.subr.bf16.mxu1 %v1756_v17  ;;  %1584 = vmatprep.subr.bf16.mxu0 %v1756_v17  ;;  %vm595_vm3 = vcmask 130048   ;;  %v1759_v56 = vmov -1e+09   ;;  %vm695_vm5 = vcmask 64512  }
  0x19   : > { %v482_v4 = vsel %vm481_vm1, %v1880_v2, 0.0  ;;  %v485_v5 = vsel %vm481_vm1, %v1885_v3, 0.0  ;;  %1571 = vmatpush3.bf16.msra.mxu1 %v1690_v16  ;;  %1574 = vmatprep.mubr.msk.bf16.mxu1 %vm1757_vm2, %v1756_v17  ;;  %v1905_v26 = vshrl.u32 %v509_v23, 7  ;;  %v1909_v28 = vld [vmem:[%s1863_s18] sm:$0x3f]  ;;  %s1758_s18 = smov 96  }
  0x1a   : > { %483 = vadd.xlane.f32.xlu0 %v482_v4  ;;  %1572 = vmatprep.subr.bf16.mxu1 %v1756_v17  ;;  %v1504_v41 = vld [vmem:[%s432_s26] ss:$0 sm:$0xff]  ;;  %v587_v54 = vand.u32 127, %v509_v23  ;;  %s1760_s26 = smov 64   ;;  %vm725_vm6 = vcmask 1043456   ;;  %s1762_s19 = smov 112  }
  0x1b   : > { %1586 = vmatprep.mubr.msk.bf16.mxu0 %vm1757_vm2, %v1756_v17  ;;  %v511_v27 = vsub.s32 0, %v1905_v26  ;;  %v517_v32 = vsub.s32 1, %v1905_v26  ;;  %s1763_s11 = smov 48   ;;  %vm1297_vm7 = vcmask 523264  }
  0x1c   : > { %vm588_vm4 = vcmp.le.s32.totalorder %v587_v54, %v1905_v26 }
  0x1d   : > { %1573 = vmatpush3.bf16.msra.mxu1 %v1691_v18  ;;  %v512_v31 = vrot.slane %v1909_v28, %v511_v27  ;;  %v518_v36 = vrot.slane %v1909_v28, %v517_v32  ;;  %v1941_v57 = vsel %vm588_vm4, 0.0, %v1759_v56 }
  0x1e   : > { %486 = vadd.xlane.f32.xlu0 %v485_v5  ;;  %1578 = vmatprep.subr.bf16.mxu1 %v1756_v17 }
  0xa7   : > { %v484_v6 = vpop.xlane.xlu0 %483 }
  0xa8   : > { %v489_v7 = vmul.f32 0.03125, %v484_v6 }
  0xaa   : > { %v491_v8 = vsub.f32 %v1880_v2, %v489_v7 }
  0xab   : > { %v487_v9 = vpop.xlane.xlu0 %486 }
  0xac   : > { %v490_v10 = vmul.f32 0.03125, %v487_v9  ;;  %v493_v11 = vmul.f32 %v491_v8, %v491_v8 }
  0xae   : > { %v492_v12 = vsub.f32 %v1885_v3, %v490_v10  ;;  %v495_v13 = vsel %vm481_vm1, %v493_v11, 0.0 }
  0xaf   : > { %496 = vadd.xlane.f32.xlu1 %v495_v13 }
  0xb0   : > { %v494_v14 = vmul.f32 %v492_v12, %v492_v12 }
  0xb2   : > { %v498_v15 = vsel %vm481_vm1, %v494_v14, 0.0 }
  0xb3   : > { %499 = vadd.xlane.f32.xlu1 %v498_v15 }
 0x13c   : > { %v497_v19 = vpop.xlane.xlu1 %496 }
 0x13d   : > { %v501_v20 = vmul.f32 0.03125, %v497_v19 }
 0x13f   : > { %v503_v21 = vadd.f32 1e-05, %v501_v20 }
 0x140   : > { %v500_v22 = vpop.xlane.xlu1 %499 }
 0x141   : > { %1700 = vrsqrt.f32 %v503_v21  ;;  %v502_v24 = vmul.f32 0.03125, %v500_v22 }
 0x143   : > { %v504_v25 = vadd.f32 1e-05, %v502_v24 }
 0x145   : > { %1702 = vrsqrt.f32 %v504_v25 }
 0x14b   : > { %v1701_v29 = vpop.eup %1700 }
 0x14c   : > { %v507_v30 = vmul.f32 %v1701_v29, %v491_v8 }
 0x14e   : > { %v513_v35 = vmul.f32 %v512_v31, %v507_v30 }
 0x14f   : > { %v1703_v33 = vpop.eup %1702 }
 0x150   : > { %v508_v34 = vmul.f32 %v1703_v33, %v492_v12  ;;  %v519_v38 = vadd.f32 %v518_v36, %v513_v35 }
 0x152   : > { %v514_v37 = vmul.f32 %v512_v31, %v508_v34 }
 0x154   : > { %v520_v39 = vadd.f32 %v518_v36, %v514_v37 }
 0x156   : > { %v521_v40 = vpack.c.bf16 %v520_v39, %v519_v38 }
 0x158   : > { %1575 = vmatmul.mubr.msk.bf16.vlgmr.msra.gmra.mrb[0].mxu1 %vm481_vm1, %v521_v40 }
 0x159   : > { %1580 = vmatprep.mubr.msk.bf16.mxu1 %vm1757_vm2, %v1756_v17 }
 0x22b   : > { %v577_v42 = vpop.f32.mrb[0].mxu1 }
 0x22c   : > { %v578_v43 = vadd.f32 %v1504_v41, %v577_v42  ;;  %v1576_v44 = vpop.f32.mrb[1].mxu1 }
 0x22d   : > { %v580_v45 = vpop.f32.mrb[2].mxu1 }
 0x22e   : > { %v1922_v46 = vpack.c.bf16 %v578_v43, %v578_v43  ;;  %v581_v47 = vadd.f32 %v1504_v41, %v580_v45  ;;  %v1577_v48 = vpop.f32.mrb[3].mxu1 }
 0x230   : > { %v1924_v49 = vpack.c.bf16 %v581_v47, %v581_v47  ;;  %593 = vrot.lane.b32.xlu0 %v1922_v46, %s1758_s18 }
 0x232   : > { %643 = vrot.lane.b32.xlu1 %v1924_v49, %s1758_s18 }
 0x2a2   : > { %v594_v50 = vpop.permute.xlu0 %593 }
 0x2a3   : > { %v600_v51 = vsel %vm595_vm3, %v594_v50, 0 }
 0x2a4   : > { %1579 = vmatpush3.bf16.xpose.msra.mxu1 %v600_v51  ;;  %v644_v52 = vpop.permute.xlu1 %643 }
 0x2a5   : > { %v649_v53 = vsel %vm595_vm3, %v644_v52, 0  ;;  %1590 = vmatprep.subr.bf16.mxu1 %v1756_v17 }
 0x2a6   : > { %1585 = vmatpush3.bf16.xpose.msra.mxu0 %v649_v53 }
 0x2a7   : > { %1596 = vmatprep.subr.bf16.mxu0 %v1756_v17 }
 0x2ab   : > { %1581 = vmatmul.mubr.msk.bf16.vlgmr.msra.gmra.mrb[4].mxu1 %vm595_vm3, %v1922_v46 }
 0x2ac   : > { %1592 = vmatprep.mubr.msk.bf16.mxu1 %vm1757_vm2, %v1756_v17 }
 0x2ad   : > { %1587 = vmatmul.mubr.msk.bf16.vlgmr.msra.gmra.mrb[0].mxu0 %vm595_vm3, %v1924_v49 }
 0x2ae   : > { %1598 = vmatprep.mubr.msk.bf16.mxu0 %vm1757_vm2, %v1756_v17 }
 0x37e   : > { %v636_v55 = vpop.f32.mrb[4].mxu1 }
 0x37f   : > { %v691_v58 = vmul.f32 0.25, %v636_v55  ;;  %v1582_v59 = vpop.f32.mrb[5].mxu1 }
 0x380   : > { %v639_v60 = vpop.f32.mrb[6].mxu1  ;;  %v685_v61 = vpop.f32.mrb[0].mxu0 }
 0x381   : > { %v692_v62 = vmul.f32 0.25, %v685_v61  ;;  %v1583_v63 = vpop.f32.mrb[7].mxu1  ;;  %v1588_v0 = vpop.f32.mrb[1].mxu0  ;;  %v693_v1 = vadd.f32 %v691_v58, %v1941_v57 }
 0x382   : > { %v688_v4 = vpop.f32.mrb[2].mxu0 }
 0x383   : > { %v1589_v5 = vpop.f32.mrb[3].mxu0  ;;  %v696_v6 = vsel %vm695_vm5, %v693_v1, -inf  ;;  %v694_v7 = vadd.f32 %v692_v62, %v1941_v57 }
 0x384   : > { %697 = vmax.xlane.f32.xlu1 %v696_v6 }
 0x385   : > { %v699_v8 = vsel %vm695_vm5, %v694_v7, -inf }
 0x386   : > { %700 = vmax.xlane.f32.xlu0 %v699_v8 }
 0x395   : > { %769 = vrot.lane.b32.xlu1 %v1924_v49, %s1760_s26 }
 0x399   : > { %820 = vrot.lane.b32.xlu1 %v1922_v46, %s1761_s10 }
 0x411   : > { %v698_v9 = vpop.xlane.xlu1 %697 }
 0x412   : > { %v702_v10 = vsub.f32 %v693_v1, %v698_v9 }
 0x413   : > { %v701_v11 = vpop.xlane.xlu0 %700 }
 0x414   : > { %v704_v12 = vmul.f32 1.442695, %v702_v10  ;;  %v703_v13 = vsub.f32 %v694_v7, %v701_v11 }
 0x415   : > { %v770_v14 = vpop.permute.xlu1 %769 }
 0x416   : > { %1704 = vpow2.f32 %v704_v12  ;;  %v706_v15 = vmul.f32 1.442695, %v703_v13  ;;  %v775_v16 = vsel %vm725_vm6, %v770_v14, 0 }
 0x417   : > { %1597 = vmatpush3.bf16.msra.mxu0 %v775_v16 }
 0x418   : > { %1706 = vpow2.f32 %v706_v15  ;;  %1608 = vmatprep.subr.bf16.mxu0 %v1756_v17 }
 0x419   : > { %v821_v22 = vpop.permute.xlu1 %820 }
 0x41a   : > { %v826_v35 = vsel %vm595_vm3, %v821_v22, 0 }
 0x420   : > { %v1705_v18 = vpop.eup %1704 }
 0x421   : > { %v708_v19 = vsel %vm695_vm5, %v1705_v18, 0.0 }
 0x422   : > { %v1707_v20 = vpop.eup %1706  ;;  %709 = vadd.xlane.f32.xlu0 %v708_v19 }
 0x423   : > { %v711_v21 = vsel %vm695_vm5, %v1707_v20, 0.0 }
 0x424   : > { %712 = vadd.xlane.f32.xlu1 %v711_v21 }
 0x435   : > { %870 = vrot.lane.b32.xlu1 %v1924_v49, %s1761_s10 }
 0x438   : > { %720 = vrot.lane.b32.xlu0 %v1922_v46, %s1760_s26 }
 0x439   : > { %868 = vrot.lane.b32.xlu1 %v1924_v49, %s1762_s19 }
 0x43c   : > { %818 = vrot.lane.b32.xlu0 %v1922_v46, %s1762_s19 }
 0x4af   : > { %v710_v23 = vpop.xlane.xlu0 %709 }
 0x4b0   : > { %1708 = vrcp.f32 %v710_v23 }
 0x4b1   : > { %v713_v24 = vpop.xlane.xlu1 %712 }
 0x4b2   : > { %1710 = vrcp.f32 %v713_v24  ;;  %v1692_v24 = vld [vmem:[%s1839_s17] sm:$0xff]  }
 0x4b3   : > { %v721_v25 = vpop.permute.xlu0 %720 }
 0x4b4   : > { %v727_v27 = vsel %vm725_vm6, %v721_v25, 0  ;;  %v1693_v25 = vld [vmem:[%s1839_s17 + $0x8] sm:$0xff]  }
 0x4b5   : > { %1591 = vmatpush3.bf16.msra.mxu1 %v727_v27  ;;  %v871_v34 = vpop.permute.xlu1 %870 }
 0x4b6   : > { %1602 = vmatprep.subr.bf16.mxu1 %v1756_v17  ;;  %v876_v37 = vsel %vm595_vm3, %v871_v34, 0 }
 0x4b7   : > { %v819_v38 = vpop.permute.xlu0 %818 }
 0x4b9   : > { %v869_v39 = vpop.permute.xlu1 %868 }
 0x4ba   : > { %v1709_v29 = vpop.eup %1708 }
 0x4bb   : > { %v716_v30 = vmul.f32 %v1709_v29, %v1705_v18 }
 0x4bc   : > { %v1711_v31 = vpop.eup %1710 }
 0x4bd   : > { %v717_v32 = vmul.f32 %v1711_v31, %v1707_v20  ;;  %v718_v33 = vpack.c.bf16 %v716_v30, %v716_v30 }
 0x4bf   : > { %1593 = vmatmul.mubr.msk.bf16.vlgmr.msra.gmra.mrb[8].mxu1 %vm695_vm5, %v718_v33  ;;  %v719_v36 = vpack.c.bf16 %v717_v32, %v717_v32 }
 0x4c0   : > { %1603 = vmatpush3.bf16.xpose.msra.mxu1 %v826_v35  ;;  %1604 = vmatprep.mubr.msk.bf16.mxu1 %vm1757_vm2, %v1756_v17 }
 0x4c1   : > { %1599 = vmatmul.mubr.msk.bf16.vlgmr.msra.gmra.mrb[4].mxu0 %vm695_vm5, %v719_v36  ;;  %1614 = vmatprep.subr.bf16.mxu1 %v1756_v17 }
 0x4c2   : > { %1609 = vmatpush3.bf16.xpose.msra.mxu0 %v876_v37  ;;  %1610 = vmatprep.mubr.msk.bf16.mxu0 %vm1757_vm2, %v1756_v17 }
 0x4c3   : > { %1620 = vmatprep.subr.bf16.mxu0 %v1756_v17 }
 0x4c7   : > { %1605 = vmatmul.mubr.msk.bf16.vlgmr.msra.gmra.mrb[12].mxu1 %vm595_vm3, %v819_v38 }
 0x4c8   : > { %1616 = vmatprep.mubr.msk.bf16.mxu1 %vm1757_vm2, %v1756_v17 }
 0x4c9   : > { %1611 = vmatmul.mubr.msk.bf16.vlgmr.msra.gmra.mrb[8].mxu0 %vm595_vm3, %v869_v39 }
 0x4ca   : > { %1622 = vmatprep.mubr.msk.bf16.mxu0 %vm1757_vm2, %v1756_v17 }
 0x592   : > { %v1975_v40 = vpop.f32.mrb[8].mxu1 }
 0x593   : > { %v1594_v41 = vpop.f32.mrb[9].mxu1 }
 0x594   : > { %v766_v42 = vpop.f32.mrb[10].mxu1  ;;  %v1977_v43 = vpop.f32.mrb[4].mxu0  ;;  %v1147_v41 = vsub.s32 4, %v1905_v26 }
 0x595   : > { %v817_v44 = vpack.c.bf16 %v1977_v43, %v1975_v40  ;;  %v1595_v45 = vpop.f32.mrb[11].mxu1  ;;  %v1600_v47 = vpop.f32.mrb[5].mxu0 }
 0x596   : > { %v814_v48 = vpop.f32.mrb[6].mxu0 }
 0x597   : > { %v1601_v50 = vpop.f32.mrb[7].mxu0 }
 0x59a   : > { %v862_v51 = vpop.f32.mrb[12].mxu1 }
 0x59b   : > { %v918_v52 = vmul.f32 0.25, %v862_v51  ;;  %v1606_v53 = vpop.f32.mrb[13].mxu1 }
 0x59c   : > { %v865_v54 = vpop.f32.mrb[14].mxu1  ;;  %v912_v55 = vpop.f32.mrb[8].mxu0 }
 0x59d   : > { %v919_v56 = vmul.f32 0.25, %v912_v55  ;;  %v1607_v58 = vpop.f32.mrb[15].mxu1  ;;  %v1612_v59 = vpop.f32.mrb[9].mxu0  ;;  %v920_v60 = vadd.f32 %v918_v52, %v1941_v57 }
 0x59e   : > { %v915_v61 = vpop.f32.mrb[10].mxu0 }
 0x59f   : > { %v1613_v62 = vpop.f32.mrb[11].mxu0  ;;  %v922_v63 = vsel %vm695_vm5, %v920_v60, -inf  ;;  %v921_v0 = vadd.f32 %v919_v56, %v1941_v57 }
 0x5a0   : > { %923 = vmax.xlane.f32.xlu0 %v922_v63 }
 0x5a1   : > { %v925_v1 = vsel %vm695_vm5, %v921_v0, -inf }
 0x5a2   : > { %926 = vmax.xlane.f32.xlu1 %v925_v1 }
 0x5b3   : > { %994 = vrot.lane.b32.xlu1 %v1924_v49, %s1763_s11 }
 0x62d   : > { %v924_v4 = vpop.xlane.xlu0 %923 }
 0x62e   : > { %v928_v5 = vsub.f32 %v920_v60, %v924_v4  ;;  %v1694_v4 = vld [vmem:[%s1844_s20] sm:$0xff]  }
 0x62f   : > { %v927_v6 = vpop.xlane.xlu1 %926 }
 0x630   : > { %v930_v7 = vmul.f32 1.442695, %v928_v5  ;;  %v929_v8 = vsub.f32 %v921_v0, %v927_v6  ;;  %v1695_v5 = vld [vmem:[%s1844_s20 + $0x8] sm:$0xff]  }
 0x632   : > { %1712 = vpow2.f32 %v930_v7  ;;  %v932_v9 = vmul.f32 1.442695, %v929_v8 }
 0x633   : > { %v995_v10 = vpop.permute.xlu1 %994 }
 0x634   : > { %1714 = vpow2.f32 %v932_v9  ;;  %v1000_v11 = vsel %vm725_vm6, %v995_v10, 0 }
 0x635   : > { %1621 = vmatpush3.bf16.msra.mxu0 %v1000_v11 }
 0x636   : > { %1632 = vmatprep.subr.bf16.mxu0 %v1756_v17 }
 0x63c   : > { %v1713_v57 = vpop.eup %1712 }
 0x63d   : > { %v934_v12 = vsel %vm695_vm5, %v1713_v57, 0.0 }
 0x63e   : > { %v1715_v13 = vpop.eup %1714  ;;  %935 = vadd.xlane.f32.xlu0 %v934_v12 }
 0x63f   : > { %v937_v49 = vsel %vm695_vm5, %v1715_v13, 0.0 }
 0x642   : > { %938 = vadd.xlane.f32.xlu0 %v937_v49 }
 0x658   : > { %946 = vrot.lane.b32.xlu0 %v1922_v46, %s1763_s11 }
 0x6cb   : > { %v936_v14 = vpop.xlane.xlu0 %935 }
 0x6cc   : > { %1716 = vrcp.f32 %v936_v14 }
 0x6cf   : > { %v939_v15 = vpop.xlane.xlu0 %938 }
 0x6d0   : > { %1718 = vrcp.f32 %v939_v15 }
 0x6d3   : > { %v947_v16 = vpop.permute.xlu0 %946 }
 0x6d4   : > { %v952_v18 = vsel %vm725_vm6, %v947_v16, 0 }
 0x6d5   : > { %1615 = vmatpush3.bf16.msra.mxu1 %v952_v18 }
 0x6d6   : > { %v1717_v19 = vpop.eup %1716  ;;  %1626 = vmatprep.subr.bf16.mxu1 %v1756_v17 }
 0x6d7   : > { %v942_v20 = vmul.f32 %v1717_v19, %v1713_v57  ;;  %v1179_v57 = vsub.s32 2, %v1905_v26 }
 0x6d9   : > { %v944_v21 = vpack.c.bf16 %v942_v20, %v942_v20  ;;  %v1180_v12 = vrot.slane %v1909_v28, %v1179_v57 }
 0x6da   : > { %v1719_v22 = vpop.eup %1718 }
 0x6db   : > { %v943_v23 = vmul.f32 %v1719_v22, %v1715_v13  ;;  %1617 = vmatmul.mubr.msk.bf16.vlgmr.msra.gmra.mrb[16].mxu1 %vm695_vm5, %v944_v21  ;;  %v1185_v13 = vsub.s32 3, %v1905_v26 }
 0x6dc   : > { %1628 = vmatprep.mubr.msk.bf16.mxu1 %vm1757_vm2, %v1756_v17  ;;  %1627 = vmatpush3.bf16.msra.mxu1 %v1693_v25  ;;  %v1698_v25 = vld [vmem:[%s1849_s23 + $0x10] sm:$0xff]  }
 0x6dd   : > { %v945_v46 = vpack.c.bf16 %v943_v23, %v943_v23  ;;  %1638 = vmatprep.subr.bf16.mxu1 %v1756_v17  ;;  %v1186_v19 = vrot.slane %v1909_v28, %v1185_v13 }
 0x6df   : > { %1623 = vmatmul.mubr.msk.bf16.vlgmr.msra.gmra.mrb[12].mxu0 %vm695_vm5, %v945_v46  ;;  %v1697_v46 = vld [vmem:[%s1849_s23 + $0x8] sm:$0xff]  }
 0x6e0   : > { %1633 = vmatpush3.bf16.msra.mxu0 %v1692_v24  ;;  %1634 = vmatprep.mubr.msk.bf16.mxu0 %vm1757_vm2, %v1756_v17  ;;  %v1696_v24 = vld [vmem:[%s1849_s23] sm:$0xff]  }
 0x6e1   : > { %1646 = vmatprep.subr.bf16.mxu0 %v1756_v17 }
 0x6e7   : > { %1635 = vmatmul.mubr.msk.bf16.vlgmr.msra.gmra.mrb[16].mxu0 %vm595_vm3, %v817_v44  ;;  %v1148_v44 = vrot.slane %v1909_v28, %v1147_v41 }
 0x6e8   : > { %1654 = vmatprep.mubr.msk.bf16.mxu0 %vm1757_vm2, %v1756_v17  ;;  %1647 = vmatpush3.bf16.msra.mxu0 %v1696_v24 }
 0x6e9   : > { %1648 = vmatprep.subr.bf16.mxu0 %v1756_v17 }
 0x6ec   : > { %1649 = vmatpush3.bf16.msra.mxu0 %v1697_v46 }
 0x6ed   : > { %1650 = vmatprep.subr.bf16.mxu0 %v1756_v17 }
 0x6f0   : > { %1651 = vmatpush3.bf16.msra.mxu0 %v1698_v25 }
 0x6f1   : > { %1652 = vmatprep.subr.bf16.mxu0 %v1756_v17 }
 0x7ae   : > { %v988_v27 = vpop.f32.mrb[16].mxu1 }
 0x7af   : > { %v1618_v29 = vpop.f32.mrb[17].mxu1 }
 0x7b0   : > { %v991_v30 = vpop.f32.mrb[18].mxu1  ;;  %v1520_v29 = vld [vmem:[%s435_s15] ss:$0 sm:$0xff] }
 0x7b1   : > { %v1619_v31 = vpop.f32.mrb[19].mxu1 }
 0x7b2   : > { %v1036_v32 = vpop.f32.mrb[12].mxu0 }
 0x7b3   : > { %v1042_v33 = vpack.c.bf16 %v1036_v32, %v988_v27  ;;  %v1624_v34 = vpop.f32.mrb[13].mxu0  ;;  %v1699_v27 = vld [vmem:[%s1849_s23 + $0x18] sm:$0xff]  }
 0x7b4   : > { %v1039_v35 = vpop.f32.mrb[14].mxu0  ;;  %1653 = vmatpush3.bf16.msra.mxu0 %v1699_v27 }
 0x7b5   : > { %v1625_v36 = vpop.f32.mrb[15].mxu0  ;;  %1629 = vmatmul.mubr.msk.bf16.vlgmr.msra.gmra.mrb[20].mxu1 %vm595_vm3, %v1042_v33 }
 0x7b6   : > { %1642 = vmatprep.mubr.msk.bf16.mxu1 %vm1757_vm2, %v1756_v17  ;;  %1639 = vmatpush3.bf16.msra.mxu1 %v1694_v4 }
 0x7b7   : > { %1640 = vmatprep.subr.bf16.mxu1 %v1756_v17 }
 0x7ba   : > { %v1136_v37 = vpop.f32.mrb[16].mxu0  ;;  %1641 = vmatpush3.bf16.msra.mxu1 %v1695_v5 }
 0x7bb   : > { %v1636_v38 = vpop.f32.mrb[17].mxu0 }
 0x7bc   : > { %v1139_v39 = vpop.f32.mrb[18].mxu0 }
 0x7bd   : > { %v1637_v40 = vpop.f32.mrb[19].mxu0 }
 0x888   : > { %v1086_v42 = vpop.f32.mrb[20].mxu1 }
 0x889   : > { %v1137_v43 = vadd.f32 %v1136_v37, %v1086_v42  ;;  %v1630_v45 = vpop.f32.mrb[21].mxu1 }
 0x88a   : > { %v1089_v47 = vpop.f32.mrb[22].mxu1 }
 0x88b   : > { %v1143_v48 = vadd.f32 %v1137_v43, %v1880_v2  ;;  %v1140_v50 = vadd.f32 %v1139_v39, %v1089_v47  ;;  %v1631_v51 = vpop.f32.mrb[23].mxu1 }
 0x88d   : > { %v2015_v52 = vadd.f32 %v1148_v44, %v1143_v48  ;;  %v1144_v53 = vadd.f32 %v1140_v50, %v1885_v3  ;;  %v1271_v50 = vsub.s32 5, %v1905_v26 }
 0x88f   : > { %v2018_v54 = vadd.f32 %v1148_v44, %v1144_v53  ;;  %v1151_v55 = vsel %vm481_vm1, %v2015_v52, 0.0  ;;  %v1272_v51 = vrot.slane %v1909_v28, %v1271_v50 }
 0x890   : > { %1152 = vadd.xlane.f32.xlu1 %v1151_v55 }
 0x891   : > { %v1154_v56 = vsel %vm481_vm1, %v2018_v54, 0.0 }
 0x892   : > { %1155 = vadd.xlane.f32.xlu0 %v1154_v56 }
 0x91d   : > { %v1153_v58 = vpop.xlane.xlu1 %1152 }
 0x91e   : > { %v1157_v2 = vmul.f32 0.03125, %v1153_v58 }
 0x91f   : > { %v1156_v59 = vpop.xlane.xlu0 %1155 }
 0x920   : > { %v1159_v60 = vsub.f32 %v2015_v52, %v1157_v2  ;;  %v1158_v61 = vmul.f32 0.03125, %v1156_v59 }
 0x922   : > { %v1160_v3 = vsub.f32 %v2018_v54, %v1158_v61  ;;  %v1161_v62 = vmul.f32 %v1159_v60, %v1159_v60 }
 0x924   : > { %v1163_v63 = vsel %vm481_vm1, %v1161_v62, 0.0  ;;  %v1162_v0 = vmul.f32 %v1160_v3, %v1160_v3 }
 0x925   : > { %1164 = vadd.xlane.f32.xlu0 %v1163_v63 }
 0x926   : > { %v1166_v1 = vsel %vm481_vm1, %v1162_v0, 0.0 }
 0x927   : > { %1167 = vadd.xlane.f32.xlu1 %v1166_v1 }
 0x9b2   : > { %v1165_v6 = vpop.xlane.xlu0 %1164 }
 0x9b3   : > { %v1169_v7 = vmul.f32 0.03125, %v1165_v6 }
 0x9b4   : > { %v1168_v8 = vpop.xlane.xlu1 %1167 }
 0x9b5   : > { %v1171_v9 = vadd.f32 1e-05, %v1169_v7  ;;  %v1170_v10 = vmul.f32 0.03125, %v1168_v8 }
 0x9b7   : > { %1720 = vrsqrt.f32 %v1171_v9  ;;  %v1172_v11 = vadd.f32 1e-05, %v1170_v10 }
 0x9b9   : > { %1722 = vrsqrt.f32 %v1172_v11 }
 0x9c1   : > { %v1721_v49 = vpop.eup %1720 }
 0x9c2   : > { %v1175_v14 = vmul.f32 %v1721_v49, %v1159_v60 }
 0x9c3   : > { %v1723_v15 = vpop.eup %1722 }
 0x9c4   : > { %v1181_v16 = vmul.f32 %v1180_v12, %v1175_v14  ;;  %v1176_v18 = vmul.f32 %v1723_v15, %v1160_v3 }
 0x9c6   : > { %v1182_v20 = vmul.f32 %v1180_v12, %v1176_v18  ;;  %v1187_v21 = vadd.f32 %v1186_v19, %v1181_v16 }
 0x9c8   : > { %v1188_v22 = vadd.f32 %v1186_v19, %v1182_v20 }
 0x9ca   : > { %v1189_v23 = vpack.c.bf16 %v1188_v22, %v1187_v21 }
 0x9cc   : > { %1643 = vmatmul.mubr.msk.bf16.vlgmr.msra.gmra.mrb[24].mxu1 %vm481_vm1, %v1189_v23 }
 0xa9f   : > { %v1245_v30 = vpop.f32.mrb[24].mxu1 }
 0xaa0   : > { %v1246_v31 = vadd.f32 %v1520_v29, %v1245_v30  ;;  %v1644_v32 = vpop.f32.mrb[25].mxu1 }
 0xaa1   : > { %v1248_v33 = vpop.f32.mrb[26].mxu1 }
 0xaa2   : > { %v1524_v34 = vmul.f32 -1.702, %v1246_v31  ;;  %v1249_v35 = vadd.f32 %v1520_v29, %v1248_v33  ;;  %v1645_v36 = vpop.f32.mrb[27].mxu1 }
 0xaa4   : > { %v1256_v37 = vmul.f32 1.442695, %v1524_v34  ;;  %v1525_v38 = vmul.f32 -1.702, %v1249_v35 }
 0xaa6   : > { %1724 = vpow2.f32 %v1256_v37  ;;  %v1258_v39 = vmul.f32 1.442695, %v1525_v38 }
 0xaa8   : > { %1726 = vpow2.f32 %v1258_v39 }
 0xab0   : > { %v1725_v17 = vpop.eup %1724 }
 0xab1   : > { %v1260_v40 = vadd.f32 1.0, %v1725_v17 }
 0xab2   : > { %v1727_v41 = vpop.eup %1726 }
 0xab3   : > { %1728 = vrcp.f32 %v1260_v40  ;;  %v1261_v42 = vadd.f32 1.0, %v1727_v41 }
 0xab5   : > { %1730 = vrcp.f32 %v1261_v42 }
 0xabd   : > { %v1729_v43 = vpop.eup %1728 }
 0xabe   : > { %v1266_v45 = vmul.f32 %v1729_v43, %v1246_v31 }
 0xabf   : > { %v1731_v44 = vpop.eup %1730 }
 0xac0   : > { %v1267_v47 = vmul.f32 %v1731_v44, %v1249_v35 }
 0xac2   : > { %v1268_v48 = vpack.c.bf16 %v1267_v47, %v1266_v45 }
 0xac4   : > { %1655 = vmatmul.mubr.msk.bf16.vlgmr.msra.gmra.mrb[20].mxu0 %vm1297_vm7, %v1268_v48 }
 0xb97   : > { %v1335_v53 = vpop.f32.mrb[20].mxu0 }
 0xb98   : > { %v1336_v55 = vadd.f32 %v1335_v53, %v1272_v51  ;;  %v1656_v56 = vpop.f32.mrb[21].mxu0 }
 0xb99   : > { %v1338_v58 = vpop.f32.mrb[22].mxu0 }
 0xb9a   : > { %v1342_v2 = vadd.f32 %v1336_v55, %v2015_v52  ;;  %v1339_v59 = vadd.f32 %v1338_v58, %v1272_v51  ;;  %v1657_v60 = vpop.f32.mrb[23].mxu0 }
 0xb9c   : > { %1344 = vst.msk [vmem:[%s2077_s8] sm:$0xff] %vm481_vm1, %v1342_v2  ;;  %v1343_v61 = vadd.f32 %v1339_v59, %v2018_v54 }
 0xb9e   : > { %1345 = vst.msk [vmem:[%s2077_s8 + $0x8] sm:$0xff] %vm481_vm1, %v1343_v61 }
 0xb9f PF: > { %s18_s29 = sadd.s32 1, %s1754_s29   ;;  %s2082_s27 = smov %s1750_s28 }
 0xba0   : > { %p15_p6 = scmp.ge.s32.totalorder %s18_s29, 4   ;;  %s2083_s28 = smov %s2085_s30 }
 0xba2   :  { %17 = sbr.rel (!%p15_p6) target bundleno = 3 (0x3), region = 107 }

// kernel: clip_forward.3
= control target key start
LH: loop header
LB: loop body
LE: loop exit
PB: predicated region body
PF: predicated region fallthrough
CT: control target
= control target key end

     0   :  { %s4539_s13 = smov 0   ;;  %s4541_s14 = smov 0   ;;  %s5427_s0 = inlined_call_operand.vmem [shape: f32[8,192], index: 0, kind: input, shape index: {}]   ;;  %s5428_s1 = inlined_call_operand.vmem [shape: bf16[192,32], index: 1, kind: input, shape index: {}]   ;;  %s5429_s2 = inlined_call_operand.vmem [shape: f32[7,32], index: 2, kind: input, shape index: {}]   ;;  %s5430_s3 = inlined_call_operand.vmem [shape: bf16[2,32,96], index: 3, kind: input, shape index: {}]   ;;  %s5431_s4 = inlined_call_operand.vmem [shape: bf16[2,32,32], index: 4, kind: input, shape index: {}]   ;;  %s5432_s5 = inlined_call_operand.vmem [shape: bf16[2,32,64], index: 5, kind: input, shape index: {}]   ;;  %s5433_s6 = inlined_call_operand.vmem [shape: bf16[2,64,32], index: 6, kind: input, shape index: {}]   ;;  %s5434_s7 = inlined_call_operand.vmem [shape: f32[2,1,96], index: 7, kind: input, shape index: {}]   ;;  %s5435_s8 = inlined_call_operand.vmem [shape: f32[2,1,64], index: 8, kind: input, shape index: {}]   ;;  %s5436_s9 = inlined_call_operand.vmem [shape: f32[2,6,32], index: 9, kind: input, shape index: {}]   ;;  %s5437_s10 = inlined_call_operand.vmem [shape: f32[2,5,32], index: 10, kind: output, shape index: {}]  }
   0x1   :  { %5445 = sst [smem:[#allocation6_spill]] %s5430_s3  ;;  %s4543_s15 = smov 0  }
   0x2   :  { %5446 = sst [smem:[#allocation7_spill]] %s5431_s4 }
   0x3 LB: > { %5447 = sst [smem:[#allocation2_spill]] %s4467_s14  ;;  %s29_s16 = sadd.s32 1, %s4467_s14  ;;  %s4471_s15 = sphi %s4543_s15, %s20_s15   ;;  %s4467_s14 = sphi %s4541_s14, %s5457_s14   ;;  %s4463_s13 = sphi %s4539_s13, %s5456_s13  }
   0x4   : > { %p4162_p0 = scmp.ge.s32.totalorder %s4471_s15, 1  ;;  %p30_p1 = scmp.ge.s32.totalorder %s29_s16, 2 }
   0x5   : > { %p389_p2 = scmp.lt.s32.totalorder %s4471_s15, 3 }
   0x6   : > { %s5459_s16 = smov (%p30_p1, %s29_s16), 0 }
   0x7   : > { %5448 = sst [smem:[#allocation3_spill]] %s5459_s16  ;;  %p390_p3 = pnand %p4162_p0, %p389_p2 }
   0x9   : > { %393 = sbr.rel (%p390_p3) target bundleno = 3758 (0xeae), region = 60 }
  0x10   : > { %p462_p4 = scmp.lt.s32.totalorder %s4463_s13, 1  ;;  %s5449_s3 = sld [smem:[#allocation6_spill]] }
  0x11   : > { %s5450_s4 = sld [smem:[#allocation7_spill]]  ;;  %p4172_p5 = scmp.ne.s32.totalorder %s4463_s13, 0 }
  0x12   : > { %s4557_s17 = scalar_select %p462_p4, %s4463_s13, 1 }
  0x13   : > { %502 = sbr.rel (%p4172_p5) target bundleno = 656 (0x290), region = 64  ;;  %v4386_v0 = vld [vmem:[%s5428_s1] sm:$0xff] (!%p4172_p5)   ;;  %v4473_v1 = vmov (!%p4172_p5), 0   ;;  %v4387_v2 = vld [vmem:[%s5428_s1 + $0x8] sm:$0xff] (!%p4172_p5)   ;;  %v4388_v3 = vld [vmem:[%s5428_s1 + $0x10] sm:$0xff] (!%p4172_p5)   ;;  %vm603_vm0 = vcmask (!%p4172_p5), 523264   ;;  %v670_v21 = vlaneseq (!%p4172_p5) }
  0x14   : > { %s4224_s18 = sshll.u32 %s4557_s17, 4  ;;  %s4227_s19 = sshll.u32 %s4557_s17, 5  ;;  %607 = vmatprep.subr.bf16.mxu0 (!%p4172_p5), %v4473_v1  ;;  %v4389_v4 = vld [vmem:[%s5428_s1 + $0x18] sm:$0xff] (!%p4172_p5)   ;;  %v504_v5 = vld [vmem:[%s5427_s0 + $0x8] sm:$0xff] (!%p4172_p5)  ;;  %v4390_v7 = vld [vmem:[%s5428_s1 + $0x20] sm:$0xff] (!%p4172_p5)   ;;  %vm651_vm1 = vcmask (!%p4172_p5), 253952  }
  0x15   : > { %s4574_s28 = scalar_lea.vmem %s5432_s5, %s4224_s18  ;;  %s4579_s11 = scalar_lea.vmem %s5433_s6, %s4227_s19  ;;  %608 = vmatpush1.bf16.msra.mxu0 (!%p4172_p5), %v4386_v0  ;;  %v530_v6 = vpack.c.bf16 (!%p4172_p5), %v504_v5, %v504_v5  ;;  %v4391_v8 = vld [vmem:[%s5428_s1 + $0x28] sm:$0xff] (!%p4172_p5)   ;;  %v4392_v9 = vld [vmem:[%s5428_s1 + $0x30] sm:$0xff] (!%p4172_p5)   ;;  %v4393_v10 = vld [vmem:[%s5428_s1 + $0x38] sm:$0xff] (!%p4172_p5)   ;;  %v4474_v19 = vmov (!%p4172_p5), 1966171168   ;;  %vm657_vm2 = vcmask (!%p4172_p5), 257024  }
  0x16   : > { %s4564_s22 = scalar_lea.vmem %s5449_s3, %s4224_s18  ;;  %s484_s20 = scalar_lea.vmem %s5434_s7, %s4557_s17  ;;  %609 = vmatprep.subr.bf16.mxu0 (!%p4172_p5), %v4473_v1  ;;  %v4394_v11 = vld [vmem:[%s5428_s1 + $0x40] sm:$0xff] (!%p4172_p5)   ;;  %v4395_v12 = vld [vmem:[%s5428_s1 + $0x48] sm:$0xff] (!%p4172_p5)   ;;  %v4396_v13 = vld [vmem:[%s5428_s1 + $0x50] sm:$0xff] (!%p4172_p5)   ;;  %v668_v20 = vunpack.c.l.s4 (!%p4172_p5), %v4474_v19  ;;  %v4652_v30 = vshrl.u32 (!%p4172_p5), %v670_v21, 7  ;;  %vm820_vm3 = vcmask (!%p4172_p5), 261120   ;;  %vm824_vm4 = vcmask (!%p4172_p5), 254976  }
  0x17   : > { %s4569_s25 = scalar_lea.vmem %s5450_s4, %s4224_s18  ;;  %s487_s23 = scalar_lea.vmem %s5435_s8, %s4557_s17  ;;  %4185 = vmatprep.mubr.msk.bf16.mxu0 (!%p4172_p5), %vm603_vm0, %v530_v6  ;;  %v4397_v14 = vld [vmem:[%s5428_s1 + $0x58] sm:$0xff] (!%p4172_p5)   ;;  %v503_v15 = vld [vmem:[%s5427_s0] sm:$0xff] (!%p4172_p5)  ;;  %vm1287_vm5 = vcmask (!%p4172_p5), 258048  }
  0x18   : > { %s4171_s24 = sshll.u32 %s4557_s17, 3  ;;  %v529_v16 = vpack.c.bf16 (!%p4172_p5), %v503_v15, %v503_v15  ;;  %v650_v17 = vld [vmem:[%s5429_s2] sm:$0x1] (!%p4172_p5)  ;;  %v654_v18 = vld [vmem:[%s5429_s2 + $0x1] sm:$0xf] (!%p4172_p5)  ;;  %v669_v29 = vunpack.c.0.s8 (!%p4172_p5), %v668_v20  ;;  %v4690_v5 = vsub.s32 (!%p4172_p5), 1, %v4652_v30 }
  0x19   : > { %s4593_s26 = scalar_lea.vmem %s5436_s9, %s4171_s24  ;;  %610 = vmatpush1.bf16.msra.mxu0 (!%p4172_p5), %v4387_v2  ;;  %652 = vst.msk [vmem:[%s5437_s10] sm:$0x1] (!%p4172_p5), %vm651_vm1, %v650_v17  ;;  %653 = vst.msk [vmem:[%s5437_s10 + $0x8] sm:$0x1] (!%p4172_p5), %vm651_vm1, %v650_v17  ;;  %v843_v6 = vsub.s32 (!%p4172_p5), 2, %v4652_v30 }
  0x1a   : > { %611 = vmatprep.subr.bf16.mxu0 %v4473_v1  ;;  %v4658_v31 = vsub.s32 %v669_v29, %v4652_v30 }
  0x1d   : > { %612 = vmatpush1.bf16.msra.mxu0 %v4388_v3 }
  0x1e   : > { %613 = vmatprep.subr.bf16.mxu0 %v4473_v1 }
  0x21   : > { %614 = vmatpush1.bf16.msra.mxu0 %v4389_v4  ;;  %v4687_v4 = vsub.s32 0, %v4652_v30 }
  0x22   : > { %615 = vmatprep.subr.bf16.mxu0 %v4473_v1 }
  0x25   : > { %616 = vmatpush1.bf16.msra.mxu0 %v4390_v7  ;;  %v847_v7 = vsub.s32 3, %v4652_v30 }
  0x26   : > { %617 = vmatprep.subr.bf16.mxu0 %v4473_v1 }
  0x29   : > { %618 = vmatpush1.bf16.msra.mxu0 %v4391_v8 }
  0x2a   : > { %619 = vmatprep.subr.bf16.mxu0 %v4473_v1 }
  0x2d   : > { %620 = vmatpush1.bf16.msra.mxu0 %v4392_v9  ;;  %v851_v9 = vsub.s32 4, %v4652_v30 }
  0x2e   : > { %621 = vmatprep.subr.bf16.mxu0 %v4473_v1 }
  0x31   : > { %622 = vmatpush1.bf16.msra.mxu0 %v4393_v10  ;;  %v855_v10 = vsub.s32 5, %v4652_v30 }
  0x32   : > { %623 = vmatprep.subr.bf16.mxu0 %v4473_v1 }
  0x35   : > { %624 = vmatpush1.bf16.msra.mxu0 %v4394_v11  ;;  %v859_v11 = vsub.s32 6, %v4652_v30 }
  0x36   : > { %625 = vmatprep.subr.bf16.mxu0 %v4473_v1 }
  0x39   : > { %626 = vmatpush1.bf16.msra.mxu0 %v4395_v12  ;;  %v863_v12 = vsub.s32 7, %v4652_v30 }
  0x3a   : > { %627 = vmatprep.subr.bf16.mxu0 %v4473_v1 }
  0x3d   : > { %628 = vmatpush1.bf16.msra.mxu0 %v4396_v13 }
  0x3e   : > { %629 = vmatprep.subr.bf16.mxu0 %v4473_v1 }
  0x41   : > { %630 = vmatpush1.bf16.msra.mxu0 %v4397_v14 }
  0x44   : > { %640 = vmatmul.mubr.bf16.vlgmr.msra.gmra.mrb[0].mxu0 %v529_v16 }
 0x117   : > { %v641_v22 = vpop.f32.mrb[0].mxu0 }
 0x118   : > { %v648_v23 = vcombine.high %v641_v22, %v641_v22  ;;  %v655_v24 = vadd.f32 %v654_v18, %v641_v22  ;;  %v643_v25 = vpop.f32.mrb[1].mxu0 }
 0x119   : > { %v644_v26 = vpop.f32.mrb[2].mxu0 }
 0x11a   : > { %v656_v27 = vadd.f32 %v654_v18, %v648_v23  ;;  %658 = vst.msk [vmem:[%s5437_s10 + $0x1] sm:$0xf] %vm657_vm2, %v655_v24  ;;  %v645_v28 = vpop.f32.mrb[3].mxu0 }
 0x11c   : > { %659 = vst.msk [vmem:[%s5437_s10 + $0x9] sm:$0xf] %vm657_vm2, %v656_v27 }
 0x121   : > { %v662_v32 = vld [vmem:[%s5437_s10] sm:$0x1f] }
 0x122   : > { %v666_v33 = vcombine.high %v662_v32, %v662_v32  ;;  %v673_v34 = vrot.slane %v662_v32, %v4658_v31 }
 0x123   : > { %v663_v35 = vld [vmem:[%s5437_s10 + $0x8] sm:$0x1f] }
 0x124   : > { %v680_v36 = vrot.slane %v666_v33, %v4658_v31  ;;  %v681_v37 = vcombine.high %v673_v34, %v673_v34  ;;  %v712_v38 = vrot.slane %v663_v35, %v4658_v31  ;;  %v688_v39 = vrot.slane %v673_v34, %v4658_v31 }
 0x125   : > { %v705_v40 = vcombine.high %v663_v35, %v663_v35 }
 0x126   : > { %v695_v41 = vrot.slane %v680_v36, %v4658_v31  ;;  %v702_v42 = vrot.slane %v681_v37, %v4658_v31  ;;  %v720_v43 = vcombine.high %v712_v38, %v712_v38  ;;  %v727_v44 = vrot.slane %v712_v38, %v4658_v31 }
 0x127   : > { %v719_v45 = vrot.slane %v705_v40, %v4658_v31  ;;  %v703_v14 = vcombine.high %v688_v39, %v688_v39 }
 0x128   : > { %v741_v46 = vrot.slane %v720_v43, %v4658_v31  ;;  %v742_v47 = vcombine.high %v727_v44, %v727_v44  ;;  %v754_v48 = vcombine.low %v688_v39, %v702_v42  ;;  %v4186_v49 = vcombine.high %v688_v39, %v702_v42 }
 0x129   : > { %v756_v50 = vcombine.low %v695_v41, %v727_v44  ;;  %v734_v51 = vrot.slane %v719_v45, %v4658_v31  ;;  %v704_v15 = vcombine.high %v702_v42, %v702_v42 }
 0x12a   : > { %v757_v52 = vcombine.low %v741_v46, %v742_v47  ;;  %v764_v53 = vrot.slane %v754_v48, %v4658_v31  ;;  %v771_v54 = vrot.slane %v4186_v49, %v4658_v31  ;;  %v743_v55 = vcombine.high %v741_v46, %v741_v46 }
 0x12b   : > { %v778_v56 = vrot.slane %v756_v50, %v4658_v31 }
 0x12c   : > { %v785_v57 = vrot.slane %v757_v52, %v4658_v31  ;;  %v786_v58 = vcombine.low %v764_v53, %v771_v54  ;;  %v803_v59 = vcombine.low %v743_v55, %v734_v51 }
 0x12e   : > { %v787_v60 = vcombine.low %v778_v56, %v785_v57  ;;  %v794_v61 = vrot.slane %v786_v58, %v4658_v31  ;;  %v810_v63 = vrot.slane %v803_v59, %v4658_v31 }
 0x130   : > { %v801_v62 = vrot.slane %v787_v60, %v4658_v31  ;;  %v817_v2 = vrot.slane %v810_v63, %v4658_v31 }
 0x132   : > { %v802_v0 = vcombine.low %v794_v61, %v801_v62  ;;  %v825_v3 = vsel %vm824_vm4, %v817_v2, 0.0 }
 0x134   : > { %v821_v1 = vsel %vm820_vm3, %v802_v0, 0.0 }
 0x135   : > { %822 = vadd.xlane.f32.xlu0 %v821_v1 }
 0x139   : > { %826 = vadd.xlane.f32.xlu0 %v825_v3 }
 0x1c2   : > { %v823_v8 = vpop.xlane.xlu0 %822 }
 0x1c3   : > { %v829_v13 = vmul.f32 0.03125, %v823_v8  ;;  %v4187_v8 = vld [vmem:[%s5429_s2 + $0x5] ss:$0 sm:$0xff] }
 0x1c5   : > { %v836_v16 = vrot.slane %v829_v13, %v4687_v4  ;;  %v840_v17 = vrot.slane %v829_v13, %v4690_v5  ;;  %v844_v18 = vrot.slane %v829_v13, %v843_v6  ;;  %v848_v19 = vrot.slane %v829_v13, %v847_v7 }
 0x1c6   : > { %v827_v20 = vpop.xlane.xlu0 %826  ;;  %v852_v21 = vrot.slane %v829_v13, %v851_v9  ;;  %v856_v22 = vrot.slane %v829_v13, %v855_v10  ;;  %v860_v23 = vrot.slane %v829_v13, %v859_v11  ;;  %v864_v24 = vrot.slane %v829_v13, %v863_v12 }
 0x1c7   : > { %v830_v25 = vmul.f32 0.03125, %v827_v20  ;;  %v4712_v26 = vsub.f32 %v688_v39, %v836_v16  ;;  %v4714_v27 = vsub.f32 %v702_v42, %v840_v17  ;;  %v4716_v28 = vsub.f32 %v703_v14, %v844_v18 }
 0x1c8   : > { %v4718_v29 = vsub.f32 %v704_v15, %v848_v19  ;;  %v4720_v32 = vsub.f32 %v695_v41, %v852_v21  ;;  %v4722_v33 = vsub.f32 %v727_v44, %v856_v22  ;;  %v4724_v34 = vsub.f32 %v741_v46, %v860_v23  ;;  %v4188_v15 = vld [vmem:[%s5429_s2 + $0x6] ss:$0 sm:$0xff] }
 0x1c9   : > { %v868_v35 = vrot.slane %v830_v25, %v4687_v4  ;;  %v872_v36 = vrot.slane %v830_v25, %v4690_v5  ;;  %v4728_v37 = vsub.f32 %v742_v47, %v864_v24  ;;  %v893_v38 = vmul.f32 %v4712_v26, %v4712_v26 }
 0x1ca   : > { %v894_v39 = vmul.f32 %v4714_v27, %v4714_v27  ;;  %v895_v40 = vmul.f32 %v4716_v28, %v4716_v28  ;;  %v896_v41 = vmul.f32 %v4718_v29, %v4718_v29  ;;  %v897_v42 = vmul.f32 %v4720_v32, %v4720_v32 }
 0x1cb   : > { %v4740_v43 = vsub.f32 %v743_v55, %v868_v35  ;;  %v4742_v44 = vsub.f32 %v734_v51, %v872_v36  ;;  %v898_v45 = vmul.f32 %v4722_v33, %v4722_v33  ;;  %v899_v46 = vmul.f32 %v4724_v34, %v4724_v34 }
 0x1cc   : > { %v900_v47 = vmul.f32 %v4728_v37, %v4728_v37  ;;  %v913_v48 = vcombine.low %v893_v38, %v894_v39  ;;  %v914_v49 = vcombine.low %v895_v40, %v896_v41  ;;  %v1058_v13 = vcombine.high %v4187_v8, %v4187_v8 }
 0x1cd   : > { %v901_v50 = vmul.f32 %v4740_v43, %v4740_v43  ;;  %v902_v52 = vmul.f32 %v4742_v44, %v4742_v44  ;;  %v915_v53 = vcombine.low %v897_v42, %v898_v45  ;;  %v1065_v17 = vrot.slane %v4187_v8, %v4658_v31 }
 0x1ce   : > { %v916_v51 = vcombine.low %v899_v46, %v900_v47  ;;  %v923_v54 = vrot.slane %v913_v48, %v4658_v31  ;;  %v930_v55 = vrot.slane %v914_v49, %v4658_v31  ;;  %v1072_v18 = vrot.slane %v1058_v13, %v4658_v31 }
 0x1cf   : > { %v937_v56 = vrot.slane %v915_v53, %v4658_v31  ;;  %v962_v59 = vcombine.low %v901_v50, %v902_v52  ;;  %v1130_v20 = vcombine.high %v4188_v15, %v4188_v15  ;;  %v1137_v21 = vrot.slane %v4188_v15, %v4658_v31 }
 0x1d0   : > { %v944_v57 = vrot.slane %v916_v51, %v4658_v31  ;;  %v945_v58 = vcombine.low %v923_v54, %v930_v55  ;;  %v1073_v24 = vcombine.high %v1065_v17, %v1065_v17  ;;  %v1074_v25 = vcombine.high %v1072_v18, %v1072_v18 }
 0x1d1   : > { %v969_v63 = vrot.slane %v962_v59, %v4658_v31  ;;  %v1144_v35 = vrot.slane %v1130_v20, %v4658_v31  ;;  %v1145_v36 = vcombine.high %v1137_v21, %v1137_v21  ;;  %v1081_v39 = vrot.slane %v1065_v17, %v4658_v31 }
 0x1d2   : > { %v946_v60 = vcombine.low %v937_v56, %v944_v57  ;;  %v953_v61 = vrot.slane %v945_v58, %v4658_v31  ;;  %v1088_v40 = vrot.slane %v1072_v18, %v4658_v31  ;;  %v1095_v41 = vrot.slane %v1073_v24, %v4658_v31 }
 0x1d3   : > { %v976_v2 = vrot.slane %v969_v63, %v4658_v31  ;;  %v1102_v42 = vrot.slane %v1074_v25, %v4658_v31  ;;  %v1146_v45 = vcombine.high %v1144_v35, %v1144_v35  ;;  %v1153_v46 = vrot.slane %v1137_v21, %v4658_v31 }
 0x1d4   : > { %v960_v62 = vrot.slane %v946_v60, %v4658_v31  ;;  %v1167_v47 = vrot.slane %v1145_v36, %v4658_v31  ;;  %v1103_v48 = vcombine.high %v1081_v39, %v1081_v39  ;;  %v1104_v49 = vcombine.high %v1088_v40, %v1088_v40 }
 0x1d5   : > { %v982_v3 = vsel %vm824_vm4, %v976_v2, 0.0  ;;  %v1105_v50 = vcombine.high %v1095_v41, %v1095_v41  ;;  %v1106_v52 = vcombine.high %v1102_v42, %v1102_v42  ;;  %v1160_v51 = vrot.slane %v1144_v35, %v4658_v31 }
 0x1d6   : > { %v961_v0 = vcombine.low %v953_v61, %v960_v62  ;;  %v1174_v54 = vrot.slane %v1146_v45, %v4658_v31  ;;  %v1175_v55 = vcombine.high %v1153_v46, %v1153_v46  ;;  %v1177_v56 = vcombine.high %v1167_v47, %v1167_v47 }
 0x1d7   : > { %v1176_v8 = vcombine.high %v1160_v51, %v1160_v51 }
 0x1d8   : > { %v979_v1 = vsel %vm820_vm3, %v961_v0, 0.0 }
 0x1d9   : > { %980 = vadd.xlane.f32.xlu1 %v979_v1 }
 0x1dd   : > { %983 = vadd.xlane.f32.xlu1 %v982_v3 }
 0x266   : > { %v981_v14 = vpop.xlane.xlu1 %980 }
 0x267   : > { %v985_v16 = vmul.f32 0.03125, %v981_v14 }
 0x269   : > { %v987_v19 = vadd.f32 1e-05, %v985_v16 }
 0x26a   : > { %v984_v22 = vpop.xlane.xlu1 %983 }
 0x26b   : > { %4400 = vrsqrt.f32 %v987_v19  ;;  %v986_v23 = vmul.f32 0.03125, %v984_v22 }
 0x26d   : > { %v988_v38 = vadd.f32 1e-05, %v986_v23 }
 0x26f   : > { %4402 = vrsqrt.f32 %v988_v38 }
 0x275   : > { %v4401_v53 = vpop.eup %4400 }
 0x276   : > { %v996_v57 = vrot.slane %v4401_v53, %v4687_v4  ;;  %v1000_v58 = vrot.slane %v4401_v53, %v4690_v5  ;;  %v1004_v59 = vrot.slane %v4401_v53, %v843_v6  ;;  %v1008_v60 = vrot.slane %v4401_v53, %v847_v7 }
 0x277   : > { %v1012_v61 = vrot.slane %v4401_v53, %v851_v9  ;;  %v1016_v62 = vrot.slane %v4401_v53, %v855_v10  ;;  %v1020_v63 = vrot.slane %v4401_v53, %v859_v11  ;;  %v1024_v0 = vrot.slane %v4401_v53, %v863_v12 }
 0x278   : > { %v1043_v1 = vmul.f32 %v996_v57, %v4712_v26  ;;  %v1044_v2 = vmul.f32 %v1000_v58, %v4714_v27  ;;  %v1045_v6 = vmul.f32 %v1004_v59, %v4716_v28  ;;  %v1046_v7 = vmul.f32 %v1008_v60, %v4718_v29 }
 0x279   : > { %v1047_v3 = vmul.f32 %v1012_v61, %v4720_v32  ;;  %v1048_v9 = vmul.f32 %v1016_v62, %v4722_v33  ;;  %v1049_v10 = vmul.f32 %v1020_v63, %v4724_v34  ;;  %v4403_v12 = vpop.eup %4402  ;;  %v1050_v26 = vmul.f32 %v1024_v0, %v4728_v37 }
 0x27a   : > { %v1115_v13 = vmul.f32 %v1081_v39, %v1043_v1  ;;  %v1116_v11 = vmul.f32 %v1095_v41, %v1044_v2  ;;  %v1117_v14 = vmul.f32 %v1103_v48, %v1045_v6  ;;  %v1118_v30 = vmul.f32 %v1105_v50, %v1046_v7 }
 0x27b   : > { %v1119_v15 = vmul.f32 %v1088_v40, %v1047_v3  ;;  %v1120_v27 = vmul.f32 %v1102_v42, %v1048_v9  ;;  %v1121_v16 = vmul.f32 %v1104_v49, %v1049_v10  ;;  %v1178_v32 = vcombine.high %v1174_v54, %v1174_v54 }
 0x27c   : > { %v1187_v28 = vadd.f32 %v1153_v46, %v1115_v13  ;;  %v1188_v17 = vadd.f32 %v1167_v47, %v1116_v11  ;;  %v1189_v29 = vadd.f32 %v1175_v55, %v1117_v14  ;;  %v1190_v18 = vadd.f32 %v1177_v56, %v1118_v30 }
 0x27d   : > { %v1191_v19 = vadd.f32 %v1160_v51, %v1119_v15  ;;  %v1028_v34 = vrot.slane %v4403_v12, %v4687_v4  ;;  %v1032_v21 = vrot.slane %v4403_v12, %v4690_v5  ;;  %v1122_v22 = vmul.f32 %v1106_v52, %v1050_v26 }
 0x27e   : > { %v1207_v33 = vcombine.low %v1187_v28, %v1188_v17  ;;  %v1208_v20 = vcombine.low %v1189_v29, %v1190_v18  ;;  %v1192_v23 = vadd.f32 %v1174_v54, %v1120_v27  ;;  %v1193_v24 = vadd.f32 %v1176_v8, %v1121_v16 }
 0x27f   : > { %v1229_v37 = vrot.slane %v1191_v19, %v4658_v31  ;;  %v1051_v36 = vmul.f32 %v1028_v34, %v4740_v43  ;;  %v1052_v38 = vmul.f32 %v1032_v21, %v4742_v44  ;;  %v1194_v48 = vadd.f32 %v1178_v32, %v1122_v22 }
 0x280   : > { %v1215_v25 = vrot.slane %v1207_v33, %v4658_v31  ;;  %v1222_v35 = vrot.slane %v1208_v20, %v4658_v31  ;;  %v1246_v4 = vcombine.low %v1192_v23, %v1193_v24 }
 0x281   : > { %v1123_v42 = vmul.f32 %v1081_v39, %v1051_v36  ;;  %v1124_v45 = vmul.f32 %v1095_v41, %v1052_v38  ;;  %v1244_v49 = vrot.slane %v1229_v37, %v4658_v31 }
 0x282   : > { %v1230_v40 = vcombine.low %v1215_v25, %v1222_v35  ;;  %v1254_v54 = vrot.slane %v1246_v4, %v4658_v31 }
 0x283   : > { %v1195_v50 = vadd.f32 %v1153_v46, %v1123_v42  ;;  %v1196_v52 = vadd.f32 %v1167_v47, %v1124_v45 }
 0x284   : > { %v1237_v5 = vrot.slane %v1230_v40, %v4658_v31 }
 0x285   : > { %v1247_v51 = vcombine.low %v1194_v48, %v1195_v50  ;;  %v1268_v44 = vrot.slane %v1196_v52, %v4658_v31 }
 0x286   : > { %v1245_v53 = vcombine.low %v1237_v5, %v1244_v49 }
 0x287   : > { %v1261_v43 = vrot.slane %v1247_v51, %v4658_v31  ;;  %v1283_v55 = vrot.slane %v1268_v44, %v4658_v31 }
 0x288   : > { %1288 = vst.msk [vmem:[%s5437_s10] sm:$0x1f] %vm1287_vm5, %v1245_v53 }
 0x289   : > { %v1269_v39 = vcombine.low %v1254_v54, %v1261_v43 }
 0x28b   : > { %v1276_v41 = vrot.slane %v1269_v39, %v4658_v31 }
 0x28d   : > { %v1284_v46 = vcombine.low %v1276_v41, %v1283_v55 }
 0x28f   : > { %1289 = vst.msk [vmem:[%s5437_s10 + $0x8] sm:$0x1f] %vm1287_vm5, %v1284_v46 }
 0x290 PF: > { %v1321_v56 = vlaneseq  ;;  %v4475_v58 = vmov 1966171168   ;;  %vm1471_vm6 = vcmask 261120   ;;  %vm1475_vm7 = vcmask 254976   ;;  %s4479_s29 = smov 64   ;;  %s4480_s4 = smov 80  }
 0x291   : > { %v1319_v59 = vunpack.c.l.s4 %v4475_v58  ;;  %vm4477_vm8 = vmmov 0   ;;  %vm2145_vm9 = vcmask 130048   ;;  %vm2243_vm10 = vcmask 36864   ;;  %s4482_s13 = smov 112   ;;  %s4483_s14 = smov 48  }
 0x292   : > { %v1322_v60 = vshrl.u32 %v1321_v56, 7  ;;  %vm2274_vm11 = vcmask 1041408   ;;  %vm2275_vm12 = vcmask 1042432   ;;  %vm2270_vm13 = vcmask 39936  }
 0x293   : > { %v1320_v31 = vunpack.c.0.s8 %v1319_v59  ;;  %vm3784_vm14 = vcmask 523264   ;;  %vm4012_vm15 = vcmask 258048  }
 0x294   : > { %v4882_v25 = vsub.s32 0, %v1322_v60  ;;  %v4884_v35 = vsub.s32 1, %v1322_v60  ;;  %v4886_v36 = vsub.s32 2, %v1322_v60  ;;  %v4888_v38 = vsub.s32 3, %v1322_v60 }
 0x295   : > { %v4830_v63 = vsub.s32 %v1320_v31, %v1322_v60  ;;  %v4890_v42 = vsub.s32 4, %v1322_v60  ;;  %v4892_v45 = vsub.s32 5, %v1322_v60  ;;  %v4894_v48 = vsub.s32 6, %v1322_v60 }
 0x296   : > { %v1290_v47 = vld [vmem:[%s5437_s10] sm:$0x1f]  ;;  %v1291_v57 = vld [vmem:[%s5437_s10 + $0x8] sm:$0x1f]  ;;  %v4896_v4 = vsub.s32 7, %v1322_v60 }
 0x297   : > { %v1317_v61 = vcombine.high %v1290_v47, %v1290_v47  ;;  %v1356_v62 = vcombine.high %v1291_v57, %v1291_v57  ;;  %v1324_v0 = vrot.slane %v1290_v47, %v4830_v63  ;;  %v1363_v2 = vrot.slane %v1291_v57, %v4830_v63  ;;  %5451 = vst [vmem:[#allocation4_spill] sm:$0xff] %v4894_v48 }
 0x298   : > { %5452 = vst [vmem:[#allocation5_spill] sm:$0xff] %v4896_v4 }
 0x299   : > { %v1331_v1 = vrot.slane %v1317_v61, %v4830_v63  ;;  %v1370_v6 = vrot.slane %v1356_v62, %v4830_v63  ;;  %v1332_v7 = vcombine.high %v1324_v0, %v1324_v0  ;;  %v4837_v3 = vrot.slane %v1324_v0, %v4830_v63 }
 0x29a   : > { %v1371_v10 = vcombine.high %v1363_v2, %v1363_v2  ;;  %v4843_v8 = vrot.slane %v1363_v2, %v4830_v63 }
 0x29b   : > { %v4840_v9 = vrot.slane %v1331_v1, %v4830_v63  ;;  %v4846_v13 = vrot.slane %v1332_v7, %v4830_v63  ;;  %v4852_v14 = vrot.slane %v1370_v6, %v4830_v63  ;;  %v4900_v49 = vcombine.high %v4837_v3, %v4837_v3 }
 0x29c   : > { %v4849_v11 = vrot.slane %v1371_v10, %v4830_v63  ;;  %v4856_v30 = vcombine.high %v4843_v8, %v4843_v8 }
 0x29d   : > { %v1407_v12 = vcombine.low %v4840_v9, %v4843_v8  ;;  %v1405_v26 = vcombine.low %v4837_v3, %v4846_v13  ;;  %v4189_v15 = vcombine.high %v4837_v3, %v4846_v13  ;;  %v4904_v50 = vcombine.high %v4846_v13, %v4846_v13 }
 0x29e   : > { %v4866_v27 = vcombine.high %v4849_v11, %v4849_v11  ;;  %v1408_v16 = vcombine.low %v4849_v11, %v4856_v30 }
 0x29f   : > { %v1429_v28 = vrot.slane %v1407_v12, %v4830_v63  ;;  %v1415_v17 = vrot.slane %v1405_v26, %v4830_v63  ;;  %v1422_v29 = vrot.slane %v4189_v15, %v4830_v63 }
 0x2a0   : > { %v1454_v18 = vcombine.low %v4866_v27, %v4852_v14  ;;  %v1436_v32 = vrot.slane %v1408_v16, %v4830_v63 }
 0x2a1   : > { %v1437_v19 = vcombine.low %v1415_v17, %v1422_v29 }
 0x2a2   : > { %v1438_v33 = vcombine.low %v1429_v28, %v1436_v32  ;;  %v1461_v20 = vrot.slane %v1454_v18, %v4830_v63 }
 0x2a3   : > { %v1445_v34 = vrot.slane %v1437_v19, %v4830_v63 }
 0x2a4   : > { %v1452_v21 = vrot.slane %v1438_v33, %v4830_v63  ;;  %v1468_v23 = vrot.slane %v1461_v20, %v4830_v63 }
 0x2a6   : > { %v1453_v22 = vcombine.low %v1445_v34, %v1452_v21  ;;  %v1476_v37 = vsel %vm1475_vm7, %v1468_v23, 0.0 }
 0x2a8   : > { %v1472_v24 = vsel %vm1471_vm6, %v1453_v22, 0.0 }
 0x2a9   : > { %1473 = vadd.xlane.f32.xlu0 %v1472_v24 }
 0x2ad   : > { %1477 = vadd.xlane.f32.xlu0 %v1476_v37 }
 0x336   : > { %v1474_v40 = vpop.xlane.xlu0 %1473 }
 0x337   : > { %v1480_v5 = vmul.f32 0.03125, %v1474_v40 }
 0x339   : > { %v1487_v52 = vrot.slane %v1480_v5, %v4882_v25  ;;  %v1491_v53 = vrot.slane %v1480_v5, %v4884_v35  ;;  %v1495_v51 = vrot.slane %v1480_v5, %v4886_v36  ;;  %v1499_v54 = vrot.slane %v1480_v5, %v4888_v38 }
 0x33a   : > { %v1478_v43 = vpop.xlane.xlu0 %1477  ;;  %v1503_v44 = vrot.slane %v1480_v5, %v4890_v42  ;;  %v1507_v39 = vrot.slane %v1480_v5, %v4892_v45  ;;  %v1511_v41 = vrot.slane %v1480_v5, %v4894_v48  ;;  %v1515_v55 = vrot.slane %v1480_v5, %v4896_v4 }
 0x33b   : > { %v1481_v46 = vmul.f32 0.03125, %v1478_v43  ;;  %v4915_v47 = vsub.f32 %v4837_v3, %v1487_v52  ;;  %v4918_v56 = vsub.f32 %v4846_v13, %v1491_v53  ;;  %v4921_v57 = vsub.f32 %v4900_v49, %v1495_v51 }
 0x33c   : > { %v4924_v58 = vsub.f32 %v4904_v50, %v1499_v54  ;;  %v4927_v59 = vsub.f32 %v4840_v9, %v1503_v44  ;;  %v4930_v60 = vsub.f32 %v4843_v8, %v1507_v39  ;;  %v4933_v61 = vsub.f32 %v4849_v11, %v1511_v41  ;;  %v4406_v44 = vld [vmem:[%s4564_s22] sm:$0xff]   ;;  %v4407_v41 = vld [vmem:[%s4564_s22 + $0x8] sm:$0xff]  }
 0x33d   : > { %v1519_v31 = vrot.slane %v1481_v46, %v4882_v25  ;;  %v1523_v62 = vrot.slane %v1481_v46, %v4884_v35  ;;  %v4938_v0 = vsub.f32 %v4856_v30, %v1515_v55  ;;  %v1544_v1 = vmul.f32 %v4915_v47, %v4915_v47  ;;  %v4987_v55 = vld [vmem:[%s4593_s26] sm:$0x3f] }
 0x33e   : > { %v1545_v2 = vmul.f32 %v4918_v56, %v4918_v56  ;;  %v1546_v6 = vmul.f32 %v4921_v57, %v4921_v57  ;;  %v1547_v7 = vmul.f32 %v4924_v58, %v4924_v58  ;;  %v1548_v10 = vmul.f32 %v4927_v59, %v4927_v59 }
 0x33f   : > { %v4951_v12 = vsub.f32 %v4866_v27, %v1519_v31  ;;  %v4954_v26 = vsub.f32 %v4852_v14, %v1523_v62  ;;  %v1549_v15 = vmul.f32 %v4930_v60, %v4930_v60  ;;  %v1550_v16 = vmul.f32 %v4933_v61, %v4933_v61 }
 0x340   : > { %v1551_v28 = vmul.f32 %v4938_v0, %v4938_v0  ;;  %v1564_v17 = vcombine.low %v1544_v1, %v1545_v2  ;;  %v1565_v29 = vcombine.low %v1546_v6, %v1547_v7  ;;  %v5439_v39 = vmov 0.0  }
 0x341   : > { %v1552_v18 = vmul.f32 %v4951_v12, %v4951_v12  ;;  %v1553_v32 = vmul.f32 %v4954_v26, %v4954_v26  ;;  %v1566_v19 = vcombine.low %v1548_v10, %v1549_v15  ;;  %4259 = vmatprep.subr.bf16.mxu1 %v5439_v39  ;;  %4263 = vmatprep.mubr.msk.bf16.mxu1 %vm4477_vm8, %v5439_v39 }
 0x342   : > { %v1567_v33 = vcombine.low %v1550_v16, %v1551_v28  ;;  %v1574_v20 = vrot.slane %v1564_v17, %v4830_v63  ;;  %v1581_v34 = vrot.slane %v1565_v29, %v4830_v63  ;;  %4260 = vmatpush3.bf16.msra.mxu1 %v4406_v44  ;;  %4273 = vmatprep.subr.bf16.mxu0 %v5439_v39 }
 0x343   : > { %v1588_v21 = vrot.slane %v1566_v19, %v4830_v63  ;;  %v1613_v22 = vcombine.low %v1552_v18, %v1553_v32  ;;  %4261 = vmatprep.subr.bf16.mxu1 %v5439_v39  ;;  %4275 = vmatprep.mubr.msk.bf16.mxu0 %vm4477_vm8, %v5439_v39  ;;  %v1707_v46 = vrot.slane %v4987_v55, %v4882_v25 }
 0x344   : > { %v1595_v23 = vrot.slane %v1567_v33, %v4830_v63  ;;  %v1596_v24 = vcombine.low %v1574_v20, %v1581_v34  ;;  %v1779_v31 = vrot.slane %v4987_v55, %v4884_v35 }
 0x345   : > { %v1620_v5 = vrot.slane %v1613_v22, %v4830_v63  ;;  %v1709_v62 = vcombine.high %v1707_v46, %v1707_v46  ;;  %v1716_v7 = vrot.slane %v1707_v46, %v4830_v63 }
 0x346   : > { %v1597_v37 = vcombine.low %v1588_v21, %v1595_v23  ;;  %v1604_v40 = vrot.slane %v1596_v24, %v4830_v63  ;;  %4262 = vmatpush3.bf16.msra.mxu1 %v4407_v41  ;;  %v1781_v1 = vcombine.high %v1779_v31, %v1779_v31  ;;  %v1788_v16 = vrot.slane %v1779_v31, %v4830_v63 }
 0x347   : > { %v1627_v51 = vrot.slane %v1620_v5, %v4830_v63  ;;  %4267 = vmatprep.subr.bf16.mxu1 %v5439_v39  ;;  %v1723_v10 = vrot.slane %v1709_v62, %v4830_v63  ;;  %v1724_v18 = vcombine.high %v1716_v7, %v1716_v7  ;;  %v1732_v34 = vrot.slane %v1716_v7, %v4830_v63 }
 0x348   : > { %v1611_v52 = vrot.slane %v1597_v37, %v4830_v63  ;;  %v1795_v28 = vrot.slane %v1781_v1, %v4830_v63  ;;  %v1796_v33 = vcombine.high %v1788_v16, %v1788_v16  ;;  %v1804_v24 = vrot.slane %v1788_v16, %v4830_v63 }
 0x349   : > { %v1633_v43 = vsel %vm1475_vm7, %v1627_v51, 0.0  ;;  %v1725_v32 = vcombine.high %v1723_v10, %v1723_v10  ;;  %v1746_v21 = vrot.slane %v1724_v18, %v4830_v63  ;;  %v1739_v22 = vrot.slane %v1723_v10, %v4830_v63 }
 0x34a   : > { %v1612_v53 = vcombine.low %v1604_v40, %v1611_v52  ;;  %v1797_v20 = vcombine.high %v1795_v28, %v1795_v28  ;;  %v1811_v37 = vrot.slane %v1795_v28, %v4830_v63  ;;  %v1818_v40 = vrot.slane %v1796_v33, %v4830_v63 }
 0x34b   : > { %v1753_v23 = vrot.slane %v1725_v32, %v4830_v63  ;;  %v1754_v52 = vcombine.high %v1732_v34, %v1732_v34  ;;  %v1756_v51 = vcombine.high %v1746_v21, %v1746_v21  ;;  %v1826_v44 = vcombine.high %v1804_v24, %v1804_v24 }
 0x34c   : > { %v1630_v54 = vsel %vm1471_vm6, %v1612_v53, 0.0  ;;  %v1825_v5 = vrot.slane %v1797_v20, %v4830_v63  ;;  %v1755_v53 = vcombine.high %v1739_v22, %v1739_v22  ;;  %v1827_v41 = vcombine.high %v1811_v37, %v1811_v37 }
 0x34d   : > { %1631 = vadd.xlane.f32.xlu1 %v1630_v54  ;;  %v1757_v54 = vcombine.high %v1753_v23, %v1753_v23  ;;  %v1828_v46 = vcombine.high %v1818_v40, %v1818_v40 }
 0x34e   : > { %v1829_v31 = vcombine.high %v1825_v5, %v1825_v5 }
 0x351   : > { %1634 = vadd.xlane.f32.xlu1 %v1633_v43 }
 0x3da   : > { %v1632_v2 = vpop.xlane.xlu1 %1631 }
 0x3db   : > { %v1636_v6 = vmul.f32 0.03125, %v1632_v2 }
 0x3dd   : > { %v1638_v15 = vadd.f32 1e-05, %v1636_v6 }
 0x3de   : > { %v1635_v17 = vpop.xlane.xlu1 %1634 }
 0x3df   : > { %4416 = vrsqrt.f32 %v1638_v15  ;;  %v1637_v29 = vmul.f32 0.03125, %v1635_v17 }
 0x3e1   : > { %v1639_v19 = vadd.f32 1e-05, %v1637_v29 }
 0x3e3   : > { %4418 = vrsqrt.f32 %v1639_v19 }
 0x3e9   : > { %v4417_v43 = vpop.eup %4416 }
 0x3ea   : > { %v1647_v62 = vrot.slane %v4417_v43, %v4882_v25  ;;  %v1651_v1 = vrot.slane %v4417_v43, %v4884_v35  ;;  %v1655_v2 = vrot.slane %v4417_v43, %v4886_v36  ;;  %v1659_v6 = vrot.slane %v4417_v43, %v4888_v38 }
 0x3eb   : > { %v1663_v7 = vrot.slane %v4417_v43, %v4890_v42  ;;  %v1667_v10 = vrot.slane %v4417_v43, %v4892_v45  ;;  %v1671_v15 = vrot.slane %v4417_v43, %v4894_v48  ;;  %v1675_v16 = vrot.slane %v4417_v43, %v4896_v4 }
 0x3ec   : > { %v1694_v28 = vmul.f32 %v1647_v62, %v4915_v47  ;;  %v1695_v17 = vmul.f32 %v1651_v1, %v4918_v56  ;;  %v1696_v29 = vmul.f32 %v1655_v2, %v4921_v57  ;;  %v1697_v18 = vmul.f32 %v1659_v6, %v4924_v58 }
 0x3ed   : > { %v4419_v32 = vpop.eup %4418  ;;  %v1698_v19 = vmul.f32 %v1663_v7, %v4927_v59  ;;  %v1699_v33 = vmul.f32 %v1667_v10, %v4930_v60  ;;  %v1700_v20 = vmul.f32 %v1671_v15, %v4933_v61  ;;  %v1701_v39 = vmul.f32 %v1675_v16, %v4938_v0 }
 0x3ee   : > { %v1679_v48 = vrot.slane %v4419_v32, %v4882_v25  ;;  %v1683_v43 = vrot.slane %v4419_v32, %v4884_v35  ;;  %v1766_v47 = vmul.f32 %v1732_v34, %v1694_v28  ;;  %v1767_v62 = vmul.f32 %v1746_v21, %v1695_v17 }
 0x3ef   : > { %v1768_v56 = vmul.f32 %v1754_v52, %v1696_v29  ;;  %v1769_v1 = vmul.f32 %v1756_v51, %v1697_v18  ;;  %v1770_v57 = vmul.f32 %v1739_v22, %v1698_v19  ;;  %v1771_v2 = vmul.f32 %v1753_v23, %v1699_v33 }
 0x3f0   : > { %v1702_v58 = vmul.f32 %v1679_v48, %v4951_v12  ;;  %v1703_v59 = vmul.f32 %v1683_v43, %v4954_v26  ;;  %v1772_v6 = vmul.f32 %v1755_v53, %v1700_v20  ;;  %v1773_v60 = vmul.f32 %v1757_v54, %v1701_v39 }
 0x3f1   : > { %v1838_v7 = vadd.f32 %v1804_v24, %v1766_v47  ;;  %v1839_v61 = vadd.f32 %v1818_v40, %v1767_v62  ;;  %v1840_v10 = vadd.f32 %v1826_v44, %v1768_v56  ;;  %v1841_v0 = vadd.f32 %v1828_v46, %v1769_v1  ;;  %v4190_v46 = vld [vmem:[%s484_s20] ss:$0 sm:$0xff]  ;;  %s4478_s20 = smov 96  }
 0x3f2   : > { %v1774_v15 = vmul.f32 %v1732_v34, %v1702_v58  ;;  %v1775_v16 = vmul.f32 %v1746_v21, %v1703_v59  ;;  %v1842_v4 = vadd.f32 %v1811_v37, %v1770_v57  ;;  %v1843_v32 = vadd.f32 %v1825_v5, %v1771_v2 }
 0x3f3   : > { %v1844_v28 = vadd.f32 %v1827_v41, %v1772_v6  ;;  %v1845_v17 = vadd.f32 %v1829_v31, %v1773_v60  ;;  %v1858_v52 = vcombine.low %v1838_v7, %v1839_v61  ;;  %v1859_v51 = vcombine.low %v1840_v10, %v1841_v0 }
 0x3f4   : > { %v1846_v22 = vadd.f32 %v1804_v24, %v1774_v15  ;;  %v1847_v23 = vadd.f32 %v1818_v40, %v1775_v16  ;;  %v1860_v29 = vcombine.low %v1842_v4, %v1843_v32  ;;  %v5453_v41 = vmov 0.0  }
 0x3f5   : > { %v1861_v48 = vcombine.low %v1844_v28, %v1845_v17  ;;  %v1868_v12 = vrot.slane %v1858_v52, %v4830_v63  ;;  %v1875_v26 = vrot.slane %v1859_v51, %v4830_v63 }
 0x3f6   : > { %v1882_v39 = vrot.slane %v1860_v29, %v4830_v63  ;;  %v1907_v53 = vcombine.low %v1846_v22, %v1847_v23 }
 0x3f7   : > { %v1889_v34 = vrot.slane %v1861_v48, %v4830_v63  ;;  %v1890_v21 = vcombine.low %v1868_v12, %v1875_v26 }
 0x3f8   : > { %v1914_v37 = vrot.slane %v1907_v53, %v4830_v63 }
 0x3f9   : > { %v1891_v5 = vcombine.low %v1882_v39, %v1889_v34  ;;  %v1898_v54 = vrot.slane %v1890_v21, %v4830_v63 }
 0x3fa   : > { %v1921_v4 = vrot.slane %v1914_v37, %v4830_v63 }
 0x3fb   : > { %v1905_v24 = vrot.slane %v1891_v5, %v4830_v63 }
 0x3fd   : > { %v1906_v40 = vcombine.low %v1898_v54, %v1905_v24 }
 0x3ff   : > { %v1924_v44 = vpack.c.bf16 %v1921_v4, %v1906_v40 }
 0x401   : > { %4264 = vmatmul.mubr.msk.bf16.vlgmr.msra.gmra.mrb[0].mxu1 %vm1471_vm6, %v1924_v44 }
 0x402   : > { %4269 = vmatprep.mubr.msk.bf16.mxu1 %vm4477_vm8, %v5453_v41 }
 0x4d4   : > { %v1980_v31 = vpop.f32.mrb[0].mxu1 }
 0x4d5   : > { %v1981_v18 = vadd.f32 %v4190_v46, %v1980_v31  ;;  %v4265_v19 = vpop.f32.mrb[1].mxu1 }
 0x4d6   : > { %v1983_v33 = vpop.f32.mrb[2].mxu1 }
 0x4d7   : > { %v1989_v20 = vcombine.high %v1981_v18, %v1981_v18  ;;  %v1996_v43 = vrot.slane %v1981_v18, %v4830_v63  ;;  %v1984_v47 = vadd.f32 %v4190_v46, %v1983_v33  ;;  %v4266_v62 = vpop.f32.mrb[3].mxu1 }
 0x4d9   : > { %v2003_v56 = vrot.slane %v1989_v20, %v4830_v63  ;;  %v2004_v1 = vcombine.high %v1996_v43, %v1996_v43  ;;  %v2044_v57 = vrot.slane %v1984_v47, %v4830_v63  ;;  %v2012_v2 = vrot.slane %v1996_v43, %v4830_v63 }
 0x4db   : > { %v2005_v58 = vcombine.high %v2003_v56, %v2003_v56  ;;  %v2019_v59 = vrot.slane %v2003_v56, %v4830_v63  ;;  %v2026_v6 = vrot.slane %v2004_v1, %v4830_v63  ;;  %v2045_v60 = vcombine.high %v2044_v57, %v2044_v57 }
 0x4dc   : > { %v2052_v16 = vrot.slane %v2044_v57, %v4830_v63 }
 0x4dd   : > { %v2033_v7 = vrot.slane %v2005_v58, %v4830_v63  ;;  %v2035_v61 = vcombine.high %v2019_v59, %v2019_v59  ;;  %v2060_v10 = vcombine.low %v2012_v2, %v2026_v6  ;;  %v4194_v0 = vcombine.high %v2012_v2, %v2026_v6 }
 0x4de   : > { %v2082_v15 = vrot.slane %v2019_v59, %v4830_v63  ;;  %v2059_v32 = vrot.slane %v2045_v60, %v4830_v63  ;;  %v4481_v58 = vmov 65535  }
 0x4df   : > { %v2068_v28 = vrot.slane %v2060_v10, %v4830_v63  ;;  %v2075_v17 = vrot.slane %v4194_v0, %v4830_v63  ;;  %v2099_v52 = vcombine.low %v2033_v7, %v2035_v61  ;;  %v2037_v51 = vcombine.high %v2033_v7, %v2033_v7 }
 0x4e0   : > { %v2097_v29 = vrot.slane %v2082_v15, %v4830_v63  ;;  %v2121_v39 = vrot.slane %v2059_v32, %v4830_v63  ;;  %v2276_v59 = vsel %vm2274_vm11, 4294967295, %v4481_v58 }
 0x4e1   : > { %v2083_v22 = vcombine.low %v2068_v28, %v2075_v17  ;;  %v2100_v23 = vcombine.low %v2037_v51, %v2052_v16  ;;  %v2107_v12 = vrot.slane %v2099_v52, %v4830_v63  ;;  %v5082_v7 = vsel %vm2275_vm12, %v2276_v59, 0 }
 0x4e2   : > { %v2136_v5 = vrot.slane %v2121_v39, %v4830_v63 }
 0x4e3   : > { %v2090_v48 = vrot.slane %v2083_v22, %v4830_v63  ;;  %v2114_v26 = vrot.slane %v2100_v23, %v4830_v63 }
 0x4e5   : > { %v2098_v53 = vcombine.low %v2090_v48, %v2097_v29  ;;  %v2122_v34 = vcombine.low %v2107_v12, %v2114_v26 }
 0x4e7   : > { %v5058_v21 = vpack.c.bf16 %v2098_v53, %v2098_v53  ;;  %v2129_v37 = vrot.slane %v2122_v34, %v4830_v63 }
 0x4e9   : > { %v2137_v54 = vcombine.low %v2129_v37, %v2136_v5  ;;  %2143 = vrot.lane.b32.xlu0 %v5058_v21, %s4478_s20 }
 0x4eb   : > { %v5063_v24 = vpack.c.bf16 %v2137_v54, %v2137_v54 }
 0x4ed   : > { %2193 = vrot.lane.b32.xlu1 %v5063_v24, %s4478_s20 }
 0x55b   : > { %v2144_v4 = vpop.permute.xlu0 %2143 }
 0x55c   : > { %v2150_v40 = vsel %vm2145_vm9, %v2144_v4, 0 }
 0x55d   : > { %4268 = vmatpush3.bf16.xpose.msra.mxu1 %v2150_v40 }
 0x55e   : > { %4279 = vmatprep.subr.bf16.mxu1 %v5453_v41 }
 0x55f   : > { %v2194_v44 = vpop.permute.xlu1 %2193 }
 0x560   : > { %v2199_v46 = vsel %vm2145_vm9, %v2194_v44, 0 }
 0x561   : > { %4274 = vmatpush3.bf16.xpose.msra.mxu0 %v2199_v46 }
 0x562   : > { %4285 = vmatprep.subr.bf16.mxu0 %v5453_v41 }
 0x564   : > { %4270 = vmatmul.mubr.msk.bf16.vlgmr.msra.gmra.mrb[4].mxu1 %vm2145_vm9, %v5058_v21 }
 0x565   : > { %4281 = vmatprep.mubr.msk.bf16.mxu1 %vm4477_vm8, %v5453_v41 }
 0x568   : > { %4276 = vmatmul.mubr.msk.bf16.vlgmr.msra.gmra.mrb[0].mxu0 %vm2145_vm9, %v5063_v24 }
 0x569   : > { %4287 = vmatprep.mubr.msk.bf16.mxu0 %vm4477_vm8, %v5453_v41 }
 0x637   : > { %v2186_v31 = vpop.f32.mrb[4].mxu1 }
 0x638   : > { %v2241_v18 = vmul.f32 0.25, %v2186_v31  ;;  %v4271_v19 = vpop.f32.mrb[5].mxu1 }
 0x639   : > { %v2189_v33 = vpop.f32.mrb[6].mxu1 }
 0x63a   : > { %v4272_v20 = vpop.f32.mrb[7].mxu1  ;;  %v2244_v43 = vsel %vm2243_vm10, %v2241_v18, -inf }
 0x63b   : > { %v2235_v47 = vpop.f32.mrb[0].mxu0  ;;  %2245 = vmax.xlane.f32.xlu1 %v2244_v43 }
 0x63c   : > { %v2242_v62 = vmul.f32 0.25, %v2235_v47  ;;  %v4277_v56 = vpop.f32.mrb[1].mxu0 }
 0x63d   : > { %v2238_v1 = vpop.f32.mrb[2].mxu0 }
 0x63e   : > { %v4278_v57 = vpop.f32.mrb[3].mxu0  ;;  %v2247_v2 = vsel %vm2243_vm10, %v2242_v62, -inf }
 0x63f   : > { %2248 = vmax.xlane.f32.xlu0 %v2247_v2 }
 0x64c   : > { %2321 = vrot.lane.b32.xlu1 %v5063_v24, %s4479_s29 }
 0x650   : > { %2518 = vrot.lane.b32.xlu1 %v5058_v21, %s4480_s4 }
 0x6c8   : > { %v2246_v6 = vpop.xlane.xlu1 %2245 }
 0x6c9   : > { %v2250_v60 = vsub.f32 %v2241_v18, %v2246_v6 }
 0x6cb   : > { %v2252_v61 = vmul.f32 1.442695, %v2250_v60 }
 0x6cc   : > { %v2249_v10 = vpop.xlane.xlu0 %2248  ;;  %v2322_v0 = vpop.permute.xlu1 %2321 }
 0x6cd   : > { %4420 = vpow2.f32 %v2252_v61  ;;  %v2251_v15 = vsub.f32 %v2242_v62, %v2249_v10  ;;  %v2327_v16 = vand.u32 %v2322_v0, %v5082_v7 }
 0x6cf   : > { %v2254_v32 = vmul.f32 1.442695, %v2251_v15  ;;  %4286 = vmatpush3.bf16.msra.mxu0 %v2327_v16 }
 0x6d0   : > { %4297 = vmatprep.subr.bf16.mxu0 %v5453_v41  ;;  %v2519_v22 = vpop.permute.xlu1 %2518 }
 0x6d1   : > { %4422 = vpow2.f32 %v2254_v32  ;;  %v2524_v37 = vsel %vm2145_vm9, %v2519_v22, 0 }
 0x6d7   : > { %v4421_v28 = vpop.eup %4420 }
 0x6d8   : > { %v2256_v17 = vsel %vm2243_vm10, %v4421_v28, 0.0 }
 0x6d9   : > { %2257 = vadd.xlane.f32.xlu0 %v2256_v17 }
 0x6db   : > { %v4423_v52 = vpop.eup %4422 }
 0x6dc   : > { %v2259_v51 = vsel %vm2243_vm10, %v4423_v52, 0.0 }
 0x6dd   : > { %2260 = vadd.xlane.f32.xlu1 %v2259_v51 }
 0x6ee   : > { %2568 = vrot.lane.b32.xlu1 %v5063_v24, %s4480_s4 }
 0x6ef   : > { %2268 = vrot.lane.b32.xlu0 %v5058_v21, %s4479_s29 }
 0x6f2   : > { %2566 = vrot.lane.b32.xlu1 %v5063_v24, %s4482_s13 }
 0x6f3   : > { %2516 = vrot.lane.b32.xlu0 %v5058_v21, %s4482_s13 }
 0x766   : > { %v2258_v23 = vpop.xlane.xlu0 %2257 }
 0x767   : > { %4424 = vrcp.f32 %v2258_v23 }
 0x76a   : > { %v2269_v29 = vpop.permute.xlu0 %2268  ;;  %v2261_v48 = vpop.xlane.xlu1 %2260 }
 0x76b   : > { %v2279_v12 = vand.u32 %v5082_v7, %v2269_v29  ;;  %4426 = vrcp.f32 %v2261_v48 }
 0x76d   : > { %4280 = vmatpush3.bf16.msra.mxu1 %v2279_v12 }
 0x76e   : > { %4291 = vmatprep.subr.bf16.mxu1 %v5453_v41  ;;  %v2569_v54 = vpop.permute.xlu1 %2568  ;;  %v2517_v44 = vpop.permute.xlu0 %2516 }
 0x76f   : > { %v2574_v40 = vsel %vm2145_vm9, %v2569_v54, 0 }
 0x771   : > { %v4425_v26 = vpop.eup %4424 }
 0x772   : > { %v2264_v39 = vmul.f32 %v4425_v26, %v4421_v28  ;;  %v2567_v46 = vpop.permute.xlu1 %2566 }
 0x774   : > { %v2266_v53 = vpack.c.bf16 %v2264_v39, %v2264_v39 }
 0x775   : > { %v4427_v34 = vpop.eup %4426 }
 0x776   : > { %v2265_v5 = vmul.f32 %v4427_v34, %v4423_v52  ;;  %4282 = vmatmul.mubr.msk.bf16.vlgmr.msra.gmra.mrb[8].mxu1 %vm2270_vm13, %v2266_v53 }
 0x777   : > { %4292 = vmatpush3.bf16.xpose.msra.mxu1 %v2524_v37  ;;  %4293 = vmatprep.mubr.msk.bf16.mxu1 %vm4477_vm8, %v5453_v41 }
 0x778   : > { %v2267_v4 = vpack.c.bf16 %v2265_v5, %v2265_v5  ;;  %4303 = vmatprep.subr.bf16.mxu1 %v5453_v41 }
 0x77a   : > { %4288 = vmatmul.mubr.msk.bf16.vlgmr.msra.gmra.mrb[4].mxu0 %vm2270_vm13, %v2267_v4 }
 0x77b   : > { %4298 = vmatpush3.bf16.xpose.msra.mxu0 %v2574_v40  ;;  %4299 = vmatprep.mubr.msk.bf16.mxu0 %vm4477_vm8, %v5453_v41 }
 0x77c   : > { %4309 = vmatprep.subr.bf16.mxu0 %v5453_v41 }
 0x77e   : > { %4294 = vmatmul.mubr.msk.bf16.vlgmr.msra.gmra.mrb[12].mxu1 %vm2145_vm9, %v2517_v44 }
 0x77f   : > { %4305 = vmatprep.mubr.msk.bf16.mxu1 %vm4477_vm8, %v5453_v41 }
 0x782   : > { %4300 = vmatmul.mubr.msk.bf16.vlgmr.msra.gmra.mrb[8].mxu0 %vm2145_vm9, %v2567_v46 }
 0x783   : > { %4311 = vmatprep.mubr.msk.bf16.mxu0 %vm4477_vm8, %v5453_v41 }
 0x849   : > { %v2315_v31 = vpop.f32.mrb[8].mxu1 }
 0x84a   : > { %v2371_v18 = vcombine.high %v2315_v31, %v2315_v31  ;;  %v2378_v19 = vrot.slane %v2315_v31, %v4830_v63  ;;  %v4283_v33 = vpop.f32.mrb[9].mxu1 }
 0x84b   : > { %v2318_v20 = vpop.f32.mrb[10].mxu1 }
 0x84c   : > { %v2386_v43 = vcombine.high %v2378_v19, %v2378_v19  ;;  %v4284_v47 = vpop.f32.mrb[11].mxu1  ;;  %v2385_v62 = vrot.slane %v2371_v18, %v4830_v63  ;;  %v2393_v1 = vrot.slane %v2378_v19, %v4830_v63 }
 0x84d   : > { %v2363_v56 = vpop.f32.mrb[4].mxu0 }
 0x84e   : > { %v2407_v57 = vrot.slane %v2386_v43, %v4830_v63  ;;  %v2410_v2 = vcombine.high %v2363_v56, %v2363_v56  ;;  %v2417_v58 = vrot.slane %v2363_v56, %v4830_v63  ;;  %v4289_v59 = vpop.f32.mrb[5].mxu0  ;;  %v2400_v16 = vrot.slane %v2385_v62, %v4830_v63 }
 0x84f   : > { %v2366_v6 = vpop.f32.mrb[6].mxu0 }
 0x850   : > { %v2449_v60 = vcombine.low %v2393_v1, %v2407_v57  ;;  %v4199_v61 = vcombine.high %v2393_v1, %v2407_v57  ;;  %v2424_v10 = vrot.slane %v2410_v2, %v4830_v63  ;;  %v2425_v0 = vcombine.high %v2417_v58, %v2417_v58  ;;  %v4290_v15 = vpop.f32.mrb[7].mxu0 }
 0x851   : > { %v2432_v32 = vrot.slane %v2417_v58, %v4830_v63  ;;  %v2560_v28 = vpop.f32.mrb[12].mxu1 }
 0x852   : > { %v2459_v17 = vrot.slane %v2449_v60, %v4830_v63  ;;  %v2446_v52 = vrot.slane %v2425_v0, %v4830_v63  ;;  %v4295_v51 = vpop.f32.mrb[13].mxu1  ;;  %v2466_v22 = vrot.slane %v4199_v61, %v4830_v63  ;;  %v2616_v48 = vmul.f32 0.25, %v2560_v28 }
 0x853   : > { %v2447_v23 = vcombine.high %v2432_v32, %v2432_v32  ;;  %v2451_v29 = vcombine.low %v2400_v16, %v2432_v32  ;;  %v2563_v12 = vpop.f32.mrb[14].mxu1  ;;  %v2439_v26 = vrot.slane %v2424_v10, %v4830_v63 }
 0x854   : > { %v2448_v39 = vcombine.high %v2446_v52, %v2446_v52  ;;  %v4296_v53 = vpop.f32.mrb[15].mxu1  ;;  %v2618_v5 = vsel %vm2243_vm10, %v2616_v48, -inf  ;;  %v2481_v44 = vcombine.low %v2459_v17, %v2466_v22 }
 0x855   : > { %v2452_v34 = vcombine.low %v2446_v52, %v2447_v23  ;;  %v2610_v37 = vpop.f32.mrb[8].mxu0  ;;  %2619 = vmax.xlane.f32.xlu0 %v2618_v5  ;;  %v2473_v46 = vrot.slane %v2451_v29, %v4830_v63 }
 0x856   : > { %v2498_v54 = vcombine.low %v2448_v39, %v2439_v26  ;;  %v2617_v4 = vmul.f32 0.25, %v2610_v37  ;;  %v4301_v40 = vpop.f32.mrb[9].mxu0  ;;  %v2489_v47 = vrot.slane %v2481_v44, %v4830_v63 }
 0x857   : > { %v2480_v31 = vrot.slane %v2452_v34, %v4830_v63  ;;  %v2613_v18 = vpop.f32.mrb[10].mxu0 }
 0x858   : > { %v4302_v19 = vpop.f32.mrb[11].mxu0  ;;  %v2621_v33 = vsel %vm2243_vm10, %v2617_v4, -inf  ;;  %v2505_v43 = vrot.slane %v2498_v54, %v4830_v63 }
 0x859   : > { %v2482_v20 = vcombine.low %v2473_v46, %v2480_v31  ;;  %2622 = vmax.xlane.f32.xlu1 %v2621_v33 }
 0x85a   : > { %v5132_v1 = vrot.slane %v2505_v43, %v4830_v63 }
 0x85b   : > { %v2496_v62 = vrot.slane %v2482_v20, %v4830_v63 }
 0x85d   : > { %v5129_v56 = vcombine.low %v2489_v47, %v2496_v62 }
 0x85f   : > { %v2515_v57 = vpack.c.bf16 %v5132_v1, %v5129_v56 }
 0x86a   : > { %2690 = vrot.lane.b32.xlu1 %v5063_v24, %s4483_s14 }
 0x8e2   : > { %v2620_v2 = vpop.xlane.xlu0 %2619 }
 0x8e3   : > { %v2624_v58 = vsub.f32 %v2616_v48, %v2620_v2 }
 0x8e5   : > { %v2626_v59 = vmul.f32 1.442695, %v2624_v58 }
 0x8e6   : > { %v2623_v6 = vpop.xlane.xlu1 %2622 }
 0x8e7   : > { %v2625_v60 = vsub.f32 %v2617_v4, %v2623_v6  ;;  %4428 = vpow2.f32 %v2626_v59 }
 0x8e9   : > { %v2628_v61 = vmul.f32 1.442695, %v2625_v60 }
 0x8ea   : > { %v2691_v10 = vpop.permute.xlu1 %2690 }
 0x8eb   : > { %4430 = vpow2.f32 %v2628_v61  ;;  %v2696_v0 = vand.u32 %v2691_v10, %v5082_v7 }
 0x8ed   : > { %4310 = vmatpush3.bf16.msra.mxu0 %v2696_v0 }
 0x8ee   : > { %4327 = vmatprep.subr.bf16.mxu0 %v5453_v41 }
 0x8f1   : > { %v4429_v15 = vpop.eup %4428 }
 0x8f2   : > { %v2630_v16 = vsel %vm2243_vm10, %v4429_v15, 0.0 }
 0x8f3   : > { %2631 = vadd.xlane.f32.xlu0 %v2630_v16 }
 0x8f5   : > { %v4431_v32 = vpop.eup %4430 }
 0x8f6   : > { %v2633_v24 = vsel %vm2243_vm10, %v4431_v32, 0.0 }
 0x8f7   : > { %2634 = vadd.xlane.f32.xlu0 %v2633_v24 }
 0x90d   : > { %2642 = vrot.lane.b32.xlu0 %v5058_v21, %s4483_s14 }
 0x980   : > { %v2632_v28 = vpop.xlane.xlu0 %2631 }
 0x981   : > { %4432 = vrcp.f32 %v2632_v28 }
 0x984   : > { %v2635_v17 = vpop.xlane.xlu0 %2634 }
 0x985   : > { %4434 = vrcp.f32 %v2635_v17 }
 0x988   : > { %v2643_v52 = vpop.permute.xlu0 %2642 }
 0x989   : > { %v2648_v51 = vand.u32 %v2643_v52, %v5082_v7  ;;  %v4408_v7 = vld [vmem:[%s4569_s25 + $0x8] sm:$0xff]  }
 0x98b   : > { %v4433_v22 = vpop.eup %4432  ;;  %4304 = vmatpush3.bf16.msra.mxu1 %v2648_v51 }
 0x98c   : > { %v2638_v23 = vmul.f32 %v4433_v22, %v4429_v15  ;;  %4315 = vmatprep.subr.bf16.mxu1 %v5453_v41 }
 0x98e   : > { %v2640_v29 = vpack.c.bf16 %v2638_v23, %v2638_v23 }
 0x98f   : > { %v4435_v48 = vpop.eup %4434 }
 0x990   : > { %v2639_v12 = vmul.f32 %v4435_v48, %v4431_v32  ;;  %4306 = vmatmul.mubr.msk.bf16.vlgmr.msra.gmra.mrb[16].mxu1 %vm2270_vm13, %v2640_v29 }
 0x991   : > { %4317 = vmatprep.mubr.msk.bf16.mxu1 %vm4477_vm8, %v5453_v41  ;;  %4316 = vmatpush3.bf16.msra.mxu1 %v4408_v7 }
 0x992   : > { %v2641_v21 = vpack.c.bf16 %v2639_v12, %v2639_v12  ;;  %4321 = vmatprep.subr.bf16.mxu1 %v5453_v41 }
 0x994   : > { %4312 = vmatmul.mubr.msk.bf16.vlgmr.msra.gmra.mrb[12].mxu0 %vm2270_vm13, %v2641_v21  ;;  %v4409_v21 = vld [vmem:[%s4569_s25] sm:$0xff]  }
 0x995   : > { %4331 = vmatprep.mubr.msk.bf16.mxu0 %vm4477_vm8, %v5453_v41 }
 0xa63   : > { %v2684_v26 = vpop.f32.mrb[16].mxu1 }
 0xa64   : > { %v2740_v39 = vcombine.high %v2684_v26, %v2684_v26  ;;  %v2747_v53 = vrot.slane %v2684_v26, %v4830_v63  ;;  %v4307_v34 = vpop.f32.mrb[17].mxu1  ;;  %v3081_v26 = vrot.slane %v4987_v55, %v4890_v42 }
 0xa65   : > { %v2687_v37 = vpop.f32.mrb[18].mxu1 }
 0xa66   : > { %v2755_v5 = vcombine.high %v2747_v53, %v2747_v53  ;;  %v4308_v54 = vpop.f32.mrb[19].mxu1  ;;  %v2754_v4 = vrot.slane %v2740_v39, %v4830_v63  ;;  %v2762_v44 = vrot.slane %v2747_v53, %v4830_v63  ;;  %v3083_v39 = vcombine.high %v3081_v26, %v3081_v26 }
 0xa67   : > { %v2732_v40 = vpop.f32.mrb[12].mxu0  ;;  %v3090_v53 = vrot.slane %v3081_v26, %v4830_v63 }
 0xa68   : > { %v2776_v46 = vrot.slane %v2755_v5, %v4830_v63  ;;  %v2779_v31 = vcombine.high %v2732_v40, %v2732_v40  ;;  %v2786_v18 = vrot.slane %v2732_v40, %v4830_v63  ;;  %v4313_v19 = vpop.f32.mrb[13].mxu0  ;;  %v2769_v58 = vrot.slane %v2754_v4, %v4830_v63 }
 0xa69   : > { %v2735_v33 = vpop.f32.mrb[14].mxu0  ;;  %v3097_v34 = vrot.slane %v3083_v39, %v4830_v63  ;;  %v3098_v37 = vcombine.high %v3090_v53, %v3090_v53  ;;  %v3106_v4 = vrot.slane %v3090_v53, %v4830_v63 }
 0xa6a   : > { %v2818_v20 = vcombine.low %v2762_v44, %v2776_v46  ;;  %v4204_v43 = vcombine.high %v2762_v44, %v2776_v46  ;;  %v2793_v47 = vrot.slane %v2779_v31, %v4830_v63  ;;  %v2794_v62 = vcombine.high %v2786_v18, %v2786_v18  ;;  %v4314_v2 = vpop.f32.mrb[15].mxu0 }
 0xa6b   : > { %v2801_v59 = vrot.slane %v2786_v18, %v4830_v63  ;;  %v3099_v54 = vcombine.high %v3097_v34, %v3097_v34  ;;  %v3113_v40 = vrot.slane %v3097_v34, %v4830_v63 }
 0xa6c   : > { %v2815_v6 = vrot.slane %v2794_v62, %v4830_v63  ;;  %v2828_v60 = vrot.slane %v2818_v20, %v4830_v63  ;;  %v2835_v61 = vrot.slane %v4204_v43, %v4830_v63  ;;  %v2808_v15 = vrot.slane %v2793_v47, %v4830_v63 }
 0xa6d   : > { %v2816_v10 = vcombine.high %v2801_v59, %v2801_v59  ;;  %v2820_v0 = vcombine.low %v2769_v58, %v2801_v59  ;;  %v3127_v20 = vrot.slane %v3099_v54, %v4830_v63  ;;  %v3128_v43 = vcombine.high %v3106_v4, %v3106_v4 }
 0xa6e   : > { %v2817_v16 = vcombine.high %v2815_v6, %v2815_v6  ;;  %v2850_v28 = vcombine.low %v2828_v60, %v2835_v61  ;;  %v3129_v47 = vcombine.high %v3113_v40, %v3113_v40 }
 0xa6f   : > { %v2821_v32 = vcombine.low %v2815_v6, %v2816_v10  ;;  %v2842_v17 = vrot.slane %v2820_v0, %v4830_v63 }
 0xa70   : > { %v2867_v24 = vcombine.low %v2817_v16, %v2808_v15  ;;  %v2858_v23 = vrot.slane %v2850_v28, %v4830_v63 }
 0xa71   : > { %v2849_v52 = vrot.slane %v2821_v32, %v4830_v63 }
 0xa72   : > { %v2874_v22 = vrot.slane %v2867_v24, %v4830_v63 }
 0xa73   : > { %v2851_v51 = vcombine.low %v2842_v17, %v2849_v52  ;;  %v3131_v17 = vcombine.high %v3127_v20, %v3127_v20 }
 0xa74   : > { %v2881_v12 = vrot.slane %v2874_v22, %v4830_v63 }
 0xa75   : > { %v2865_v29 = vrot.slane %v2851_v51, %v4830_v63 }
 0xa77   : > { %v2866_v48 = vcombine.low %v2858_v23, %v2865_v29 }
 0xa79   : > { %v2884_v7 = vpack.c.bf16 %v2881_v12, %v2866_v48 }
 0xa7b   : > { %4318 = vmatmul.mubr.msk.bf16.vlgmr.msra.gmra.mrb[20].mxu1 %vm2145_vm9, %v2884_v7 }
 0xa7c   : > { %4322 = vmatpush3.bf16.msra.mxu1 %v4409_v21  ;;  %4323 = vmatprep.mubr.msk.bf16.mxu1 %vm4477_vm8, %v5453_v41 }
 0xa87   : > { %4324 = vmatmul.mubr.msk.bf16.vlgmr.msra.gmra.mrb[20].mxu1 %vm2145_vm9, %v2515_v57  ;;  %v3120_v57 = vrot.slane %v3098_v37, %v4830_v63 }
 0xa89   : > { %v3130_v60 = vcombine.high %v3120_v57, %v3120_v57 }
 0xb5a   : > { %v2978_v5 = vpop.f32.mrb[20].mxu1 }
 0xb5b   : > { %v2987_v44 = vcombine.high %v2978_v5, %v2978_v5  ;;  %v2994_v56 = vrot.slane %v2978_v5, %v4830_v63  ;;  %v4325_v1 = vpop.f32.mrb[21].mxu1 }
 0xb5c   : > { %v2981_v46 = vpop.f32.mrb[22].mxu1 }
 0xb5d   : > { %v3001_v55 = vrot.slane %v2987_v44, %v4830_v63  ;;  %v3002_v31 = vcombine.high %v2994_v56, %v2994_v56  ;;  %v3010_v18 = vrot.slane %v2994_v56, %v4830_v63  ;;  %v3042_v19 = vrot.slane %v2981_v46, %v4830_v63  ;;  %v4326_v33 = vpop.f32.mrb[23].mxu1 }
 0xb5f   : > { %v3003_v62 = vcombine.high %v3001_v55, %v3001_v55  ;;  %v3017_v2 = vrot.slane %v3001_v55, %v4830_v63  ;;  %v3024_v58 = vrot.slane %v3002_v31, %v4830_v63  ;;  %v3032_v59 = vcombine.high %v3010_v18, %v3010_v18 }
 0xb60   : > { %v3068_v6 = vadd.f32 %v3010_v18, %v4837_v3  ;;  %v3043_v61 = vcombine.high %v3042_v19, %v3042_v19  ;;  %v3050_v10 = vrot.slane %v3042_v19, %v4830_v63 }
 0xb61   : > { %v3031_v0 = vrot.slane %v3003_v62, %v4830_v63  ;;  %v3033_v15 = vcombine.high %v3017_v2, %v3017_v2  ;;  %v3034_v16 = vcombine.high %v3024_v58, %v3024_v58  ;;  %v3069_v32 = vadd.f32 %v3024_v58, %v4846_v13 }
 0xb62   : > { %v3070_v24 = vadd.f32 %v3032_v59, %v4900_v49  ;;  %v3072_v28 = vadd.f32 %v3017_v2, %v4840_v9  ;;  %v3057_v52 = vrot.slane %v3043_v61, %v4830_v63  ;;  %v5202_v29 = vadd.f32 %v3106_v4, %v3068_v6 }
 0xb63   : > { %v3035_v51 = vcombine.high %v3031_v0, %v3031_v0  ;;  %v3071_v3 = vadd.f32 %v3034_v16, %v4904_v50  ;;  %v3073_v22 = vadd.f32 %v3031_v0, %v4843_v8  ;;  %v3074_v23 = vadd.f32 %v3033_v15, %v4849_v11 }
 0xb64   : > { %v5204_v48 = vadd.f32 %v3120_v57, %v3069_v32  ;;  %v5206_v12 = vadd.f32 %v3128_v43, %v3070_v24  ;;  %v3076_v13 = vadd.f32 %v3050_v10, %v4866_v27  ;;  %v5212_v21 = vadd.f32 %v3113_v40, %v3072_v28  ;;  %v5454_v32 = vld [vmem:[#allocation4_spill] sm:$0xff]  ;;  %v5455_v28 = vld [vmem:[#allocation5_spill] sm:$0xff] }
 0xb65   : > { %v3075_v9 = vadd.f32 %v3035_v51, %v4856_v30  ;;  %v5210_v49 = vadd.f32 %v3130_v60, %v3071_v3  ;;  %v5214_v7 = vadd.f32 %v3127_v20, %v3073_v22  ;;  %v3077_v8 = vadd.f32 %v3057_v52, %v4852_v14 }
 0xb66   : > { %v3160_v11 = vcombine.low %v5202_v29, %v5204_v48  ;;  %v5219_v50 = vadd.f32 %v3129_v47, %v3074_v23  ;;  %v5227_v39 = vadd.f32 %v3106_v4, %v3076_v13 }
 0xb67   : > { %v5221_v26 = vadd.f32 %v3131_v17, %v3075_v9  ;;  %v3161_v27 = vcombine.low %v5206_v12, %v5210_v49  ;;  %v3162_v30 = vcombine.low %v5212_v21, %v5214_v7  ;;  %v5229_v53 = vadd.f32 %v3120_v57, %v3077_v8 }
 0xb68   : > { %v3170_v34 = vrot.slane %v3160_v11, %v4830_v63 }
 0xb69   : > { %v3163_v14 = vcombine.low %v5219_v50, %v5221_v26  ;;  %v3177_v37 = vrot.slane %v3161_v27, %v4830_v63  ;;  %v3209_v5 = vcombine.low %v5227_v39, %v5229_v53  ;;  %v3184_v54 = vrot.slane %v3162_v30, %v4830_v63 }
 0xb6b   : > { %v3191_v40 = vrot.slane %v3163_v14, %v4830_v63  ;;  %v3192_v44 = vcombine.low %v3170_v34, %v3177_v37  ;;  %v3216_v4 = vrot.slane %v3209_v5, %v4830_v63 }
 0xb6d   : > { %v3193_v56 = vcombine.low %v3184_v54, %v3191_v40  ;;  %v3223_v1 = vrot.slane %v3216_v4, %v4830_v63  ;;  %v3200_v57 = vrot.slane %v3192_v44, %v4830_v63 }
 0xb6f   : > { %v3207_v46 = vrot.slane %v3193_v56, %v4830_v63  ;;  %v3229_v55 = vsel %vm1475_vm7, %v3223_v1, 0.0 }
 0xb70   : > { %3230 = vadd.xlane.f32.xlu0 %v3229_v55 }
 0xb71   : > { %v3208_v31 = vcombine.low %v3200_v57, %v3207_v46 }
 0xb73   : > { %v3226_v18 = vsel %vm1471_vm6, %v3208_v31, 0.0 }
 0xb74   : > { %3227 = vadd.xlane.f32.xlu1 %v3226_v18 }
 0xbfd   : > { %v3231_v19 = vpop.xlane.xlu0 %3230 }
 0xbfe   : > { %v3233_v33 = vmul.f32 0.03125, %v3231_v19 }
 0xc00   : > { %v3271_v20 = vrot.slane %v3233_v33, %v4882_v25  ;;  %v3275_v43 = vrot.slane %v3233_v33, %v4884_v35 }
 0xc01   : > { %v3228_v47 = vpop.xlane.xlu1 %3227 }
 0xc02   : > { %v3232_v62 = vmul.f32 0.03125, %v3228_v47  ;;  %v5248_v2 = vsub.f32 %v5227_v39, %v3271_v20  ;;  %v5251_v58 = vsub.f32 %v5229_v53, %v3275_v43 }
 0xc04   : > { %v3239_v59 = vrot.slane %v3232_v62, %v4882_v25  ;;  %v3243_v6 = vrot.slane %v3232_v62, %v4884_v35  ;;  %v3247_v60 = vrot.slane %v3232_v62, %v4886_v36  ;;  %v3251_v61 = vrot.slane %v3232_v62, %v4888_v38 }
 0xc05   : > { %v3304_v10 = vmul.f32 %v5248_v2, %v5248_v2  ;;  %v3305_v0 = vmul.f32 %v5251_v58, %v5251_v58  ;;  %v3255_v15 = vrot.slane %v3232_v62, %v4890_v42  ;;  %v3259_v16 = vrot.slane %v3232_v62, %v4892_v45 }
 0xc06   : > { %v3263_v24 = vrot.slane %v3232_v62, %v5454_v32  ;;  %v3267_v17 = vrot.slane %v3232_v62, %v5455_v28  ;;  %v5266_v52 = vsub.f32 %v5202_v29, %v3239_v59  ;;  %v5269_v51 = vsub.f32 %v5204_v48, %v3243_v6 }
 0xc07   : > { %v3365_v3 = vcombine.low %v3304_v10, %v3305_v0  ;;  %v5272_v22 = vsub.f32 %v5206_v12, %v3247_v60  ;;  %v5275_v23 = vsub.f32 %v5210_v49, %v3251_v61  ;;  %v5278_v13 = vsub.f32 %v5212_v21, %v3255_v15  ;;  %v4410_v60 = vld [vmem:[%s4574_s28] sm:$0xff]   ;;  %v4411_v61 = vld [vmem:[%s4574_s28 + $0x8] sm:$0xff]  }
 0xc08   : > { %v5281_v9 = vsub.f32 %v5214_v7, %v3259_v16  ;;  %v5284_v8 = vsub.f32 %v5219_v50, %v3263_v24  ;;  %v5287_v11 = vsub.f32 %v5221_v26, %v3267_v17  ;;  %v3296_v27 = vmul.f32 %v5266_v52, %v5266_v52  ;;  %4328 = vmatpush3.bf16.msra.mxu0 %v4410_v60  ;;  %v5320_v16 = vld [vmem:[%s4593_s26] sm:$0x3f] }
 0xc09   : > { %v3372_v30 = vrot.slane %v3365_v3, %v4830_v63  ;;  %v3297_v14 = vmul.f32 %v5269_v51, %v5269_v51  ;;  %v3298_v34 = vmul.f32 %v5272_v22, %v5272_v22  ;;  %v3299_v37 = vmul.f32 %v5275_v23, %v5275_v23  ;;  %4329 = vmatprep.subr.bf16.mxu0 %v5453_v41 }
 0xc0a   : > { %v3300_v5 = vmul.f32 %v5278_v13, %v5278_v13  ;;  %v3301_v54 = vmul.f32 %v5281_v9, %v5281_v9  ;;  %v3302_v40 = vmul.f32 %v5284_v8, %v5284_v8  ;;  %v3303_v44 = vmul.f32 %v5287_v11, %v5287_v11 }
 0xc0b   : > { %v3379_v4 = vrot.slane %v3372_v30, %v4830_v63  ;;  %v3316_v56 = vcombine.low %v3296_v27, %v3297_v14  ;;  %v3317_v1 = vcombine.low %v3298_v34, %v3299_v37  ;;  %v3459_v24 = vrot.slane %v5320_v16, %v4886_v36 }
 0xc0c   : > { %v3318_v57 = vcombine.low %v3300_v5, %v3301_v54  ;;  %v3319_v46 = vcombine.low %v3302_v40, %v3303_v44  ;;  %4330 = vmatpush3.bf16.msra.mxu0 %v4411_v61  ;;  %v3531_v17 = vrot.slane %v5320_v16, %v4888_v38 }
 0xc0d   : > { %v3385_v55 = vsel %vm1475_vm7, %v3379_v4, 0.0  ;;  %v3326_v31 = vrot.slane %v3316_v56, %v4830_v63  ;;  %v3333_v18 = vrot.slane %v3317_v1, %v4830_v63  ;;  %4335 = vmatprep.subr.bf16.mxu0 %v5453_v41  ;;  %v3461_v3 = vcombine.high %v3459_v24, %v3459_v24 }
 0xc0e   : > { %3386 = vadd.xlane.f32.xlu1 %v3385_v55  ;;  %v3340_v19 = vrot.slane %v3318_v57, %v4830_v63  ;;  %v3347_v33 = vrot.slane %v3319_v46, %v4830_v63  ;;  %v3468_v27 = vrot.slane %v3459_v24, %v4830_v63  ;;  %v3533_v30 = vcombine.high %v3531_v17, %v3531_v17 }
 0xc0f   : > { %v3348_v20 = vcombine.low %v3326_v31, %v3333_v18  ;;  %v3475_v37 = vrot.slane %v3461_v3, %v4830_v63  ;;  %v3540_v5 = vrot.slane %v3531_v17, %v4830_v63 }
 0xc10   : > { %v3349_v43 = vcombine.low %v3340_v19, %v3347_v33  ;;  %v3476_v54 = vcombine.high %v3468_v27, %v3468_v27  ;;  %v3547_v44 = vrot.slane %v3533_v30, %v4830_v63  ;;  %v3484_v56 = vrot.slane %v3468_v27, %v4830_v63 }
 0xc11   : > { %v3356_v47 = vrot.slane %v3348_v20, %v4830_v63  ;;  %v3548_v1 = vcombine.high %v3540_v5, %v3540_v5  ;;  %v3477_v57 = vcombine.high %v3475_v37, %v3475_v37  ;;  %v3556_v20 = vrot.slane %v3540_v5, %v4830_v63 }
 0xc12   : > { %v3363_v62 = vrot.slane %v3349_v43, %v4830_v63  ;;  %v3498_v46 = vrot.slane %v3476_v54, %v4830_v63  ;;  %v3549_v18 = vcombine.high %v3547_v44, %v3547_v44  ;;  %v3491_v43 = vrot.slane %v3475_v37, %v4830_v63 }
 0xc13   : > { %v3578_v24 = vcombine.high %v3556_v20, %v3556_v20 }
 0xc14   : > { %v3364_v59 = vcombine.low %v3356_v47, %v3363_v62  ;;  %v3505_v47 = vrot.slane %v3477_v57, %v4830_v63  ;;  %v3563_v62 = vrot.slane %v3547_v44, %v4830_v63  ;;  %v3577_v61 = vrot.slane %v3549_v18, %v4830_v63 }
 0xc16   : > { %v3382_v6 = vsel %vm1471_vm6, %v3364_v59, 0.0  ;;  %v3570_v59 = vrot.slane %v3548_v1, %v4830_v63 }
 0xc17   : > { %3383 = vadd.xlane.f32.xlu0 %v3382_v6 }
 0xc18   : > { %v3580_v30 = vcombine.high %v3570_v59, %v3570_v59 }
 0xc9b   : > { %v3387_v10 = vpop.xlane.xlu1 %3386 }
 0xc9c   : > { %v3389_v0 = vmul.f32 0.03125, %v3387_v10  ;;  %v3506_v10 = vcombine.high %v3484_v56, %v3484_v56 }
 0xc9e   : > { %v3391_v15 = vadd.f32 1e-05, %v3389_v0  ;;  %v3508_v0 = vcombine.high %v3498_v46, %v3498_v46 }
 0xca0   : > { %4436 = vrsqrt.f32 %v3391_v15  ;;  %v3507_v15 = vcombine.high %v3491_v43, %v3491_v43 }
 0xca4   : > { %v3384_v14 = vpop.xlane.xlu0 %3383 }
 0xca5   : > { %v3388_v34 = vmul.f32 0.03125, %v3384_v14  ;;  %v3581_v14 = vcombine.high %v3577_v61, %v3577_v61 }
 0xca7   : > { %v3390_v40 = vadd.f32 1e-05, %v3388_v34 }
 0xca9   : > { %4438 = vrsqrt.f32 %v3390_v40 }
 0xcaa   : > { %v4437_v4 = vpop.eup %4436 }
 0xcab   : > { %v3431_v55 = vrot.slane %v4437_v4, %v4882_v25  ;;  %v3435_v31 = vrot.slane %v4437_v4, %v4884_v35 }
 0xcad   : > { %v3454_v19 = vmul.f32 %v3431_v55, %v5248_v2  ;;  %v3455_v33 = vmul.f32 %v3435_v31, %v5251_v58  ;;  %v3509_v2 = vcombine.high %v3505_v47, %v3505_v47  ;;  %v3579_v58 = vcombine.high %v3563_v62, %v3563_v62 }
 0xcaf   : > { %v3526_v6 = vmul.f32 %v3484_v56, %v3454_v19  ;;  %v3527_v60 = vmul.f32 %v3498_v46, %v3455_v33 }
 0xcb1   : > { %v3598_v3 = vadd.f32 %v3556_v20, %v3526_v6  ;;  %v3599_v27 = vadd.f32 %v3570_v59, %v3527_v60 }
 0xcb3   : > { %v4439_v17 = vpop.eup %4438 }
 0xcb4   : > { %v3399_v34 = vrot.slane %v4439_v17, %v4882_v25  ;;  %v3403_v37 = vrot.slane %v4439_v17, %v4884_v35  ;;  %v3407_v5 = vrot.slane %v4439_v17, %v4886_v36  ;;  %v3411_v54 = vrot.slane %v4439_v17, %v4888_v38 }
 0xcb5   : > { %v3415_v40 = vrot.slane %v4439_v17, %v4890_v42  ;;  %v3419_v44 = vrot.slane %v4439_v17, %v4892_v45  ;;  %v3423_v4 = vrot.slane %v4439_v17, %v5454_v32  ;;  %v3427_v1 = vrot.slane %v4439_v17, %v5455_v28 }
 0xcb6   : > { %v3446_v57 = vmul.f32 %v3399_v34, %v5266_v52  ;;  %v3447_v55 = vmul.f32 %v3403_v37, %v5269_v51  ;;  %v3448_v25 = vmul.f32 %v3407_v5, %v5272_v22  ;;  %v3449_v35 = vmul.f32 %v3411_v54, %v5275_v23 }
 0xcb7   : > { %v3450_v36 = vmul.f32 %v3415_v40, %v5278_v13  ;;  %v3451_v38 = vmul.f32 %v3419_v44, %v5281_v9  ;;  %v3452_v42 = vmul.f32 %v3423_v4, %v5284_v8  ;;  %v3453_v31 = vmul.f32 %v3427_v1, %v5287_v11 }
 0xcb8   : > { %v3518_v18 = vmul.f32 %v3484_v56, %v3446_v57  ;;  %v3519_v32 = vmul.f32 %v3498_v46, %v3447_v55  ;;  %v3520_v19 = vmul.f32 %v3506_v10, %v3448_v25  ;;  %v3521_v28 = vmul.f32 %v3508_v0, %v3449_v35 }
 0xcb9   : > { %v3522_v33 = vmul.f32 %v3491_v43, %v3450_v36  ;;  %v3523_v52 = vmul.f32 %v3505_v47, %v3451_v38  ;;  %v3524_v6 = vmul.f32 %v3507_v15, %v3452_v42  ;;  %v3525_v51 = vmul.f32 %v3509_v2, %v3453_v31 }
 0xcba   : > { %v3590_v60 = vadd.f32 %v3556_v20, %v3518_v18  ;;  %v3591_v22 = vadd.f32 %v3570_v59, %v3519_v32  ;;  %v3592_v17 = vadd.f32 %v3578_v24, %v3520_v19  ;;  %v3593_v23 = vadd.f32 %v3580_v30, %v3521_v28  ;;  %v4415_v30 = vld [vmem:[%s4579_s11 + $0x18] sm:$0xff]  }
 0xcbb   : > { %v3594_v34 = vadd.f32 %v3563_v62, %v3522_v33  ;;  %v3595_v13 = vadd.f32 %v3577_v61, %v3523_v52  ;;  %v3596_v37 = vadd.f32 %v3579_v58, %v3524_v6  ;;  %v3597_v9 = vadd.f32 %v3581_v14, %v3525_v51  ;;  %v4412_v58 = vld [vmem:[%s4579_s11] sm:$0xff]  }
 0xcbc   : > { %v3610_v5 = vcombine.low %v3590_v60, %v3591_v22  ;;  %v3611_v8 = vcombine.low %v3592_v17, %v3593_v23  ;;  %v3659_v56 = vcombine.low %v3598_v3, %v3599_v27  ;;  %v4413_v3 = vld [vmem:[%s4579_s11 + $0x8] sm:$0xff]   ;;  %v4414_v27 = vld [vmem:[%s4579_s11 + $0x10] sm:$0xff]   ;;  %v4209_v14 = vld [vmem:[%s487_s23] ss:$0 sm:$0xff]  ;;  %v3759_v6 = vrot.slane %v5320_v16, %v4892_v45 }
 0xcbd   : > { %v3612_v54 = vcombine.low %v3594_v34, %v3595_v13  ;;  %v3613_v11 = vcombine.low %v3596_v37, %v3597_v9 }
 0xcbe   : > { %v3620_v46 = vrot.slane %v3610_v5, %v4830_v63  ;;  %v3627_v43 = vrot.slane %v3611_v8, %v4830_v63  ;;  %v3666_v61 = vrot.slane %v3659_v56, %v4830_v63 }
 0xcbf   : > { %v3634_v20 = vrot.slane %v3612_v54, %v4830_v63  ;;  %v3641_v47 = vrot.slane %v3613_v11, %v4830_v63 }
 0xcc0   : > { %v3642_v59 = vcombine.low %v3620_v46, %v3627_v43  ;;  %v3673_v2 = vrot.slane %v3666_v61, %v4830_v63 }
 0xcc1   : > { %v3643_v62 = vcombine.low %v3634_v20, %v3641_v47 }
 0xcc2   : > { %v3650_v10 = vrot.slane %v3642_v59, %v4830_v63 }
 0xcc3   : > { %v3657_v0 = vrot.slane %v3643_v62, %v4830_v63 }
 0xcc5   : > { %v3658_v15 = vcombine.low %v3650_v10, %v3657_v0 }
 0xcc7   : > { %v3676_v24 = vpack.c.bf16 %v3673_v2, %v3658_v15 }
 0xcc9   : > { %4332 = vmatmul.mubr.msk.bf16.vlgmr.msra.gmra.mrb[16].mxu0 %vm1471_vm6, %v3676_v24 }
 0xcca   : > { %4343 = vmatprep.mubr.msk.bf16.mxu0 %vm4477_vm8, %v5453_v41  ;;  %4336 = vmatpush3.bf16.msra.mxu0 %v4412_v58 }
 0xccb   : > { %4337 = vmatprep.subr.bf16.mxu0 %v5453_v41 }
 0xcce   : > { %4338 = vmatpush3.bf16.msra.mxu0 %v4413_v3 }
 0xccf   : > { %4339 = vmatprep.subr.bf16.mxu0 %v5453_v41 }
 0xcd2   : > { %4340 = vmatpush3.bf16.msra.mxu0 %v4414_v27 }
 0xcd3   : > { %4341 = vmatprep.subr.bf16.mxu0 %v5453_v41 }
 0xcd6   : > { %4342 = vmatpush3.bf16.msra.mxu0 %v4415_v30 }
 0xd9c   : > { %v3732_v40 = vpop.f32.mrb[16].mxu0 }
 0xd9d   : > { %v3733_v44 = vadd.f32 %v4209_v14, %v3732_v40  ;;  %v4333_v4 = vpop.f32.mrb[17].mxu0 }
 0xd9e   : > { %v3735_v1 = vpop.f32.mrb[18].mxu0 }
 0xd9f   : > { %v4213_v57 = vmul.f32 -1.702, %v3733_v44  ;;  %v3736_v55 = vadd.f32 %v4209_v14, %v3735_v1  ;;  %v4334_v25 = vpop.f32.mrb[19].mxu0 }
 0xda1   : > { %v3743_v35 = vmul.f32 1.442695, %v4213_v57  ;;  %v4214_v36 = vmul.f32 -1.702, %v3736_v55 }
 0xda3   : > { %4440 = vpow2.f32 %v3743_v35  ;;  %v3745_v38 = vmul.f32 1.442695, %v4214_v36 }
 0xda5   : > { %4442 = vpow2.f32 %v3745_v38 }
 0xdad   : > { %v4441_v42 = vpop.eup %4440 }
 0xdae   : > { %v3747_v41 = vadd.f32 1.0, %v4441_v42 }
 0xdaf   : > { %v4443_v31 = vpop.eup %4442 }
 0xdb0   : > { %4444 = vrcp.f32 %v3747_v41  ;;  %v3748_v18 = vadd.f32 1.0, %v4443_v31 }
 0xdb2   : > { %4446 = vrcp.f32 %v3748_v18 }
 0xdba   : > { %v4445_v32 = vpop.eup %4444 }
 0xdbb   : > { %v3753_v28 = vmul.f32 %v4445_v32, %v3733_v44 }
 0xdbc   : > { %v4447_v19 = vpop.eup %4446 }
 0xdbd   : > { %v3754_v33 = vmul.f32 %v4447_v19, %v3736_v55 }
 0xdbf   : > { %v3755_v52 = vpack.c.bf16 %v3754_v33, %v3753_v28 }
 0xdc1   : > { %4344 = vmatmul.mubr.msk.bf16.vlgmr.msra.gmra.mrb[20].mxu0 %vm3784_vm14, %v3755_v52 }
 0xe94   : > { %v3822_v51 = vpop.f32.mrb[20].mxu0 }
 0xe95   : > { %v3823_v60 = vadd.f32 %v3822_v51, %v3759_v6  ;;  %v4345_v22 = vpop.f32.mrb[21].mxu0 }
 0xe96   : > { %v3825_v17 = vpop.f32.mrb[22].mxu0 }
 0xe97   : > { %v3831_v23 = vcombine.high %v3823_v60, %v3823_v60  ;;  %v3838_v34 = vrot.slane %v3823_v60, %v4830_v63  ;;  %v3826_v13 = vadd.f32 %v3825_v17, %v3759_v6  ;;  %v4346_v37 = vpop.f32.mrb[23].mxu0 }
 0xe99   : > { %v3845_v9 = vrot.slane %v3831_v23, %v4830_v63  ;;  %v3846_v5 = vcombine.high %v3838_v34, %v3838_v34  ;;  %v3854_v8 = vrot.slane %v3838_v34, %v4830_v63  ;;  %v3886_v54 = vrot.slane %v3826_v13, %v4830_v63 }
 0xe9b   : > { %v3847_v11 = vcombine.high %v3845_v9, %v3845_v9  ;;  %v3861_v56 = vrot.slane %v3845_v9, %v4830_v63  ;;  %v3868_v45 = vrot.slane %v3846_v5, %v4830_v63  ;;  %v3876_v16 = vcombine.high %v3854_v8, %v3854_v8 }
 0xe9c   : > { %v3887_v46 = vcombine.high %v3886_v54, %v3886_v54  ;;  %v3894_v43 = vrot.slane %v3886_v54, %v4830_v63  ;;  %v3912_v61 = vadd.f32 %v3854_v8, %v5202_v29 }
 0xe9d   : > { %v3875_v20 = vrot.slane %v3847_v11, %v4830_v63  ;;  %v3877_v47 = vcombine.high %v3861_v56, %v3861_v56  ;;  %v3878_v59 = vcombine.high %v3868_v45, %v3868_v45  ;;  %v3913_v62 = vadd.f32 %v3868_v45, %v5204_v48 }
 0xe9e   : > { %v3914_v10 = vadd.f32 %v3876_v16, %v5206_v12  ;;  %v3916_v0 = vadd.f32 %v3861_v56, %v5212_v21  ;;  %v3901_v15 = vrot.slane %v3887_v46, %v4830_v63  ;;  %v3920_v30 = vadd.f32 %v3894_v43, %v5227_v39 }
 0xe9f   : > { %v3879_v2 = vcombine.high %v3875_v20, %v3875_v20  ;;  %v3915_v24 = vadd.f32 %v3878_v59, %v5210_v49  ;;  %v3917_v58 = vadd.f32 %v3875_v20, %v5214_v7  ;;  %v3918_v3 = vadd.f32 %v3877_v47, %v5219_v50 }
 0xea0   : > { %v3932_v27 = vcombine.low %v3912_v61, %v3913_v62  ;;  %v3921_v12 = vadd.f32 %v3901_v15, %v5229_v53  ;;  %v3954_v44 = vrot.slane %v3916_v0, %v4830_v63 }
 0xea1   : > { %v3933_v14 = vcombine.low %v3914_v10, %v3915_v24  ;;  %v3971_v48 = vcombine.low %v3917_v58, %v3918_v3  ;;  %v3919_v29 = vadd.f32 %v3879_v2, %v5221_v26 }
 0xea2   : > { %v3940_v21 = vrot.slane %v3932_v27, %v4830_v63  ;;  %v3993_v39 = vrot.slane %v3921_v12, %v4830_v63  ;;  %v3969_v26 = vrot.slane %v3954_v44, %v4830_v63 }
 0xea3   : > { %v3947_v40 = vrot.slane %v3933_v14, %v4830_v63  ;;  %v3972_v49 = vcombine.low %v3919_v29, %v3920_v30  ;;  %v3979_v7 = vrot.slane %v3971_v48, %v4830_v63 }
 0xea4   : > { %v4008_v25 = vrot.slane %v3993_v39, %v4830_v63 }
 0xea5   : > { %v3955_v4 = vcombine.low %v3940_v21, %v3947_v40  ;;  %v3986_v50 = vrot.slane %v3972_v49, %v4830_v63 }
 0xea7   : > { %v3962_v1 = vrot.slane %v3955_v4, %v4830_v63  ;;  %v3994_v57 = vcombine.low %v3979_v7, %v3986_v50 }
 0xea9   : > { %v3970_v53 = vcombine.low %v3962_v1, %v3969_v26  ;;  %v4001_v55 = vrot.slane %v3994_v57, %v4830_v63 }
 0xeab   : > { %4013 = vst.msk [vmem:[%s5437_s10] sm:$0x1f] %vm4012_vm15, %v3970_v53  ;;  %v4009_v35 = vcombine.low %v4001_v55, %v4008_v25 }
 0xead   : > { %4014 = vst.msk [vmem:[%s5437_s10 + $0x8] sm:$0x1f] %vm4012_vm15, %v4009_v35 }
 0xeae PF: > { %s20_s15 = sadd.s32 1, %s4471_s15   ;;  %s5456_s13 = sld [smem:[#allocation2_spill]] }
 0xeaf   : > { %p17_p6 = scmp.ge.s32.totalorder %s20_s15, 4   ;;  %s5457_s14 = sld [smem:[#allocation3_spill]] }
 0xeb1   :  { %19 = sbr.rel (!%p17_p6) target bundleno = 3 (0x3), region = 115 }

</bundles_post_ra>
